<compile_context>
chip_gen: v7x
topology: tpu7x:2x2x1
jax: 0.10.0
libtpu: 0.0.40
codegen_flags: <defaults>
</compile_context>

<pallas_src>
import functools
import math

import numpy as np
import jax
import jax.numpy as jnp
from jax.experimental import pallas as pl
from jax.experimental.pallas import tpu as pltpu


# ---------------------------------------------------------------------------
# 2D sin-cos positional embedding (numpy, same as the PyTorch reference)
# ---------------------------------------------------------------------------
def get_1d_sincos_pos_embed_from_grid(embed_dim, pos):
    assert embed_dim % 2 == 0
    omega = np.arange(embed_dim // 2, dtype=np.float32)
    omega /= embed_dim / 2.0
    omega = 1.0 / 10000 ** omega
    pos = pos.reshape(-1)
    out = np.einsum("m,d->md", pos, omega)
    return np.concatenate([np.sin(out), np.cos(out)], axis=1)


def get_2d_sincos_pos_embed_from_grid(embed_dim, grid):
    assert embed_dim % 2 == 0
    emb_h = get_1d_sincos_pos_embed_from_grid(embed_dim // 2, grid[0])
    emb_w = get_1d_sincos_pos_embed_from_grid(embed_dim // 2, grid[1])
    return np.concatenate([emb_h, emb_w], axis=1)


def get_2d_sincos_pos_embed(embed_dim, grid_size):
    grid_h = np.arange(grid_size, dtype=np.float32)
    grid_w = np.arange(grid_size, dtype=np.float32)
    grid = np.meshgrid(grid_w, grid_h)
    grid = np.stack(grid, axis=0).reshape([2, 1, grid_size, grid_size])
    return get_2d_sincos_pos_embed_from_grid(embed_dim, grid)


def _layernorm(z, gamma, beta, eps=1e-5):
    mu = jnp.mean(z, axis=-1, keepdims=True)
    var = jnp.mean(jnp.square(z - mu), axis=-1, keepdims=True)
    return (z - mu) * jax.lax.rsqrt(var + eps) * gamma + beta


# ---------------------------------------------------------------------------
# Pallas kernel: Resampler forward for a (Bt, N, KV) batch tile
# ---------------------------------------------------------------------------
def resampler_kernel(
    x_ref,              # (Bt, N, KV)     input block (pipelined)
    qh_ref,             # (H, Qn, hd_p)   pre-projected, pre-scaled, head-padded queries
    wkv_ref,            # (KV, E)         kv_proj weight
    gkv_ref, bkv_ref,   # (1, E) f32      ln_kv gamma/beta
    wkvp_ref,           # (E, 2*Ek)       fused head-padded [wk | wv] in-proj weight
    kvb_ref,            # (N, 2*Ek) cdt   fused bias: [pos@wk + bik | biv] (head-padded)
    wo_ref,             # (Ek, E)         out-proj weight (head-padded rows)
    bo_ref,             # (1, E) f32      out-proj bias
    out_ref,            # (Bt, Qn, E)
    *rest,              # [attn_ref (Bt, Qn, N)] + ctx scratch (Bt*Qn, Ek)
    num_heads: int,
    head_dim_padded: int,
    return_attn: bool,
    approx_recip: bool,
):
    if return_attn:
        attn_ref, ctx_scr = rest
    else:
        (ctx_scr,) = rest

    Bt, N, _ = x_ref.shape
    H = num_heads
    hd_p = head_dim_padded
    Ek = H * hd_p
    Qn = qh_ref.shape[1]
    E = wkv_ref.shape[1]
    cdt = wkvp_ref.dtype            # compute dtype for MXU inputs (f32 or bf16)

    # (1) kv projection -- batch rows folded into the matmul M dimension
    x2 = x_ref[...].reshape(Bt * N, -1)
    kv = jnp.dot(x2, wkv_ref[...], preferred_element_type=jnp.float32)        # (Bt*N, E) f32

    # (2) LayerNorm(kv) kept in f32
    mu = jnp.mean(kv, axis=-1, keepdims=True)
    var = jnp.mean(jnp.square(kv - mu), axis=-1, keepdims=True)
    kv = (kv - mu) * jax.lax.rsqrt(var + 1e-5) * gkv_ref[...] + bkv_ref[...]

    # (3) fused k/v in-projection; bias add in the compute dtype (smaller live intermediate);
    #     `key = kv + pos` is pre-folded into the k-bias columns of kvb.
    kvp = jnp.dot(kv.astype(cdt), wkvp_ref[...],
                  preferred_element_type=jnp.float32).astype(cdt)              # (Bt*N, 2*Ek)
    kvp = (kvp.reshape(Bt, N, 2 * Ek) + kvb_ref[...]).reshape(Bt * N, 2 * Ek)

    inv_h = 1.0 / H
    for h in range(H):               # static head loop
        # lane-aligned head slices (hd_p is a multiple of 128 when padding is on)
        k_flat = kvp[:, h * hd_p:(h + 1) * hd_p]                               # (Bt*N, hd_p)
        v_h = kvp[:, Ek + h * hd_p:Ek + (h + 1) * hd_p].reshape(Bt, N, hd_p)   # (Bt, N, hd_p)
        q_h = qh_ref[h]                                                        # (Qn, hd_p), pre-scaled

        # one wide QK^T MXU matmul covering the whole batch tile (q is batch-invariant)
        s = jax.lax.dot_general(q_h, k_flat, (((1,), (1,)), ((), ())),
                                preferred_element_type=jnp.float32)            # (Qn, Bt*N)
        s = s.reshape(Qn, Bt, N)
        s = s - jnp.max(s, axis=-1, keepdims=True)
        e = jnp.exp(s)
        denom = jnp.sum(e, axis=-1, keepdims=True)
        if approx_recip:
            # EUP slot; rows sum to ~1 only approximately (documented, gated by flag)
            p = e * pl.reciprocal(denom, approx=True)
        else:
            p = e / denom
        p_b = jnp.swapaxes(p, 0, 1)                                            # (Bt, Qn, N)

        if return_attn:
            contrib = (p_b * inv_h).astype(attn_ref.dtype)
            if h == 0:
                attn_ref[...] = contrib
            else:
                attn_ref[...] = attn_ref[...] + contrib

        ctx = jnp.einsum("bqn,bnd->bqd", p_b.astype(cdt), v_h,
                         preferred_element_type=jnp.float32)                   # (Bt, Qn, hd_p)
        # lane-aligned store into the per-head scratch slab (no concat, bounded live ranges)
        ctx_scr[:, h * hd_p:(h + 1) * hd_p] = ctx.reshape(Bt * Qn, hd_p).astype(cdt)

    # (4) out-projection
    out = jnp.dot(ctx_scr[...], wo_ref[...], preferred_element_type=jnp.float32) + bo_ref[...]
    out_ref[...] = out.reshape(Bt, Qn, E).astype(out_ref.dtype)


# ---------------------------------------------------------------------------
# Wrapper
# ---------------------------------------------------------------------------
def resampler_forward(x, params, num_heads, *, batch_tile=None, return_attn=True,
                      dtype=None, pad_head_dim=True, approx_reciprocal=True):
    B, N, KV = x.shape
    Qn, E = params["query"].shape
    assert N == Qn, "kernel assumes the identity get_abs_pos path (N == grid_size**2)"
    H = num_heads
    hd = E // H
    assert H * hd == E

    dtype = jnp.dtype(x.dtype if dtype is None else dtype)
    f32 = jnp.float32
    attn_dtype = dtype if return_attn else None

    LANE = 128
    hd_p = (-(-hd // LANE) * LANE) if pad_head_dim else hd
    Ek = H * hd_p

    # ---- batch-independent query path, hoisted out of the kernel ----
    query = params["query"].astype(f32)
    pos = params["pos_embed"].astype(f32)
    qn = _layernorm(query, params["ln_q_g"].astype(f32), params["ln_q_b"].astype(f32))
    scale = 1.0 / math.sqrt(hd)     # PyTorch MHA scales by (E // num_heads) ** -0.5
    q_full = ((qn + pos) @ params["wq"].astype(f32) + params["biq"].astype(f32)) * scale   # (Qn, E)
    q_heads = jnp.transpose(q_full.reshape(Qn, H, hd), (1, 0, 2))                          # (H, Qn, hd)
    if hd_p != hd:
        q_heads = jnp.pad(q_heads, ((0, 0), (0, 0), (0, hd_p - hd)))

    # ---- fused, head-padded k/v in-projection weight; pos folded into the k bias ----
    def pad_head_cols(w):            # (E, E) -> (E, Ek), per-head zero padding of columns
        w = w.reshape(E, H, hd)
        if hd_p != hd:
            w = jnp.pad(w, ((0, 0), (0, 0), (0, hd_p - hd)))
        return w.reshape(E, Ek)

    def pad_head_vec(b):             # (E,) -> (Ek,)
        b = b.reshape(H, hd)
        if hd_p != hd:
            b = jnp.pad(b, ((0, 0), (0, hd_p - hd)))
        return b.reshape(Ek)

    wk_p = pad_head_cols(params["wk"].astype(f32))
    wv_p = pad_head_cols(params["wv"].astype(f32))
    w_kv_fused = jnp.concatenate([wk_p, wv_p], axis=1)                         # (E, 2*Ek)
    k_bias = pos @ wk_p + pad_head_vec(params["bik"].astype(f32).reshape(-1))[None, :]
    v_bias = jnp.broadcast_to(
        pad_head_vec(params["biv"].astype(f32).reshape(-1))[None, :], (N, Ek))
    kv_bias = jnp.concatenate([k_bias, v_bias], axis=1)                        # (N, 2*Ek)

    wo = params["wo"].astype(f32).reshape(H, hd, E)
    if hd_p != hd:
        wo = jnp.pad(wo, ((0, 0), (0, hd_p - hd), (0, 0)))
    wo_p = wo.reshape(Ek, E)

    # ---- compute-dtype casts (LayerNorm / softmax / accumulation stay f32) ----
    x_c = x.astype(dtype)
    q_heads_c = q_heads.astype(dtype)
    wkv_c = params["wkv"].astype(dtype)
    w_kv_fused_c = w_kv_fused.astype(dtype)
    kv_bias_c = kv_bias.astype(dtype)
    wo_c = wo_p.astype(dtype)
    gkv = params["ln_kv_g"].astype(f32)
    bkv = params["ln_kv_b"].astype(f32)
    bo = params["bo"].astype(f32)

    # ---- batch-tile pick: ~256 matmul M rows (fills the 256-wide MXU on v6e/v7x) while
    #      keeping >= 2 grid steps for v7x megacore sharding + x/out pipelining ----
    if batch_tile is None:
        bt = max(1, min(B, -(-256 // N)))
        while bt > 1 and (B % bt != 0 or B // bt < 2):
            bt -= 1
        batch_tile = bt
    Bt = batch_tile
    assert B % Bt == 0, "batch_tile must divide B"

    kern = functools.partial(
        resampler_kernel, num_heads=H, head_dim_padded=hd_p,
        return_attn=return_attn, approx_recip=approx_reciprocal)

    # Constant operands: memory-space-only spec -> resident in VMEM, not double-buffered by
    # the grid pipeline (only the x tile and the outputs are pipelined per step).
    const_spec = pl.BlockSpec(memory_space=pltpu.MemorySpace.VMEM)
    in_specs = [
        pl.BlockSpec((Bt, N, KV), lambda b: (b, 0, 0)),   # x tile (pipelined)
        const_spec,   # q_heads   (H, Qn, hd_p)
        const_spec,   # wkv       (KV, E)
        const_spec,   # ln_kv gamma (1, E) f32
        const_spec,   # ln_kv beta  (1, E) f32
        const_spec,   # fused [wk|wv]  (E, 2*Ek)
        const_spec,   # fused k/v bias (N, 2*Ek)
        const_spec,   # wo (Ek, E)
        const_spec,   # bo (1, E) f32
    ]
    out_spec_main = pl.BlockSpec((Bt, Qn, E), lambda b: (b, 0, 0))
    out_shape_main = jax.ShapeDtypeStruct((B, Qn, E), dtype)
    if return_attn:
        out_specs = (out_spec_main, pl.BlockSpec((Bt, Qn, N), lambda b: (b, 0, 0)))
        out_shape = (out_shape_main, jax.ShapeDtypeStruct((B, Qn, N), attn_dtype))
    else:
        out_specs = out_spec_main
        out_shape = out_shape_main

    # ---- explicit VMEM budget + cost estimate ----
    def nbytes(shape, dt):
        return int(np.prod(shape)) * jnp.dtype(dt).itemsize

    weight_bytes = (nbytes((H, Qn, hd_p), dtype) + nbytes((KV, E), dtype)
                    + nbytes((E, 2 * Ek), dtype) + nbytes((N, 2 * Ek), dtype)
                    + nbytes((Ek, E), dtype) + 3 * nbytes((1, E), f32))
    pipe_bytes = 2 * (nbytes((Bt, N, KV), dtype) + nbytes((Bt, Qn, E), dtype))
    if return_attn:
        pipe_bytes += 2 * nbytes((Bt, Qn, N), attn_dtype)
    scratch_bytes = nbytes((Bt * Qn, Ek), dtype)
    vmem_limit = int(max(32 << 20, min(64 << 20,
                         2 * (weight_bytes + pipe_bytes + scratch_bytes) + (8 << 20))))

    flops = (2 * B * N * KV * E            # kv projection
             + 2 * B * N * E * (2 * Ek)    # fused k/v in-projection
             + 2 * B * Qn * N * Ek         # QK^T over all heads
             + 2 * B * Qn * N * Ek         # P @ V over all heads
             + 2 * B * Qn * Ek * E)        # out projection
    bytes_accessed = (nbytes((B, N, KV), dtype) + nbytes((B, Qn, E), dtype)
                      + (nbytes((B, Qn, N), attn_dtype) if return_attn else 0)
                      + weight_bytes)
    cost = pl.CostEstimate(flops=int(flops), transcendentals=int(B * H * Qn * N),
                           bytes_accessed=int(bytes_accessed))

    f = pl.pallas_call(
        kern,
        out_shape=out_shape,
        grid_spec=pltpu.PrefetchScalarGridSpec(
            num_scalar_prefetch=0,
            grid=(B // Bt,),
            in_specs=in_specs,
            out_specs=out_specs,
            scratch_shapes=[pltpu.VMEM((Bt * Qn, Ek), dtype)],
        ),
        compiler_params=pltpu.CompilerParams(
            dimension_semantics=("parallel",),
            vmem_limit_bytes=vmem_limit),
        cost_estimate=cost,
    )
    return f(x_c, q_heads_c, wkv_c, gkv, bkv, w_kv_fused_c, kv_bias_c, wo_c, bo)


# ---------------------------------------------------------------------------
# Pure-JAX reference (original unfused math) for a sanity check
# ---------------------------------------------------------------------------
def resampler_reference(x, params, num_heads):
    def ln(z, g, b, eps=1e-5):
        mu = jnp.mean(z, axis=-1, keepdims=True)
        var = jnp.mean((z - mu) ** 2, axis=-1, keepdims=True)
        return (z - mu) / jnp.sqrt(var + eps) * g + b

    B, N, KV = x.shape
    Qn, E = params["query"].shape
    hd = E // num_heads
    kv = jnp.einsum("bnk,ke->bne", x, params["wkv"])
    kv = ln(kv, params["ln_kv_g"], params["ln_kv_b"])
    qn = ln(params["query"], params["ln_q_g"], params["ln_q_b"])
    query = (qn + params["pos_embed"])[None].repeat(B, axis=0)
    key = kv + params["pos_embed"][None]
    value = kv
    q = jnp.einsum("bqe,ef->bqf", query, params["wq"]) + params["biq"]
    k = jnp.einsum("bne,ef->bnf", key, params["wk"]) + params["bik"]
    v = jnp.einsum("bne,ef->bnf", value, params["wv"]) + params["biv"]
    qh = q.reshape(B, Qn, num_heads, hd).transpose(0, 2, 1, 3) / math.sqrt(hd)
    kh = k.reshape(B, N, num_heads, hd).transpose(0, 2, 1, 3)
    vh = v.reshape(B, N, num_heads, hd).transpose(0, 2, 1, 3)
    s = jnp.einsum("bhqd,bhkd->bhqk", qh, kh)
    p = jax.nn.softmax(s, axis=-1)
    ctx = jnp.einsum("bhqk,bhkd->bhqd", p, vh)
    ctx = ctx.transpose(0, 2, 1, 3).reshape(B, Qn, E)
    out = jnp.einsum("bqe,ef->bqf", ctx, params["wo"]) + params["bo"]
    return out, p.mean(axis=1)


if __name__ == "__main__":
    grid_size = 4
    num_queries = grid_size ** 2     # 16
    embed_dim = 32
    num_heads = 4
    kv_dim = 64                      # != embed_dim -> real kv_proj Linear
    B = 4
    N = num_queries                  # identity get_abs_pos path

    key = jax.random.PRNGKey(0)
    keys = jax.random.split(key, 8)

    pos_embed = jnp.asarray(get_2d_sincos_pos_embed(embed_dim, grid_size), jnp.float32)

    params = {
        "query": 0.02 * jax.random.normal(keys[0], (num_queries, embed_dim), jnp.float32),
        "pos_embed": pos_embed,
        "wkv": 0.02 * jax.random.normal(keys[1], (kv_dim, embed_dim), jnp.float32),
        "ln_q_g": jnp.ones((1, embed_dim), jnp.float32),
        "ln_q_b": jnp.zeros((1, embed_dim), jnp.float32),
        "ln_kv_g": jnp.ones((1, embed_dim), jnp.float32),
        "ln_kv_b": jnp.zeros((1, embed_dim), jnp.float32),
        "wq": 0.02 * jax.random.normal(keys[2], (embed_dim, embed_dim), jnp.float32),
        "wk": 0.02 * jax.random.normal(keys[3], (embed_dim, embed_dim), jnp.float32),
        "wv": 0.02 * jax.random.normal(keys[4], (embed_dim, embed_dim), jnp.float32),
        "biq": jnp.zeros((1, embed_dim), jnp.float32),
        "bik": jnp.zeros((1, embed_dim), jnp.float32),
        "biv": jnp.zeros((1, embed_dim), jnp.float32),
        "wo": 0.02 * jax.random.normal(keys[5], (embed_dim, embed_dim), jnp.float32),
        "bo": jnp.zeros((1, embed_dim), jnp.float32),
    }

    x = jax.random.normal(keys[6], (B, N, kv_dim), jnp.float32)

    # f32 path with attention weights (auto batch_tile -> Bt=2, 2 parallel grid steps)
    out, attn = resampler_forward(x, params, num_heads, return_attn=True)
    jax.block_until_ready(out)
    jax.block_until_ready(attn)

    out_ref, attn_ref = resampler_reference(x, params, num_heads)
    np.testing.assert_allclose(np.asarray(out), np.asarray(out_ref), rtol=2e-3, atol=2e-3)
    np.testing.assert_allclose(np.asarray(attn), np.asarray(attn_ref), rtol=2e-3, atol=2e-3)

    # bf16 compute path, attention output disabled (production-style smoke test)
    out_bf16 = resampler_forward(x, params, num_heads, return_attn=False, dtype=jnp.bfloat16)
    jax.block_until_ready(out_bf16)
    out_bf16_np = np.asarray(out_bf16, dtype=np.float32)
    assert np.all(np.isfinite(out_bf16_np))
    np.testing.assert_allclose(out_bf16_np, np.asarray(out_ref), rtol=0.0, atol=3e-2)

    print("KERNEL_OK")
</pallas_src>

<mosaic_0001>
module attributes {stable_mosaic.version = 11 : i64} {
  func.func @resampler_kernel(%arg0: i32, %arg1: memref<2x16x64xf32, #tpu.memory_space<vmem>>, %arg2: memref<4x16x128xf32, #tpu.memory_space<vmem>>, %arg3: memref<64x32xf32, #tpu.memory_space<vmem>>, %arg4: memref<1x32xf32, #tpu.memory_space<vmem>>, %arg5: memref<1x32xf32, #tpu.memory_space<vmem>>, %arg6: memref<32x1024xf32, #tpu.memory_space<vmem>>, %arg7: memref<16x1024xf32, #tpu.memory_space<vmem>>, %arg8: memref<512x32xf32, #tpu.memory_space<vmem>>, %arg9: memref<1x32xf32, #tpu.memory_space<vmem>>, %arg10: memref<2x16x32xf32, #tpu.memory_space<vmem>>, %arg11: memref<2x16x16xf32, #tpu.memory_space<vmem>>, %arg12: memref<32x512xf32, #tpu.memory_space<vmem>>) attributes {dimension_semantics = [#tpu.dimension_semantics<parallel>], iteration_bounds = array<i64: 2>, scalar_prefetch = 0 : i64, scratch_operands = 1 : i64, tpu.core_type = #tpu.core_type<tc>, window_params = [{transform_indices = @transform_0, window_bounds = array<i64: 2, 16, 64>}, {pipeline_mode = #tpu.pipeline_mode<synchronous>, transform_indices = @transform_1, window_bounds = array<i64: 4, 16, 128>}, {pipeline_mode = #tpu.pipeline_mode<synchronous>, transform_indices = @transform_2, window_bounds = array<i64: 64, 32>}, {pipeline_mode = #tpu.pipeline_mode<synchronous>, transform_indices = @transform_3, window_bounds = array<i64: 1, 32>}, {pipeline_mode = #tpu.pipeline_mode<synchronous>, transform_indices = @transform_4, window_bounds = array<i64: 1, 32>}, {pipeline_mode = #tpu.pipeline_mode<synchronous>, transform_indices = @transform_5, window_bounds = array<i64: 32, 1024>}, {pipeline_mode = #tpu.pipeline_mode<synchronous>, transform_indices = @transform_6, window_bounds = array<i64: 16, 1024>}, {pipeline_mode = #tpu.pipeline_mode<synchronous>, transform_indices = @transform_7, window_bounds = array<i64: 512, 32>}, {pipeline_mode = #tpu.pipeline_mode<synchronous>, transform_indices = @transform_8, window_bounds = array<i64: 1, 32>}, {transform_indices = @transform_9, window_bounds = array<i64: 2, 16, 32>}, {transform_indices = @transform_10, window_bounds = array<i64: 2, 16, 16>}]} {
    %c0 = arith.constant 0 : index
    %c0_0 = arith.constant 0 : index
    %c0_1 = arith.constant 0 : index
    %0 = vector.load %arg1[%c0, %c0_0, %c0_1] : memref<2x16x64xf32, #tpu.memory_space<vmem>>, vector<2x16x64xf32>
    %1 = vector.shape_cast %0 : vector<2x16x64xf32> to vector<32x64xf32>
    %c0_2 = arith.constant 0 : index
    %c0_3 = arith.constant 0 : index
    %2 = vector.load %arg3[%c0_2, %c0_3] : memref<64x32xf32, #tpu.memory_space<vmem>>, vector<64x32xf32>
    %cst = arith.constant dense<0.000000e+00> : vector<32x32xf32>
    %3 = tpu.matmul %1, %2, %cst {dimension_numbers = #tpu.dot_dimension_numbers<[1], [0], [0], [1], [0, 0, 1, 1], [], []>} : vector<32x64xf32>, vector<64x32xf32>, vector<32x32xf32> -> vector<32x32xf32>
    %cst_4 = arith.constant dense<0.000000e+00> : vector<32xf32>
    %4 = vector.multi_reduction <add>, %3, %cst_4 [1] : vector<32x32xf32> to vector<32xf32>
    %5 = vector.shape_cast %4 : vector<32xf32> to vector<32x1xf32>
    %cst_5 = arith.constant 3.200000e+01 : f32
    %6 = vector.broadcast %cst_5 : f32 to vector<32x1xf32>
    %7 = arith.divf %5, %6 : vector<32x1xf32>
    %8 = vector.broadcast %7 : vector<32x1xf32> to vector<32x32xf32>
    %9 = arith.subf %3, %8 : vector<32x32xf32>
    %10 = arith.mulf %9, %9 : vector<32x32xf32>
    %cst_6 = arith.constant dense<0.000000e+00> : vector<32xf32>
    %11 = vector.multi_reduction <add>, %10, %cst_6 [1] : vector<32x32xf32> to vector<32xf32>
    %12 = vector.shape_cast %11 : vector<32xf32> to vector<32x1xf32>
    %cst_7 = arith.constant 3.200000e+01 : f32
    %13 = vector.broadcast %cst_7 : f32 to vector<32x1xf32>
    %14 = arith.divf %12, %13 : vector<32x1xf32>
    %15 = vector.broadcast %7 : vector<32x1xf32> to vector<32x32xf32>
    %16 = arith.subf %3, %15 : vector<32x32xf32>
    %cst_8 = arith.constant 9.99999974E-6 : f32
    %17 = vector.broadcast %cst_8 : f32 to vector<32x1xf32>
    %18 = arith.addf %14, %17 : vector<32x1xf32>
    %19 = math.rsqrt %18 : vector<32x1xf32>
    %20 = vector.broadcast %19 : vector<32x1xf32> to vector<32x32xf32>
    %21 = arith.mulf %16, %20 : vector<32x32xf32>
    %c0_9 = arith.constant 0 : index
    %c0_10 = arith.constant 0 : index
    %22 = vector.load %arg4[%c0_9, %c0_10] : memref<1x32xf32, #tpu.memory_space<vmem>>, vector<1x32xf32>
    %23 = vector.broadcast %22 : vector<1x32xf32> to vector<32x32xf32>
    %24 = arith.mulf %21, %23 : vector<32x32xf32>
    %c0_11 = arith.constant 0 : index
    %c0_12 = arith.constant 0 : index
    %25 = vector.load %arg5[%c0_11, %c0_12] : memref<1x32xf32, #tpu.memory_space<vmem>>, vector<1x32xf32>
    %26 = vector.broadcast %25 : vector<1x32xf32> to vector<32x32xf32>
    %27 = arith.addf %24, %26 : vector<32x32xf32>
    %c0_13 = arith.constant 0 : index
    %c0_14 = arith.constant 0 : index
    %28 = vector.load %arg6[%c0_13, %c0_14] : memref<32x1024xf32, #tpu.memory_space<vmem>>, vector<32x1024xf32>
    %cst_15 = arith.constant dense<0.000000e+00> : vector<32x1024xf32>
    %29 = tpu.matmul %27, %28, %cst_15 {dimension_numbers = #tpu.dot_dimension_numbers<[1], [0], [0], [1], [0, 0, 1, 1], [], []>} : vector<32x32xf32>, vector<32x1024xf32>, vector<32x1024xf32> -> vector<32x1024xf32>
    %30 = vector.shape_cast %29 : vector<32x1024xf32> to vector<2x16x1024xf32>
    %c0_16 = arith.constant 0 : index
    %c0_17 = arith.constant 0 : index
    %31 = vector.load %arg7[%c0_16, %c0_17] : memref<16x1024xf32, #tpu.memory_space<vmem>>, vector<16x1024xf32>
    %32 = vector.shape_cast %31 : vector<16x1024xf32> to vector<1x16x1024xf32>
    %33 = vector.broadcast %32 : vector<1x16x1024xf32> to vector<2x16x1024xf32>
    %34 = arith.addf %30, %33 : vector<2x16x1024xf32>
    %35 = vector.shape_cast %34 : vector<2x16x1024xf32> to vector<32x1024xf32>
    %36 = vector.extract_strided_slice %35 {offsets = [0, 0], sizes = [32, 128], strides = [1, 1]} : vector<32x1024xf32> to vector<32x128xf32>
    %37 = vector.extract_strided_slice %35 {offsets = [0, 512], sizes = [32, 128], strides = [1, 1]} : vector<32x1024xf32> to vector<32x128xf32>
    %38 = vector.shape_cast %37 : vector<32x128xf32> to vector<2x16x128xf32>
    %c0_18 = arith.constant 0 : index
    %c0_19 = arith.constant 0 : index
    %c0_20 = arith.constant 0 : index
    %39 = vector.load %arg2[%c0_18, %c0_19, %c0_20] : memref<4x16x128xf32, #tpu.memory_space<vmem>>, vector<1x16x128xf32>
    %40 = vector.shape_cast %39 : vector<1x16x128xf32> to vector<16x128xf32>
    %cst_21 = arith.constant dense<0.000000e+00> : vector<16x32xf32>
    %41 = tpu.matmul %40, %36, %cst_21 {dimension_numbers = #tpu.dot_dimension_numbers<[1], [1], [0], [0], [0, 0, 1, 0], [], []>} : vector<16x128xf32>, vector<32x128xf32>, vector<16x32xf32> -> vector<16x32xf32>
    %42 = vector.shape_cast %41 : vector<16x32xf32> to vector<16x2x16xf32>
    %cst_22 = arith.constant dense<0xFF800000> : vector<16x2xf32>
    %43 = vector.multi_reduction <maximumf>, %42, %cst_22 [2] : vector<16x2x16xf32> to vector<16x2xf32>
    %44 = vector.shape_cast %43 : vector<16x2xf32> to vector<16x2x1xf32>
    %45 = vector.broadcast %44 : vector<16x2x1xf32> to vector<16x2x16xf32>
    %46 = arith.subf %42, %45 : vector<16x2x16xf32>
    %47 = math.exp %46 : vector<16x2x16xf32>
    %cst_23 = arith.constant dense<0.000000e+00> : vector<16x2xf32>
    %48 = vector.multi_reduction <add>, %47, %cst_23 [2] : vector<16x2x16xf32> to vector<16x2xf32>
    %49 = vector.shape_cast %48 : vector<16x2xf32> to vector<16x2x1xf32>
    %50 = tpu.reciprocal %49 {approx = true} : vector<16x2x1xf32> -> vector<16x2x1xf32>
    %51 = vector.broadcast %50 : vector<16x2x1xf32> to vector<16x2x16xf32>
    %52 = arith.mulf %47, %51 : vector<16x2x16xf32>
    %53 = tpu.transpose %52, [1, 0, 2] : vector<16x2x16xf32> -> vector<2x16x16xf32>
    %cst_24 = arith.constant 2.500000e-01 : f32
    %54 = vector.broadcast %cst_24 : f32 to vector<2x16x16xf32>
    %55 = arith.mulf %53, %54 : vector<2x16x16xf32>
    %c0_25 = arith.constant 0 : index
    %c0_26 = arith.constant 0 : index
    %c0_27 = arith.constant 0 : index
    %56 = vector.load %arg11[%c0_25, %c0_26, %c0_27] : memref<2x16x16xf32, #tpu.memory_space<vmem>>, vector<2x16x16xf32>
    tpu.vector_store %arg11[%c0_25, %c0_26, %c0_27], %55 {strides = array<i32>} : memref<2x16x16xf32, #tpu.memory_space<vmem>>, vector<2x16x16xf32>,
    "tpu.trace_start"() <{level = 10 : i32, message = "bqn,bnd->bqd"}> : () -> ()
    %cst_28 = arith.constant dense<0.000000e+00> : vector<2x16x128xf32>
    %57 = tpu.matmul %53, %38, %cst_28 {dimension_numbers = #tpu.dot_dimension_numbers<[2], [1], [1], [2], [0, 0, 0, 1, 1, 2], [0], [0]>} : vector<2x16x16xf32>, vector<2x16x128xf32>, vector<2x16x128xf32> -> vector<2x16x128xf32>
    "tpu.trace_stop"() : () -> ()
    %58 = vector.shape_cast %57 : vector<2x16x128xf32> to vector<32x128xf32>
    %c0_29 = arith.constant 0 : index
    %c0_30 = arith.constant 0 : index
    %59 = vector.load %arg12[%c0_29, %c0_30] : memref<32x512xf32, #tpu.memory_space<vmem>>, vector<32x128xf32>
    tpu.vector_store %arg12[%c0_29, %c0_30], %58 {strides = array<i32>} : memref<32x512xf32, #tpu.memory_space<vmem>>, vector<32x128xf32>,
    %60 = vector.extract_strided_slice %35 {offsets = [0, 128], sizes = [32, 128], strides = [1, 1]} : vector<32x1024xf32> to vector<32x128xf32>
    %61 = vector.extract_strided_slice %35 {offsets = [0, 640], sizes = [32, 128], strides = [1, 1]} : vector<32x1024xf32> to vector<32x128xf32>
    %62 = vector.shape_cast %61 : vector<32x128xf32> to vector<2x16x128xf32>
    %c1 = arith.constant 1 : index
    %c0_31 = arith.constant 0 : index
    %c0_32 = arith.constant 0 : index
    %63 = vector.load %arg2[%c1, %c0_31, %c0_32] : memref<4x16x128xf32, #tpu.memory_space<vmem>>, vector<1x16x128xf32>
    %64 = vector.shape_cast %63 : vector<1x16x128xf32> to vector<16x128xf32>
    %cst_33 = arith.constant dense<0.000000e+00> : vector<16x32xf32>
    %65 = tpu.matmul %64, %60, %cst_33 {dimension_numbers = #tpu.dot_dimension_numbers<[1], [1], [0], [0], [0, 0, 1, 0], [], []>} : vector<16x128xf32>, vector<32x128xf32>, vector<16x32xf32> -> vector<16x32xf32>
    %66 = vector.shape_cast %65 : vector<16x32xf32> to vector<16x2x16xf32>
    %cst_34 = arith.constant dense<0xFF800000> : vector<16x2xf32>
    %67 = vector.multi_reduction <maximumf>, %66, %cst_34 [2] : vector<16x2x16xf32> to vector<16x2xf32>
    %68 = vector.shape_cast %67 : vector<16x2xf32> to vector<16x2x1xf32>
    %69 = vector.broadcast %68 : vector<16x2x1xf32> to vector<16x2x16xf32>
    %70 = arith.subf %66, %69 : vector<16x2x16xf32>
    %71 = math.exp %70 : vector<16x2x16xf32>
    %cst_35 = arith.constant dense<0.000000e+00> : vector<16x2xf32>
    %72 = vector.multi_reduction <add>, %71, %cst_35 [2] : vector<16x2x16xf32> to vector<16x2xf32>
    %73 = vector.shape_cast %72 : vector<16x2xf32> to vector<16x2x1xf32>
    %74 = tpu.reciprocal %73 {approx = true} : vector<16x2x1xf32> -> vector<16x2x1xf32>
    %75 = vector.broadcast %74 : vector<16x2x1xf32> to vector<16x2x16xf32>
    %76 = arith.mulf %71, %75 : vector<16x2x16xf32>
    %77 = tpu.transpose %76, [1, 0, 2] : vector<16x2x16xf32> -> vector<2x16x16xf32>
    %cst_36 = arith.constant 2.500000e-01 : f32
    %78 = vector.broadcast %cst_36 : f32 to vector<2x16x16xf32>
    %79 = arith.mulf %77, %78 : vector<2x16x16xf32>
    %c0_37 = arith.constant 0 : index
    %c0_38 = arith.constant 0 : index
    %c0_39 = arith.constant 0 : index
    %80 = vector.load %arg11[%c0_37, %c0_38, %c0_39] : memref<2x16x16xf32, #tpu.memory_space<vmem>>, vector<2x16x16xf32>
    %81 = arith.addf %80, %79 : vector<2x16x16xf32>
    %c0_40 = arith.constant 0 : index
    %c0_41 = arith.constant 0 : index
    %c0_42 = arith.constant 0 : index
    %82 = vector.load %arg11[%c0_40, %c0_41, %c0_42] : memref<2x16x16xf32, #tpu.memory_space<vmem>>, vector<2x16x16xf32>
    tpu.vector_store %arg11[%c0_40, %c0_41, %c0_42], %81 {strides = array<i32>} : memref<2x16x16xf32, #tpu.memory_space<vmem>>, vector<2x16x16xf32>,
    "tpu.trace_start"() <{level = 10 : i32, message = "bqn,bnd->bqd"}> : () -> ()
    %cst_43 = arith.constant dense<0.000000e+00> : vector<2x16x128xf32>
    %83 = tpu.matmul %77, %62, %cst_43 {dimension_numbers = #tpu.dot_dimension_numbers<[2], [1], [1], [2], [0, 0, 0, 1, 1, 2], [0], [0]>} : vector<2x16x16xf32>, vector<2x16x128xf32>, vector<2x16x128xf32> -> vector<2x16x128xf32>
    "tpu.trace_stop"() : () -> ()
    %84 = vector.shape_cast %83 : vector<2x16x128xf32> to vector<32x128xf32>
    %c0_44 = arith.constant 0 : index
    %c128 = arith.constant 128 : index
    %85 = vector.load %arg12[%c0_44, %c128] : memref<32x512xf32, #tpu.memory_space<vmem>>, vector<32x128xf32>
    tpu.vector_store %arg12[%c0_44, %c128], %84 {strides = array<i32>} : memref<32x512xf32, #tpu.memory_space<vmem>>, vector<32x128xf32>,
    %86 = vector.extract_strided_slice %35 {offsets = [0, 256], sizes = [32, 128], strides = [1, 1]} : vector<32x1024xf32> to vector<32x128xf32>
    %87 = vector.extract_strided_slice %35 {offsets = [0, 768], sizes = [32, 128], strides = [1, 1]} : vector<32x1024xf32> to vector<32x128xf32>
    %88 = vector.shape_cast %87 : vector<32x128xf32> to vector<2x16x128xf32>
    %c2 = arith.constant 2 : index
    %c0_45 = arith.constant 0 : index
    %c0_46 = arith.constant 0 : index
    %89 = vector.load %arg2[%c2, %c0_45, %c0_46] : memref<4x16x128xf32, #tpu.memory_space<vmem>>, vector<1x16x128xf32>
    %90 = vector.shape_cast %89 : vector<1x16x128xf32> to vector<16x128xf32>
    %cst_47 = arith.constant dense<0.000000e+00> : vector<16x32xf32>
    %91 = tpu.matmul %90, %86, %cst_47 {dimension_numbers = #tpu.dot_dimension_numbers<[1], [1], [0], [0], [0, 0, 1, 0], [], []>} : vector<16x128xf32>, vector<32x128xf32>, vector<16x32xf32> -> vector<16x32xf32>
    %92 = vector.shape_cast %91 : vector<16x32xf32> to vector<16x2x16xf32>
    %cst_48 = arith.constant dense<0xFF800000> : vector<16x2xf32>
    %93 = vector.multi_reduction <maximumf>, %92, %cst_48 [2] : vector<16x2x16xf32> to vector<16x2xf32>
    %94 = vector.shape_cast %93 : vector<16x2xf32> to vector<16x2x1xf32>
    %95 = vector.broadcast %94 : vector<16x2x1xf32> to vector<16x2x16xf32>
    %96 = arith.subf %92, %95 : vector<16x2x16xf32>
    %97 = math.exp %96 : vector<16x2x16xf32>
    %cst_49 = arith.constant dense<0.000000e+00> : vector<16x2xf32>
    %98 = vector.multi_reduction <add>, %97, %cst_49 [2] : vector<16x2x16xf32> to vector<16x2xf32>
    %99 = vector.shape_cast %98 : vector<16x2xf32> to vector<16x2x1xf32>
    %100 = tpu.reciprocal %99 {approx = true} : vector<16x2x1xf32> -> vector<16x2x1xf32>
    %101 = vector.broadcast %100 : vector<16x2x1xf32> to vector<16x2x16xf32>
    %102 = arith.mulf %97, %101 : vector<16x2x16xf32>
    %103 = tpu.transpose %102, [1, 0, 2] : vector<16x2x16xf32> -> vector<2x16x16xf32>
    %cst_50 = arith.constant 2.500000e-01 : f32
    %104 = vector.broadcast %cst_50 : f32 to vector<2x16x16xf32>
    %105 = arith.mulf %103, %104 : vector<2x16x16xf32>
    %c0_51 = arith.constant 0 : index
    %c0_52 = arith.constant 0 : index
    %c0_53 = arith.constant 0 : index
    %106 = vector.load %arg11[%c0_51, %c0_52, %c0_53] : memref<2x16x16xf32, #tpu.memory_space<vmem>>, vector<2x16x16xf32>
    %107 = arith.addf %106, %105 : vector<2x16x16xf32>
    %c0_54 = arith.constant 0 : index
    %c0_55 = arith.constant 0 : index
    %c0_56 = arith.constant 0 : index
    %108 = vector.load %arg11[%c0_54, %c0_55, %c0_56] : memref<2x16x16xf32, #tpu.memory_space<vmem>>, vector<2x16x16xf32>
    tpu.vector_store %arg11[%c0_54, %c0_55, %c0_56], %107 {strides = array<i32>} : memref<2x16x16xf32, #tpu.memory_space<vmem>>, vector<2x16x16xf32>,
    "tpu.trace_start"() <{level = 10 : i32, message = "bqn,bnd->bqd"}> : () -> ()
    %cst_57 = arith.constant dense<0.000000e+00> : vector<2x16x128xf32>
    %109 = tpu.matmul %103, %88, %cst_57 {dimension_numbers = #tpu.dot_dimension_numbers<[2], [1], [1], [2], [0, 0, 0, 1, 1, 2], [0], [0]>} : vector<2x16x16xf32>, vector<2x16x128xf32>, vector<2x16x128xf32> -> vector<2x16x128xf32>
    "tpu.trace_stop"() : () -> ()
    %110 = vector.shape_cast %109 : vector<2x16x128xf32> to vector<32x128xf32>
    %c0_58 = arith.constant 0 : index
    %c256 = arith.constant 256 : index
    %111 = vector.load %arg12[%c0_58, %c256] : memref<32x512xf32, #tpu.memory_space<vmem>>, vector<32x128xf32>
    tpu.vector_store %arg12[%c0_58, %c256], %110 {strides = array<i32>} : memref<32x512xf32, #tpu.memory_space<vmem>>, vector<32x128xf32>,
    %112 = vector.extract_strided_slice %35 {offsets = [0, 384], sizes = [32, 128], strides = [1, 1]} : vector<32x1024xf32> to vector<32x128xf32>
    %113 = vector.extract_strided_slice %35 {offsets = [0, 896], sizes = [32, 128], strides = [1, 1]} : vector<32x1024xf32> to vector<32x128xf32>
    %114 = vector.shape_cast %113 : vector<32x128xf32> to vector<2x16x128xf32>
    %c3 = arith.constant 3 : index
    %c0_59 = arith.constant 0 : index
    %c0_60 = arith.constant 0 : index
    %115 = vector.load %arg2[%c3, %c0_59, %c0_60] : memref<4x16x128xf32, #tpu.memory_space<vmem>>, vector<1x16x128xf32>
    %116 = vector.shape_cast %115 : vector<1x16x128xf32> to vector<16x128xf32>
    %cst_61 = arith.constant dense<0.000000e+00> : vector<16x32xf32>
    %117 = tpu.matmul %116, %112, %cst_61 {dimension_numbers = #tpu.dot_dimension_numbers<[1], [1], [0], [0], [0, 0, 1, 0], [], []>} : vector<16x128xf32>, vector<32x128xf32>, vector<16x32xf32> -> vector<16x32xf32>
    %118 = vector.shape_cast %117 : vector<16x32xf32> to vector<16x2x16xf32>
    %cst_62 = arith.constant dense<0xFF800000> : vector<16x2xf32>
    %119 = vector.multi_reduction <maximumf>, %118, %cst_62 [2] : vector<16x2x16xf32> to vector<16x2xf32>
    %120 = vector.shape_cast %119 : vector<16x2xf32> to vector<16x2x1xf32>
    %121 = vector.broadcast %120 : vector<16x2x1xf32> to vector<16x2x16xf32>
    %122 = arith.subf %118, %121 : vector<16x2x16xf32>
    %123 = math.exp %122 : vector<16x2x16xf32>
    %cst_63 = arith.constant dense<0.000000e+00> : vector<16x2xf32>
    %124 = vector.multi_reduction <add>, %123, %cst_63 [2] : vector<16x2x16xf32> to vector<16x2xf32>
    %125 = vector.shape_cast %124 : vector<16x2xf32> to vector<16x2x1xf32>
    %126 = tpu.reciprocal %125 {approx = true} : vector<16x2x1xf32> -> vector<16x2x1xf32>
    %127 = vector.broadcast %126 : vector<16x2x1xf32> to vector<16x2x16xf32>
    %128 = arith.mulf %123, %127 : vector<16x2x16xf32>
    %129 = tpu.transpose %128, [1, 0, 2] : vector<16x2x16xf32> -> vector<2x16x16xf32>
    %cst_64 = arith.constant 2.500000e-01 : f32
    %130 = vector.broadcast %cst_64 : f32 to vector<2x16x16xf32>
    %131 = arith.mulf %129, %130 : vector<2x16x16xf32>
    %c0_65 = arith.constant 0 : index
    %c0_66 = arith.constant 0 : index
    %c0_67 = arith.constant 0 : index
    %132 = vector.load %arg11[%c0_65, %c0_66, %c0_67] : memref<2x16x16xf32, #tpu.memory_space<vmem>>, vector<2x16x16xf32>
    %133 = arith.addf %132, %131 : vector<2x16x16xf32>
    %c0_68 = arith.constant 0 : index
    %c0_69 = arith.constant 0 : index
    %c0_70 = arith.constant 0 : index
    %134 = vector.load %arg11[%c0_68, %c0_69, %c0_70] : memref<2x16x16xf32, #tpu.memory_space<vmem>>, vector<2x16x16xf32>
    tpu.vector_store %arg11[%c0_68, %c0_69, %c0_70], %133 {strides = array<i32>} : memref<2x16x16xf32, #tpu.memory_space<vmem>>, vector<2x16x16xf32>,
    "tpu.trace_start"() <{level = 10 : i32, message = "bqn,bnd->bqd"}> : () -> ()
    %cst_71 = arith.constant dense<0.000000e+00> : vector<2x16x128xf32>
    %135 = tpu.matmul %129, %114, %cst_71 {dimension_numbers = #tpu.dot_dimension_numbers<[2], [1], [1], [2], [0, 0, 0, 1, 1, 2], [0], [0]>} : vector<2x16x16xf32>, vector<2x16x128xf32>, vector<2x16x128xf32> -> vector<2x16x128xf32>
    "tpu.trace_stop"() : () -> ()
    %136 = vector.shape_cast %135 : vector<2x16x128xf32> to vector<32x128xf32>
    %c0_72 = arith.constant 0 : index
    %c384 = arith.constant 384 : index
    %137 = vector.load %arg12[%c0_72, %c384] : memref<32x512xf32, #tpu.memory_space<vmem>>, vector<32x128xf32>
    tpu.vector_store %arg12[%c0_72, %c384], %136 {strides = array<i32>} : memref<32x512xf32, #tpu.memory_space<vmem>>, vector<32x128xf32>,
    %c0_73 = arith.constant 0 : index
    %c0_74 = arith.constant 0 : index
    %138 = vector.load %arg12[%c0_73, %c0_74] : memref<32x512xf32, #tpu.memory_space<vmem>>, vector<32x512xf32>
    %c0_75 = arith.constant 0 : index
    %c0_76 = arith.constant 0 : index
    %139 = vector.load %arg8[%c0_75, %c0_76] : memref<512x32xf32, #tpu.memory_space<vmem>>, vector<512x32xf32>
    %cst_77 = arith.constant dense<0.000000e+00> : vector<32x32xf32>
    %140 = tpu.matmul %138, %139, %cst_77 {dimension_numbers = #tpu.dot_dimension_numbers<[1], [0], [0], [1], [0, 0, 1, 1], [], []>} : vector<32x512xf32>, vector<512x32xf32>, vector<32x32xf32> -> vector<32x32xf32>
    %c0_78 = arith.constant 0 : index
    %c0_79 = arith.constant 0 : index
    %141 = vector.load %arg9[%c0_78, %c0_79] : memref<1x32xf32, #tpu.memory_space<vmem>>, vector<1x32xf32>
    %142 = vector.broadcast %141 : vector<1x32xf32> to vector<32x32xf32>
    %143 = arith.addf %140, %142 : vector<32x32xf32>
    %144 = vector.shape_cast %143 : vector<32x32xf32> to vector<2x16x32xf32>
    %c0_80 = arith.constant 0 : index
    %c0_81 = arith.constant 0 : index
    %c0_82 = arith.constant 0 : index
    %145 = vector.load %arg10[%c0_80, %c0_81, %c0_82] : memref<2x16x32xf32, #tpu.memory_space<vmem>>, vector<2x16x32xf32>
    tpu.vector_store %arg10[%c0_80, %c0_81, %c0_82], %144 {strides = array<i32>} : memref<2x16x32xf32, #tpu.memory_space<vmem>>, vector<2x16x32xf32>,
    return
  }
  func.func @transform_0(%arg0: i32) -> (i32, i32, i32) {
    %c0_i32 = arith.constant 0 : i32
    %c0_i32_0 = arith.constant 0 : i32
    %c0_i32_1 = arith.constant 0 : i32
    return %arg0, %c0_i32, %c0_i32_0 : i32, i32, i32
  }
  func.func @transform_1(%arg0: i32) -> (i32, i32, i32) {
    %c0_i32 = arith.constant 0 : i32
    %c0_i32_0 = arith.constant 0 : i32
    %c0_i32_1 = arith.constant 0 : i32
    %c0_i32_2 = arith.constant 0 : i32
    return %c0_i32, %c0_i32_0, %c0_i32_1 : i32, i32, i32
  }
  func.func @transform_2(%arg0: i32) -> (i32, i32) {
    %c0_i32 = arith.constant 0 : i32
    %c0_i32_0 = arith.constant 0 : i32
    %c0_i32_1 = arith.constant 0 : i32
    return %c0_i32, %c0_i32_0 : i32, i32
  }
  func.func @transform_3(%arg0: i32) -> (i32, i32) {
    %c0_i32 = arith.constant 0 : i32
    %c0_i32_0 = arith.constant 0 : i32
    %c0_i32_1 = arith.constant 0 : i32
    return %c0_i32, %c0_i32_0 : i32, i32
  }
  func.func @transform_4(%arg0: i32) -> (i32, i32) {
    %c0_i32 = arith.constant 0 : i32
    %c0_i32_0 = arith.constant 0 : i32
    %c0_i32_1 = arith.constant 0 : i32
    return %c0_i32, %c0_i32_0 : i32, i32
  }
  func.func @transform_5(%arg0: i32) -> (i32, i32) {
    %c0_i32 = arith.constant 0 : i32
    %c0_i32_0 = arith.constant 0 : i32
    %c0_i32_1 = arith.constant 0 : i32
    return %c0_i32, %c0_i32_0 : i32, i32
  }
  func.func @transform_6(%arg0: i32) -> (i32, i32) {
    %c0_i32 = arith.constant 0 : i32
    %c0_i32_0 = arith.constant 0 : i32
    %c0_i32_1 = arith.constant 0 : i32
    return %c0_i32, %c0_i32_0 : i32, i32
  }
  func.func @transform_7(%arg0: i32) -> (i32, i32) {
    %c0_i32 = arith.constant 0 : i32
    %c0_i32_0 = arith.constant 0 : i32
    %c0_i32_1 = arith.constant 0 : i32
    return %c0_i32, %c0_i32_0 : i32, i32
  }
  func.func @transform_8(%arg0: i32) -> (i32, i32) {
    %c0_i32 = arith.constant 0 : i32
    %c0_i32_0 = arith.constant 0 : i32
    %c0_i32_1 = arith.constant 0 : i32
    return %c0_i32, %c0_i32_0 : i32, i32
  }
  func.func @transform_9(%arg0: i32) -> (i32, i32, i32) {
    %c0_i32 = arith.constant 0 : i32
    %c0_i32_0 = arith.constant 0 : i32
    %c0_i32_1 = arith.constant 0 : i32
    return %arg0, %c0_i32, %c0_i32_0 : i32, i32, i32
  }
  func.func @transform_10(%arg0: i32) -> (i32, i32, i32) {
    %c0_i32 = arith.constant 0 : i32
    %c0_i32_0 = arith.constant 0 : i32
    %c0_i32_1 = arith.constant 0 : i32
    return %arg0, %c0_i32, %c0_i32_0 : i32, i32, i32
  }
}

</mosaic_0001>

<bundles_post_ra>
// kernel: tpu_custom_call.1
= control target key start
LH: loop header
LB: loop body
LE: loop exit
PB: predicated region body
PF: predicated region fallthrough
CT: control target
= control target key end

     0   :  { %s6794_s0 = inlined_call_operand.vmem [shape: f32[4,16,64], index: 0, kind: input, shape index: {}]   ;;  %s6795_s1 = inlined_call_operand.vmem [shape: f32[4,16,128], index: 1, kind: input, shape index: {}]   ;;  %s6796_s2 = inlined_call_operand.vmem [shape: f32[64,32], index: 2, kind: input, shape index: {}]   ;;  %s6797_s3 = inlined_call_operand.vmem [shape: f32[1,32], index: 3, kind: input, shape index: {}]   ;;  %s6798_s4 = inlined_call_operand.vmem [shape: f32[1,32], index: 4, kind: input, shape index: {}]   ;;  %s6799_s5 = inlined_call_operand.vmem [shape: f32[32,1024], index: 5, kind: input, shape index: {}]   ;;  %s6800_s6 = inlined_call_operand.vmem [shape: f32[16,1024], index: 6, kind: input, shape index: {}]   ;;  %s6801_s7 = inlined_call_operand.vmem [shape: f32[512,32], index: 7, kind: input, shape index: {}]   ;;  %s6802_s8 = inlined_call_operand.vmem [shape: f32[1,32], index: 8, kind: input, shape index: {}]   ;;  %s6803_s9 = inlined_call_operand.hbm [shape: f32[4,16,32], index: 9, kind: output, shape index: {0}]   ;;  %s6804_s10 = inlined_call_operand.hbm [shape: f32[4,16,16], index: 10, kind: output, shape index: {1}]  }
   0x1   :  { %6833 = sst [smem:[#allocation34_spill]] %s6794_s0 }
   0x2   :  { %6834 = sst [smem:[#allocation35_spill]] %s6795_s1 }
   0x3   :  { %16 = vsyncpa [#allocation4], 0 }
   0x4   :  { %18 = vsyncpa [#allocation4 + $0x1], 0 }
   0x5   :  { %19 = vsyncpa [#allocation6], 0 }
   0x6   :  { %21 = vsyncpa [#allocation6 + $0x1], 0  ;;  %s5095_s13 = smov 0   ;;  %s5097_s14 = smov 0  }
   0x7   :  { %s5099_s15 = smov 0   ;;  %s5101_s16 = smov 0  }
   0x8 LB: > { %s5116_s17 = sadd.s32 4294967295, %s5030_s16   ;;  %s4099_s18 = sadd.s32 4294967294, %s5030_s16   ;;  %s5030_s16 = sphi %s5101_s16, %s6894_s16   ;;  %s5026_s15 = sphi %s5099_s15, %s6893_s15   ;;  %s5022_s14 = sphi %s5097_s14, %s6892_s14   ;;  %s5018_s13 = sphi %s5095_s13, %s6891_s13  }
   0x9   : > { %s5120_s19 = sadd.s32 1, %s5030_s16   ;;  %s228_s20 = sadd.s32 1, %s5026_s15 }
   0xa   : > { %s225_s21 = ssub.s32 %s5030_s16, %s5120_s19  ;;  %p238_p0 = scmp.ne.s32.totalorder %s5026_s15, %s5022_s14 }
   0xb   : > { %p226_p1 = scmp.eq.s32.totalorder %s225_s21, 0  ;;  %p239_p2 = scmp.eq.s32.totalorder %s5116_s17, 1 }
   0xc   : > { %p244_p3 = scmp.ne.s32.totalorder %s5022_s14, %s5018_s13  ;;  %p245_p4 = scmp.eq.s32.totalorder %s4099_s18, 1 }
   0xd   : > { %s5131_s22 = scalar_select %p226_p1, %s5026_s15, %s228_s20  }
   0xe   : > { %p5133_p5 = por %p239_p2, %p238_p0  ;;  %p5137_p6 = por %p245_p4, %p244_p3 }
   0xf   : > { %p4102_p7 = scmp.ge.s32.totalorder %s5030_s16, 1  ;;  %p323_p8 = scmp.lt.s32.totalorder %s5030_s16, 3 }
  0x11   : > { %p324_p9 = pnand %p4102_p7, %p323_p8 }
  0x13   : > { %327 = sbr.rel (%p324_p9) target bundleno = 2760 (0xac8), region = 56 }
  0x1a   : > { %v380_v0 = vld [vmem:[%s6796_s2] sm:$0xff]  ;;  %v381_v1 = vld [vmem:[%s6796_s2 + $0x8] sm:$0xff]  ;;  %v382_v2 = vld [vmem:[%s6796_s2 + $0x10] sm:$0xff]  ;;  %s4105_s11 = sshll.u32 %s5116_s17, 1  ;;  %vm388_vm0 = vcmask 523264   ;;  %s6837_s0 = sld [smem:[#allocation34_spill]] }
  0x1b   : > { %v4446_v3 = vpack.c.bf16 %v381_v1, %v380_v0  ;;  %v383_v4 = vld [vmem:[%s6796_s2 + $0x18] sm:$0xff]  ;;  %p368_p10 = scmp.lt.s32.totalorder %s4105_s11, 3  ;;  %v384_v6 = vld [vmem:[%s6796_s2 + $0x20] sm:$0xff]  ;;  %v385_v7 = vld [vmem:[%s6796_s2 + $0x28] sm:$0xff]  ;;  %vm486_vm1 = vcmask 261120   ;;  %v6806_v56 = vmov 0.0  }
  0x1c   : > { %v4450_v5 = vpack.c.bf16 %v383_v4, %v382_v2  ;;  %v4454_v8 = vpack.c.bf16 %v385_v7, %v384_v6  ;;  %v386_v9 = vld [vmem:[%s6796_s2 + $0x30] sm:$0xff]  ;;  %v387_v10 = vld [vmem:[%s6796_s2 + $0x38] sm:$0xff]  ;;  %v563_v44 = vld [vmem:[%s6799_s5 + $0x8] sm:$0xff]  ;;  %670 = vmatprep.mubr.f32.mxu1 %v6806_v56  ;;  %s6838_s1 = sld [smem:[#allocation35_spill]]  ;;  %s5033_s12 = smov 112   ;;  %vm1227_vm2 = vcmask 123904  }
  0x1d   : > { %4447 = vmatprep.subr.bf16.mxu0 %v4446_v3  ;;  %s6896_s11 = smov (!%p368_p10, %s4105_s11), 3  ;;  %v4458_v12 = vpack.c.bf16 %v387_v10, %v386_v9  ;;  %v571_v45 = vld [vmem:[%s6799_s5 + $0x48] sm:$0xff]  ;;  %v565_v46 = vld [vmem:[%s6799_s5 + $0x18] sm:$0xff]  ;;  %v562_v49 = vld [vmem:[%s6799_s5] sm:$0xff]  ;;  %s6080_s18 = sand.u32 1, %s5022_s14   ;;  %vm1508_vm3 = vcmask 130048  }
  0x1e   : > { %4449 = vmatpush3.bf16.msra.mxu0 %v4446_v3  ;;  %s4163_s27 = sshll.u32 %s6896_s11, 4  ;;  %v4462_v47 = vpack.c.bf16 %v571_v45, %v563_v44  ;;  %v573_v48 = vld [vmem:[%s6799_s5 + $0x58] sm:$0xff]  ;;  %v570_v50 = vld [vmem:[%s6799_s5 + $0x40] sm:$0xff]  ;;  %v564_v53 = vld [vmem:[%s6799_s5 + $0x10] sm:$0xff]  ;;  %s6832_s20 = sshll.u32 %s6080_s18, 5 }
  0x1f   : > { %4451 = vmatprep.subr.bf16.mxu0 %v4450_v5  ;;  %v4470_v51 = vpack.c.bf16 %v573_v48, %v565_v46  ;;  %v4464_v52 = vpack.c.bf16 %v570_v50, %v562_v49  ;;  %v572_v54 = vld [vmem:[%s6799_s5 + $0x50] sm:$0xff]  ;;  %v579_v55 = vld [vmem:[%s6799_s5 + $0x88] sm:$0xff]  ;;  %v581_v59 = vld [vmem:[%s6799_s5 + $0x98] sm:$0xff]  ;;  %s3974_s28 = scalar_lea.sflag [#allocation6], %s6080_s18  ;;  %s5036_s30 = smov [#allocation5]  }
  0x20   : > { %s372_s21 = scalar_lea.vmem %s6837_s0, %s4163_s27  ;;  %4463 = vmatprep.subr.bf16.mxu1 %v4462_v47  ;;  %v4472_v57 = vpack.c.bf16 %v572_v54, %v564_v53  ;;  %v587_v58 = vld [vmem:[%s6799_s5 + $0xc8] sm:$0xff]  ;;  %v589_v60 = vld [vmem:[%s6799_s5 + $0xd8] sm:$0xff]  ;;  %v578_v63 = vld [vmem:[%s6799_s5 + $0x80] sm:$0xff] }
  0x21   : > { %v376_v11 = vld [vmem:[%s372_s21] sm:$0xff]  ;;  %v377_v13 = vld [vmem:[%s372_s21 + $0x8] sm:$0xff]  ;;  %v378_v14 = vld [vmem:[%s372_s21 + $0x10] sm:$0xff]  ;;  %4465 = vmatpush1.bf16.msra.mxu1 %v4464_v52  ;;  %v4466_v61 = vpack.c.bf16 %v587_v58, %v579_v55  ;;  %v4474_v62 = vpack.c.bf16 %v589_v60, %v581_v59 }
  0x22   : > { %4453 = vmatpush3.bf16.msra.mxu0 %v4450_v5  ;;  %4340 = vmatprep.mubr.msk.f32.mxu0 %vm388_vm0, %v376_v11  ;;  %v379_v15 = vld [vmem:[%s372_s21 + $0x18] sm:$0xff]  ;;  %v586_v0 = vld [vmem:[%s6799_s5 + $0xc0] sm:$0xff]  ;;  %v580_v1 = vld [vmem:[%s6799_s5 + $0x90] sm:$0xff]  ;;  %s6108_s21 = scalar_lea.vmem [#allocation5], %s6832_s20  ;;  %s4165_s20 = sshll.u32 %s5116_s17, 9 }
  0x23   : > { %4455 = vmatprep.subr.bf16.mxu0 %v4454_v8  ;;  %v4468_v2 = vpack.c.bf16 %v586_v0, %v578_v63  ;;  %v588_v3 = vld [vmem:[%s6799_s5 + $0xd0] sm:$0xff]  ;;  %4467 = vmatprep.subr.bf16.mxu1 %v4466_v61  ;;  %v567_v5 = vld [vmem:[%s6799_s5 + $0x28] sm:$0xff]  ;;  %v569_v7 = vld [vmem:[%s6799_s5 + $0x38] sm:$0xff]  ;;  %s6700_s27 = scalar_lea.hbm %s6804_s10, %s4165_s20  ;;  %s4005_s0 = sshll.u32 %s6108_s21, 4  ;;  %s6703_s0 = int_to_ptr.vmem [resolvable:$true] %s4005_s0 }
  0x24   : > { %v4476_v4 = vpack.c.bf16 %v588_v3, %v580_v1  ;;  %v575_v6 = vld [vmem:[%s6799_s5 + $0x68] sm:$0xff]  ;;  %v577_v9 = vld [vmem:[%s6799_s5 + $0x78] sm:$0xff]  ;;  %v582_v44 = vld [vmem:[%s6799_s5 + $0xa0] sm:$0xff]  ;;  %s4936_s29 = scalar_lea.vmem %s6703_s0, 512 }
  0x25   : > { %4469 = vmatpush1.bf16.msra.mxu1 %v4468_v2  ;;  %v4486_v10 = vpack.c.bf16 %v577_v9, %v569_v7  ;;  %v590_v49 = vld [vmem:[%s6799_s5 + $0xe0] sm:$0xff]  ;;  %v584_v50 = vld [vmem:[%s6799_s5 + $0xb0] sm:$0xff]  ;;  %v965_v7 = vld [vmem:[%s6800_s6 + $0x18] sm:$0xff]  ;;  %p4937_p11 = scmp.ne.s32.totalorder %s6703_s0, %s4936_s29 }
  0x26   : > { %4457 = vmatpush3.bf16.msra.mxu0 %v4454_v8  ;;  %v4478_v8 = vpack.c.bf16 %v575_v6, %v567_v5  ;;  %v4484_v52 = vpack.c.bf16 %v590_v49, %v582_v44  ;;  %v1010_v60 = vld [vmem:[%s6838_s1] sm:$0xff]  ;;  %v4134_v61 = vld [vmem:[%s6838_s1 + $0x10] sm:$0xff]  ;;  %v973_v9 = vld [vmem:[%s6800_s6 + $0x58] sm:$0xff] }
  0x27   : > { %4459 = vmatprep.subr.bf16.mxu0 %v4458_v12  ;;  %v962_v2 = vld [vmem:[%s6800_s6] sm:$0xff]  ;;  %v964_v3 = vld [vmem:[%s6800_s6 + $0x10] sm:$0xff]  ;;  %p4938_p12 = pnand %p4937_p11, %p5133_p5 }
  0x28   : > { %4479 = vmatprep.subr.bf16.mxu1 %v4478_v8  ;;  %v970_v5 = vld [vmem:[%s6800_s6 + $0x40] sm:$0xff]  ;;  %v972_v6 = vld [vmem:[%s6800_s6 + $0x50] sm:$0xff]  ;;  %v971_v8 = vld [vmem:[%s6800_s6 + $0x48] sm:$0xff] }
  0x29   : > { %p4939_p13 = pneg %p4938_p12 }
  0x2a   : > { %4461 = vmatpush3.bf16.msra.mxu0 %v4458_v12 }
  0x2b   : > { %4471 = vmatprep.subr.bf16.mxu0 %v4470_v51  ;;  %v592_v51 = vld [vmem:[%s6799_s5 + $0xf0] sm:$0xff] }
  0x2c   : > { %v4492_v53 = vpack.c.bf16 %v592_v51, %v584_v50  ;;  %v966_v51 = vld [vmem:[%s6800_s6 + $0x20] sm:$0xff] }
  0x2d   : > { %4341 = vmatmul.mubr.msk.f32.vlgmr.msra.gmra.mrb[0].mxu0 %vm388_vm0, %v377_v13 }
  0x2e   : > { %4343 = vmatprep.mubr.msk.f32.mxu0 %vm388_vm0, %v378_v14  ;;  %4473 = vmatpush1.bf16.msra.mxu0 %v4472_v57 }
  0x2f   : > { %4475 = vmatprep.subr.bf16.mxu0 %v4474_v62 }
  0x31   : > { %4344 = vmatmul.mubr.msk.f32.gmra.mrb[2].mxu0 %vm388_vm0, %v379_v15 }
  0x32   : > { %759 = vmatprep.mubr.f32.mxu0 %v6806_v56  ;;  %4477 = vmatpush1.bf16.msra.mxu0 %v4476_v4  ;;  %v963_v4 = vld [vmem:[%s6800_s6 + $0x8] sm:$0xff] }
  0x33   : > { %4487 = vmatprep.subr.bf16.mxu0 %v4486_v10 }
 0x100   : > { %v4342_v16 = vpop.f32.mrb[0].mxu0 }
 0x101   : > { %v467_v17 = vpop.f32.mrb[1].mxu0  ;;  %v490_v21 = vsel %vm486_vm1, %v4342_v16, 0.0 }
 0x102   : > { %v487_v18 = vsel %vm486_vm1, %v467_v17, 0.0 }
 0x103   : > { %488 = vadd.xlane.f32.xlu0 %v487_v18 }
 0x104   : > { %v4345_v19 = vpop.f32.mrb[2].mxu0 }
 0x105   : > { %v477_v20 = vpop.f32.mrb[3].mxu0  ;;  %v496_v23 = vsel %vm486_vm1, %v4345_v19, 0.0 }
 0x106   : > { %v493_v22 = vsel %vm486_vm1, %v477_v20, 0.0 }
 0x107   : > { %491 = vadd.xlane.f32.xlu0 %v490_v21  ;;  %494 = vadd.xlane.f32.xlu1 %v493_v22 }
 0x10b   : > { %497 = vadd.xlane.f32.xlu1 %v496_v23 }
 0x190   : > { %v489_v24 = vpop.xlane.xlu0 %488 }
 0x191   : > { %v500_v25 = vmul.f32 0.03125, %v489_v24  ;;  %v4112_v24 = vld [vmem:[%s6797_s3] ss:$0 sm:$0xff] }
 0x193   : > { %v5179_v26 = vsub.f32 %v467_v17, %v500_v25 }
 0x194   : > { %v492_v27 = vpop.xlane.xlu0 %491  ;;  %v495_v28 = vpop.xlane.xlu1 %494 }
 0x195   : > { %v501_v29 = vmul.f32 0.03125, %v492_v27  ;;  %v502_v30 = vmul.f32 0.03125, %v495_v28  ;;  %v508_v31 = vmul.f32 %v5179_v26, %v5179_v26  ;;  %v4113_v27 = vld [vmem:[%s6798_s4] ss:$0 sm:$0xff] }
 0x196   : > { %v566_v28 = vld [vmem:[%s6799_s5 + $0x20] sm:$0xff] }
 0x197   : > { %v5183_v32 = vsub.f32 %v4342_v16, %v501_v29  ;;  %v5185_v33 = vsub.f32 %v477_v20, %v502_v30  ;;  %v512_v34 = vsel %vm486_vm1, %v508_v31, 0.0  ;;  %v574_v29 = vld [vmem:[%s6799_s5 + $0x60] sm:$0xff]  ;;  %v568_v30 = vld [vmem:[%s6799_s5 + $0x30] sm:$0xff]  ;;  %v583_v31 = vld [vmem:[%s6799_s5 + $0xa8] sm:$0xff] }
 0x198   : > { %513 = vadd.xlane.f32.xlu0 %v512_v34  ;;  %v498_v35 = vpop.xlane.xlu1 %497 }
 0x199   : > { %v503_v36 = vmul.f32 0.03125, %v498_v35  ;;  %v509_v37 = vmul.f32 %v5183_v32, %v5183_v32  ;;  %v510_v38 = vmul.f32 %v5185_v33, %v5185_v33  ;;  %v591_v35 = vld [vmem:[%s6799_s5 + $0xe8] sm:$0xff] }
 0x19a   : > { %v4482_v47 = vpack.c.bf16 %v591_v35, %v583_v31 }
 0x19b   : > { %v5192_v39 = vsub.f32 %v4345_v19, %v503_v36  ;;  %v515_v40 = vsel %vm486_vm1, %v509_v37, 0.0  ;;  %v518_v41 = vsel %vm486_vm1, %v510_v38, 0.0  ;;  %v585_v36 = vld [vmem:[%s6799_s5 + $0xb8] sm:$0xff] }
 0x19c   : > { %516 = vadd.xlane.f32.xlu1 %v515_v40  ;;  %519 = vadd.xlane.f32.xlu0 %v518_v41  ;;  %v593_v37 = vld [vmem:[%s6799_s5 + $0xf8] sm:$0xff] }
 0x19d   : > { %v511_v42 = vmul.f32 %v5192_v39, %v5192_v39  ;;  %v4490_v48 = vpack.c.bf16 %v593_v37, %v585_v36 }
 0x19f   : > { %v521_v43 = vsel %vm486_vm1, %v511_v42, 0.0  ;;  %v4480_v42 = vpack.c.bf16 %v574_v29, %v566_v28 }
 0x1a0   : > { %522 = vadd.xlane.f32.xlu1 %v521_v43 }
 0x225   : > { %v514_v11 = vpop.xlane.xlu0 %513 }
 0x226   : > { %v524_v12 = vmul.f32 0.03125, %v514_v11 }
 0x228   : > { %v528_v13 = vadd.f32 1e-05, %v524_v12 }
 0x229   : > { %v520_v14 = vpop.xlane.xlu0 %519  ;;  %v517_v15 = vpop.xlane.xlu1 %516 }
 0x22a   : > { %4672 = vrsqrt.f32 %v528_v13  ;;  %v526_v16 = vmul.f32 0.03125, %v520_v14  ;;  %v525_v17 = vmul.f32 0.03125, %v517_v15 }
 0x22c   : > { %v530_v18 = vadd.f32 1e-05, %v526_v16  ;;  %v529_v19 = vadd.f32 1e-05, %v525_v17 }
 0x22d   : > { %v523_v20 = vpop.xlane.xlu1 %522 }
 0x22e   : > { %4674 = vrsqrt.f32 %v530_v18  ;;  %v527_v21 = vmul.f32 0.03125, %v523_v20 }
 0x22f   : > { %4676 = vrsqrt.f32 %v529_v19 }
 0x230   : > { %v531_v22 = vadd.f32 1e-05, %v527_v21 }
 0x232   : > { %4678 = vrsqrt.f32 %v531_v22 }
 0x234   : > { %v4673_v23 = vpop.eup %4672 }
 0x235   : > { %v536_v25 = vmul.f32 %v4673_v23, %v5179_v26  ;;  %v576_v26 = vld [vmem:[%s6799_s5 + $0x70] sm:$0xff] }
 0x236   : > { %v4488_v43 = vpack.c.bf16 %v576_v26, %v568_v30 }
 0x237   : > { %v547_v34 = vmul.f32 %v4112_v24, %v536_v25 }
 0x238   : > { %v4675_v38 = vpop.eup %4674 }
 0x239   : > { %v4677_v40 = vpop.eup %4676  ;;  %v558_v41 = vadd.f32 %v4113_v27, %v547_v34  ;;  %v538_v46 = vmul.f32 %v4675_v38, %v5185_v33 }
 0x23a   : > { %v537_v45 = vmul.f32 %v4677_v40, %v5183_v32 }
 0x23b   : > { %4114 = vmatmul.mubr.msk.f32.vlgmr.msra.gmra.mrb[0].mxu1 %vm486_vm1, %v558_v41  ;;  %4118 = vmatmul.mubr.msk.f32.vlgmr.msra.gmra.mrb[4].mxu0 %vm486_vm1, %v558_v41  ;;  %v549_v55 = vmul.f32 %v4112_v24, %v538_v46 }
 0x23c   : > { %v4679_v32 = vpop.eup %4678  ;;  %676 = vmatprep.mubr.f32.mxu1 %v6806_v56  ;;  %765 = vmatprep.mubr.f32.mxu0 %v6806_v56  ;;  %v548_v33 = vmul.f32 %v4112_v24, %v537_v45 }
 0x23d   : > { %4481 = vmatpush1.bf16.msra.mxu1 %v4480_v42  ;;  %4489 = vmatpush1.bf16.msra.mxu0 %v4488_v43  ;;  %v539_v57 = vmul.f32 %v4679_v32, %v5192_v39  ;;  %v560_v58 = vadd.f32 %v4113_v27, %v549_v55  ;;  %v968_v32 = vld [vmem:[%s6800_s6 + $0x30] sm:$0xff] }
 0x23e   : > { %v559_v54 = vadd.f32 %v4113_v27, %v548_v33  ;;  %4483 = vmatprep.subr.bf16.mxu1 %v4482_v47  ;;  %4491 = vmatprep.subr.bf16.mxu0 %v4490_v48  ;;  %v976_v55 = vld [vmem:[%s6800_s6 + $0x70] sm:$0xff] }
 0x23f   : > { %v550_v59 = vmul.f32 %v4112_v24, %v539_v57  ;;  %v969_v57 = vld [vmem:[%s6800_s6 + $0x38] sm:$0xff] }
 0x240   : > { %4115 = vmatmul.mubr.msk.f32.gmra.mrb[2].mxu1 %vm486_vm1, %v559_v54  ;;  %4119 = vmatmul.mubr.msk.f32.gmra.mrb[6].mxu0 %vm486_vm1, %v559_v54 }
 0x241   : > { %682 = vmatprep.mubr.f32.mxu1 %v6806_v56  ;;  %771 = vmatprep.mubr.f32.mxu0 %v6806_v56  ;;  %v561_v39 = vadd.f32 %v4113_v27, %v550_v59  ;;  %v977_v59 = vld [vmem:[%s6800_s6 + $0x78] sm:$0xff] }
 0x242   : > { %4485 = vmatpush1.bf16.msra.mxu1 %v4484_v52  ;;  %4493 = vmatpush1.bf16.msra.mxu0 %v4492_v53  ;;  %v967_v53 = vld [vmem:[%s6800_s6 + $0x28] sm:$0xff] }
 0x244   : > { %4116 = vmatmul.mubr.msk.f32.gmra.mrb[4].mxu1 %vm486_vm1, %v560_v58  ;;  %4120 = vmatmul.mubr.msk.f32.gmra.mrb[8].mxu0 %vm486_vm1, %v560_v58 }
 0x245   : > { %688 = vmatprep.mubr.f32.mxu1 %v6806_v56  ;;  %777 = vmatprep.mubr.f32.mxu0 %v6806_v56 }
 0x248   : > { %4117 = vmatmul.mubr.msk.f32.gmra.mrb[6].mxu1 %vm486_vm1, %v561_v39  ;;  %4121 = vmatmul.mubr.msk.f32.gmra.mrb[10].mxu0 %vm486_vm1, %v561_v39 }
 0x249   : > { %848 = vmatprep.mubr.f32.mxu1 %v6806_v56  ;;  %937 = vmatprep.mubr.f32.mxu0 %v6806_v56 }
 0x24c   : > { %4122 = vmatmul.mubr.msk.f32.vlgmr.msra.gmra.mrb[8].mxu1 %vm486_vm1, %v558_v41  ;;  %4126 = vmatmul.mubr.msk.f32.vlgmr.msra.gmra.mrb[12].mxu0 %vm486_vm1, %v558_v41 }
 0x24d   : > { %854 = vmatprep.mubr.f32.mxu1 %v6806_v56  ;;  %943 = vmatprep.mubr.f32.mxu0 %v6806_v56 }
 0x250   : > { %4123 = vmatmul.mubr.msk.f32.gmra.mrb[10].mxu1 %vm486_vm1, %v559_v54  ;;  %4127 = vmatmul.mubr.msk.f32.gmra.mrb[14].mxu0 %vm486_vm1, %v559_v54  ;;  %v974_v54 = vld [vmem:[%s6800_s6 + $0x60] sm:$0xff] }
 0x251   : > { %860 = vmatprep.mubr.f32.mxu1 %v6806_v56  ;;  %949 = vmatprep.mubr.f32.mxu0 %v6806_v56 }
 0x254   : > { %4124 = vmatmul.mubr.msk.f32.gmra.mrb[12].mxu1 %vm486_vm1, %v560_v58  ;;  %4128 = vmatmul.mubr.msk.f32.gmra.mrb[16].mxu0 %vm486_vm1, %v560_v58  ;;  %v975_v58 = vld [vmem:[%s6800_s6 + $0x68] sm:$0xff] }
 0x255   : > { %866 = vmatprep.mubr.f32.mxu1 %v6806_v56  ;;  %955 = vmatprep.mubr.f32.mxu0 %v6806_v56 }
 0x258   : > { %4125 = vmatmul.mubr.msk.f32.gmra.mrb[14].mxu1 %vm486_vm1, %v561_v39  ;;  %4129 = vmatmul.mubr.msk.f32.gmra.mrb[18].mxu0 %vm486_vm1, %v561_v39 }
 0x259   : > { %4354 = vmatprep.mubr.f32.mxu1 %v1010_v60  ;;  %4379 = vmatprep.mubr.f32.mxu0 %v4134_v61 }
 0x30e   : > { %v672_v62 = vpop.f32.mrb[0].mxu1  ;;  %v761_v63 = vpop.f32.mrb[4].mxu0 }
 0x30f   : > { %v674_v0 = vpop.f32.mrb[1].mxu1  ;;  %v763_v1 = vpop.f32.mrb[5].mxu0  ;;  %v978_v12 = vadd.f32 %v962_v2, %v672_v62  ;;  %v980_v13 = vadd.f32 %v964_v3, %v761_v63 }
 0x310   : > { %v979_v18 = vadd.f32 %v963_v4, %v674_v0  ;;  %v981_v19 = vadd.f32 %v965_v7, %v763_v1 }
 0x313   : > { %v678_v10 = vpop.f32.mrb[2].mxu1  ;;  %v767_v11 = vpop.f32.mrb[6].mxu0 }
 0x314   : > { %v986_v14 = vadd.f32 %v970_v5, %v678_v10  ;;  %v988_v15 = vadd.f32 %v972_v6, %v767_v11  ;;  %v680_v16 = vpop.f32.mrb[3].mxu1  ;;  %v769_v17 = vpop.f32.mrb[7].mxu0  ;;  %v4135_v10 = vld [vmem:[%s6838_s1 + $0x18] sm:$0xff] }
 0x315   : > { %v987_v20 = vadd.f32 %v971_v8, %v680_v16  ;;  %v989_v21 = vadd.f32 %v973_v9, %v769_v17 }
 0x316   : > { %v4494_v22 = vpack.c.bf16 %v986_v14, %v978_v12  ;;  %v5367_v23 = vpack.c.bf16 %v988_v15, %v980_v13  ;;  %v4140_v15 = vld [vmem:[%s6838_s1 + $0x20] sm:$0xff] }
 0x317   : > { %v4510_v24 = vpack.c.bf16 %v987_v20, %v979_v18  ;;  %v5369_v25 = vpack.c.bf16 %v989_v21, %v981_v19  ;;  %v684_v27 = vpop.f32.mrb[4].mxu1  ;;  %v773_v28 = vpop.f32.mrb[8].mxu0 }
 0x318   : > { %v686_v29 = vpop.f32.mrb[5].mxu1  ;;  %v775_v30 = vpop.f32.mrb[9].mxu0  ;;  %4495 = vmatprep.subr.bf16.mxu1 %v4494_v22  ;;  %v994_v34 = vadd.f32 %v962_v2, %v684_v27  ;;  %v996_v35 = vadd.f32 %v964_v3, %v773_v28 }
 0x319   : > { %6839 = vst [vmem:[#allocation9_spill] sm:$0xff] %v5369_v25  ;;  %4497 = vmatpush3.bf16.xpose.msra.mxu1 %v4494_v22  ;;  %4511 = vmatprep.subr.bf16.mxu0 %v4510_v24  ;;  %v995_v41 = vadd.f32 %v963_v4, %v686_v29  ;;  %v997_v42 = vadd.f32 %v965_v7, %v775_v30  ;;  %v1011_v7 = vld [vmem:[%s6838_s1 + $0x8] sm:$0xff] }
 0x31a   : > { %4513 = vmatpush3.bf16.xpose.msra.mxu0 %v4510_v24 }
 0x31b   : > { %v690_v26 = vpop.f32.mrb[6].mxu1  ;;  %v779_v31 = vpop.f32.mrb[10].mxu0 }
 0x31c   : > { %v1002_v36 = vadd.f32 %v970_v5, %v690_v26  ;;  %v1004_v37 = vadd.f32 %v972_v6, %v779_v31  ;;  %v692_v38 = vpop.f32.mrb[7].mxu1  ;;  %v781_v40 = vpop.f32.mrb[11].mxu0 }
 0x31d   : > { %v1003_v43 = vadd.f32 %v971_v8, %v692_v38  ;;  %v1005_v44 = vadd.f32 %v973_v9, %v781_v40 }
 0x31e   : > { %v4498_v45 = vpack.c.bf16 %v1002_v36, %v994_v34  ;;  %v5371_v46 = vpack.c.bf16 %v1004_v37, %v996_v35  ;;  %v4141_v37 = vld [vmem:[%s6838_s1 + $0x28] sm:$0xff] }
 0x31f   : > { %v4514_v47 = vpack.c.bf16 %v1003_v43, %v995_v41  ;;  %v5373_v48 = vpack.c.bf16 %v1005_v44, %v997_v42  ;;  %v850_v49 = vpop.f32.mrb[8].mxu1  ;;  %v939_v50 = vpop.f32.mrb[12].mxu0 }
 0x320   : > { %v852_v33 = vpop.f32.mrb[9].mxu1  ;;  %v941_v52 = vpop.f32.mrb[13].mxu0  ;;  %4499 = vmatprep.subr.bf16.mxu1 %v4498_v45  ;;  %v982_v61 = vadd.f32 %v966_v51, %v850_v49  ;;  %v984_v62 = vadd.f32 %v968_v32, %v939_v50 }
 0x321   : > { %6840 = vst [vmem:[#allocation10_spill] sm:$0xff] %v5373_v48  ;;  %4501 = vmatpush3.bf16.xpose.msra.mxu1 %v4498_v45  ;;  %4515 = vmatprep.subr.bf16.mxu0 %v4514_v47  ;;  %v983_v3 = vadd.f32 %v967_v53, %v852_v33  ;;  %v985_v4 = vadd.f32 %v969_v57, %v941_v52  ;;  %v5034_v45 = vmov 1983009808  }
 0x322   : > { %4517 = vmatpush3.bf16.xpose.msra.mxu0 %v4514_v47  ;;  %v1099_v47 = vlaneseq }
 0x323   : > { %v856_v39 = vpop.f32.mrb[10].mxu1  ;;  %v945_v60 = vpop.f32.mrb[14].mxu0  ;;  %4527 = vmatprep.subr.bf16.mxu0 %v5367_v23 }
 0x324   : > { %v990_v63 = vadd.f32 %v974_v54, %v856_v39  ;;  %v992_v0 = vadd.f32 %v976_v55, %v945_v60  ;;  %v858_v1 = vpop.f32.mrb[11].mxu1  ;;  %v947_v2 = vpop.f32.mrb[15].mxu0  ;;  %v1100_v50 = vshrl.u32 %v1099_v47, 7 }
 0x325   : > { %v991_v5 = vadd.f32 %v975_v58, %v858_v1  ;;  %v993_v6 = vadd.f32 %v977_v59, %v947_v2 }
 0x326   : > { %v4502_v8 = vpack.c.bf16 %v990_v63, %v982_v61  ;;  %v5403_v9 = vpack.c.bf16 %v992_v0, %v984_v62 }
 0x327   : > { %v5408_v11 = vpack.c.bf16 %v991_v5, %v983_v3  ;;  %v4550_v12 = vpack.c.bf16 %v993_v6, %v985_v4  ;;  %v862_v13 = vpop.f32.mrb[12].mxu1  ;;  %v951_v14 = vpop.f32.mrb[16].mxu0 }
 0x328   : > { %6841 = vst [vmem:[#allocation11_spill] sm:$0xff] %v5403_v9  ;;  %v864_v16 = vpop.f32.mrb[13].mxu1  ;;  %v953_v17 = vpop.f32.mrb[17].mxu0  ;;  %4355 = vmatmul.mubr.f32.vlgmr.msra.gmra.mrb[16].mxu1 %v1011_v7  ;;  %4503 = vmatprep.subr.bf16.mxu1 %v4502_v8  ;;  %v998_v20 = vadd.f32 %v966_v51, %v862_v13  ;;  %v1000_v21 = vadd.f32 %v968_v32, %v951_v14  ;;  %v5035_v51 = vmov 1934713408  }
 0x329   : > { %6842 = vst [vmem:[#allocation12_spill] sm:$0xff] %v5408_v11  ;;  %4505 = vmatpush3.bf16.msra.mxu1 %v4502_v8  ;;  %4380 = vmatmul.mubr.f32.vlgmr.msra.gmra.mrb[20].mxu0 %v4135_v10  ;;  %v999_v29 = vadd.f32 %v967_v53, %v864_v16  ;;  %v1001_v30 = vadd.f32 %v969_v57, %v953_v17  ;;  %v1128_v32 = vunpack.c.l.s4 %v5035_v51 }
 0x32a   : > { %4529 = vmatpush3.bf16.xpose.msra.mxu0 %v5367_v23  ;;  %4404 = vmatprep.mubr.f32.mxu0 %v4140_v15 }
 0x32b   : > { %v868_v18 = vpop.f32.mrb[14].mxu1  ;;  %v957_v19 = vpop.f32.mrb[18].mxu0  ;;  %4531 = vmatprep.subr.bf16.mxu0 %v5371_v46  ;;  %v1129_v52 = vunpack.c.0.s8 %v1128_v32 }
 0x32c   : > { %v1006_v22 = vadd.f32 %v974_v54, %v868_v18  ;;  %v1008_v24 = vadd.f32 %v976_v55, %v957_v19  ;;  %v870_v27 = vpop.f32.mrb[15].mxu1  ;;  %v959_v28 = vpop.f32.mrb[19].mxu0 }
 0x32d   : > { %v1007_v26 = vadd.f32 %v975_v58, %v870_v27  ;;  %v1009_v31 = vadd.f32 %v977_v59, %v959_v28  ;;  %v5455_v59 = vsub.s32 %v1129_v52, %v1100_v50 }
 0x32e   : > { %v5415_v34 = vpack.c.bf16 %v1006_v22, %v998_v20  ;;  %v5417_v35 = vpack.c.bf16 %v1008_v24, %v1000_v21 }
 0x32f   : > { %v5419_v23 = vpack.c.bf16 %v1007_v26, %v999_v29  ;;  %v5421_v36 = vpack.c.bf16 %v1009_v31, %v1001_v30 }
 0x330   : > { %6843 = vst [vmem:[#allocation13_spill] sm:$0xff] %v5415_v34  ;;  %6844 = vst [vmem:[#allocation14_spill] sm:$0xff] %v5417_v35  ;;  %4507 = vmatprep.subr.bf16.mxu1 %v5415_v34 }
 0x331   : > { %6845 = vst [vmem:[#allocation15_spill] sm:$0xff] %v5419_v23  ;;  %6846 = vst [vmem:[#allocation16_spill] sm:$0xff] %v5421_v36 }
 0x332   : > { %4533 = vmatpush3.bf16.xpose.msra.mxu0 %v5371_v46  ;;  %v1097_v46 = vunpack.c.l.s4 %v5034_v45 }
 0x333   : > { %4551 = vmatprep.subr.bf16.mxu0 %v4550_v12 }
 0x334   : > { %v1098_v49 = vunpack.c.0.s8 %v1097_v46 }
 0x336   : > { %v5450_v33 = vsub.s32 %v1098_v49, %v1100_v50 }
 0x339   : > { %4405 = vmatmul.mubr.f32.vlgmr.msra.gmra.mrb[22].mxu0 %v4141_v37 }
 0x33a   : > { %4553 = vmatpush3.bf16.msra.mxu0 %v4550_v12 }
 0x33b   : > { %4555 = vmatprep.subr.bf16.mxu0 %v5421_v36 }
 0x3fb   : > { %v4356_v38 = vpop.f32.mrb[16].mxu1 }
 0x3fc   : > { %1091 = vrot.lane.b32.xlu1 %v4356_v38, %s5033_s12  ;;  %v5430_v40 = vpop.f32.mrb[17].mxu1  ;;  %v5432_v41 = vpop.f32.mrb[20].mxu0  ;;  %v1168_v54 = vrot.slane %v4356_v38, %v5450_v33  ;;  %v1161_v13 = vcombine.high %v4356_v38, %v6806_v56 }
 0x3fd   : > { %1089 = vrot.lane.b32.xlu0 %v5430_v40, %s5033_s12  ;;  %v5436_v42 = vpop.f32.mrb[21].mxu0  ;;  %v1102_v61 = vrot.slane %v5430_v40, %v5450_v33  ;;  %v1838_v3 = vrot.slane %v5432_v41, %v5450_v33 }
 0x3fe   : > { %v1175_v21 = vrot.slane %v1161_v13, %v5450_v33  ;;  %v1772_v49 = vrot.slane %v5436_v42, %v5450_v33  ;;  %v1831_v13 = vcombine.high %v5432_v41, %v6806_v56 }
 0x400   : > { %1761 = vrot.lane.b32.xlu1 %v5432_v41, %s5033_s12  ;;  %v1845_v41 = vrot.slane %v1831_v13, %v5450_v33 }
 0x404   : > { %1759 = vrot.lane.b32.xlu1 %v5436_v42, %s5033_s12 }
 0x40c   : > { %v5442_v43 = vpop.f32.mrb[22].mxu0 }
 0x40d   : > { %v5444_v44 = vpop.f32.mrb[23].mxu0  ;;  %2437 = vrot.lane.b32.xlu1 %v5442_v43, %s5033_s12 }
 0x40e   : > { %2435 = vrot.lane.b32.xlu0 %v5444_v44, %s5033_s12 }
 0x46e   : > { %v1092_v53 = vpop.permute.xlu1 %1091 }
 0x46f   : > { %v1183_v55 = vrot.slane %v1092_v53, %v5450_v33  ;;  %v1090_v57 = vpop.permute.xlu0 %1089  ;;  %v1176_v6 = vcombine.high %v1092_v53, %v6806_v56 }
 0x470   : > { %v1117_v58 = vrot.slane %v1090_v57, %v5450_v33  ;;  %v1110_v51 = vcombine.high %v1090_v57, %v6806_v56 }
 0x471   : > { %v1191_v39 = vcombine.low %v1168_v54, %v1183_v55  ;;  %v1192_v60 = vcombine.high %v1168_v54, %v1183_v55  ;;  %v1190_v16 = vrot.slane %v1176_v6, %v5450_v33  ;;  %v1095_v55 = vcombine.high %v5430_v40, %v6806_v56 }
 0x472   : > { %v5459_v62 = vpop.permute.xlu1 %1761  ;;  %v1125_v63 = vcombine.low %v1102_v61, %v1117_v58  ;;  %v1126_v14 = vcombine.high %v1102_v61, %v1117_v58  ;;  %v1124_v57 = vrot.slane %v1110_v51, %v5450_v33 }
 0x473   : > { %v1853_v0 = vrot.slane %v5459_v62, %v5450_v33  ;;  %v5464_v1 = vrot.slane %v1191_v39, %v5455_v59  ;;  %v5467_v2 = vrot.slane %v1192_v60, %v5455_v59  ;;  %v1207_v27 = vcombine.low %v1175_v21, %v1190_v16 }
 0x474   : > { %v5485_v12 = vrot.slane %v1125_v63, %v5455_v59  ;;  %v5504_v24 = vrot.slane %v1126_v14, %v5455_v59  ;;  %v1208_v37 = vcombine.high %v1175_v21, %v1190_v16  ;;  %v1109_v40 = vrot.slane %v1095_v55, %v5450_v33 }
 0x475   : > { %v1252_v4 = vsel %vm1227_vm2, %v5464_v1, -inf  ;;  %v5475_v5 = vcombine.high %v5464_v1, %v6806_v56  ;;  %v1861_v7 = vcombine.low %v1838_v3, %v1853_v0  ;;  %v5482_v10 = vcombine.high %v5467_v2, %v6806_v56 }
 0x476   : > { %1253 = vmax.xlane.f32.xlu0 %v1252_v4  ;;  %v1258_v15 = vsel %vm1227_vm2, %v5467_v2, -inf  ;;  %v1862_v17 = vcombine.high %v1838_v3, %v1853_v0  ;;  %v5495_v19 = vcombine.high %v5485_v12, %v6806_v56  ;;  %v1228_v22 = vsel %vm1227_vm2, %v5485_v12, -inf  ;;  %v1760_v26 = vpop.permute.xlu1 %1759 }
 0x477   : > { %v1255_v8 = vsel %vm1227_vm2, %v5475_v5, -inf  ;;  %v1261_v18 = vsel %vm1227_vm2, %v5482_v10, -inf  ;;  %v5498_v20 = vrot.slane %v1861_v7, %v5455_v59  ;;  %v1234_v31 = vsel %vm1227_vm2, %v5504_v24, -inf }
 0x478   : > { %1256 = vmax.xlane.f32.xlu1 %v1255_v8  ;;  %v1231_v28 = vsel %vm1227_vm2, %v5495_v19, -inf  ;;  %v5513_v30 = vrot.slane %v1862_v17, %v5455_v59  ;;  %v1787_v38 = vrot.slane %v1760_v26, %v5450_v33  ;;  %v5525_v47 = vrot.slane %v1207_v27, %v5455_v59 }
 0x479   : > { %v5510_v29 = vcombine.high %v5498_v20, %v6806_v56  ;;  %v1921_v50 = vsel %vm1227_vm2, %v5498_v20, -inf  ;;  %v5539_v54 = vrot.slane %v1208_v37, %v5455_v59  ;;  %v1846_v3 = vcombine.high %v5459_v62, %v6806_v56 }
 0x47a   : > { %1259 = vmax.xlane.f32.xlu0 %v1258_v15  ;;  %v5522_v46 = vcombine.high %v5513_v30, %v6806_v56  ;;  %v1795_v32 = vcombine.low %v1772_v49, %v1787_v38  ;;  %v5536_v53 = vcombine.high %v5525_v47, %v6806_v56  ;;  %v1927_v58 = vsel %vm1227_vm2, %v5513_v30, -inf }
 0x47b   : > { %v1924_v45 = vsel %vm1227_vm2, %v5510_v29, -inf  ;;  %v1796_v39 = vcombine.high %v1772_v49, %v1787_v38  ;;  %v5550_v61 = vcombine.high %v5539_v54, %v6806_v56  ;;  %v1264_v0 = vsel %vm1227_vm2, %v5525_v47, -inf }
 0x47c   : > { %1262 = vmax.xlane.f32.xlu1 %v1261_v18  ;;  %v1930_v52 = vsel %vm1227_vm2, %v5522_v46, -inf  ;;  %v1267_v60 = vsel %vm1227_vm2, %v5536_v53, -inf  ;;  %v5553_v63 = vrot.slane %v1795_v32, %v5455_v59  ;;  %v1141_v4 = vcombine.low %v1109_v40, %v1124_v57 }
 0x47d   : > { %v1273_v6 = vsel %vm1227_vm2, %v5550_v61, -inf  ;;  %v5567_v8 = vrot.slane %v1796_v39, %v5455_v59  ;;  %v1270_v14 = vsel %vm1227_vm2, %v5539_v54, -inf  ;;  %v1860_v62 = vrot.slane %v1846_v3, %v5450_v33 }
 0x47e   : > { %1229 = vmax.xlane.f32.xlu0 %v1228_v22  ;;  %v5564_v7 = vcombine.high %v5553_v63, %v6806_v56  ;;  %v1142_v15 = vcombine.high %v1109_v40, %v1124_v57  ;;  %v5581_v18 = vrot.slane %v1141_v4, %v5455_v59  ;;  %v1897_v21 = vsel %vm1227_vm2, %v5553_v63, -inf }
 0x47f   : > { %v5578_v17 = vcombine.high %v5567_v8, %v6806_v56  ;;  %v1877_v22 = vcombine.low %v1845_v41, %v1860_v62  ;;  %v1780_v27 = vcombine.high %v1760_v26, %v6806_v56  ;;  %v1765_v38 = vcombine.high %v5436_v42, %v6806_v56  ;;  %v2438_v40 = vpop.permute.xlu1 %2437 }
 0x480   : > { %1232 = vmax.xlane.f32.xlu1 %v1231_v28  ;;  %v1900_v16 = vsel %vm1227_vm2, %v5564_v7, -inf  ;;  %v5594_v37 = vrot.slane %v1142_v15, %v5455_v59  ;;  %v5602_v26 = vcombine.high %v5504_v24, %v6806_v56  ;;  %v1878_v49 = vcombine.high %v1845_v41, %v1860_v62  ;;  %v2436_v41 = vpop.permute.xlu0 %2435 }
 0x481   : > { %v1906_v28 = vsel %vm1227_vm2, %v5578_v17, -inf  ;;  %v5612_v42 = vrot.slane %v1877_v22, %v5455_v59  ;;  %v2529_v4 = vrot.slane %v2438_v40, %v5450_v33  ;;  %v2514_v62 = vrot.slane %v5442_v43, %v5450_v33 }
 0x482   : > { %1235 = vmax.xlane.f32.xlu0 %v1234_v31  ;;  %v5591_v31 = vcombine.high %v5581_v18, %v6806_v56  ;;  %v5609_v32 = vcombine.high %v5594_v37, %v6806_v56  ;;  %v1237_v55 = vsel %vm1227_vm2, %v5602_v26, -inf  ;;  %v1246_v15 = vsel %vm1227_vm2, %v5594_v37, -inf }
 0x483   : > { %v5621_v39 = vcombine.high %v5612_v42, %v6806_v56 }
 0x484   : > { %1925 = vmax.xlane.f32.xlu1 %v1924_v45  ;;  %v1903_v45 = vsel %vm1227_vm2, %v5567_v8, -inf  ;;  %v1243_v51 = vsel %vm1227_vm2, %v5591_v31, -inf  ;;  %v1249_v57 = vsel %vm1227_vm2, %v5609_v32, -inf }
 0x486   : > { %1922 = vmax.xlane.f32.xlu0 %v1921_v50  ;;  %v1794_v50 = vrot.slane %v1780_v27, %v5450_v33 }
 0x488   : > { %1931 = vmax.xlane.f32.xlu1 %v1930_v52  ;;  %v1779_v52 = vrot.slane %v1765_v38, %v5450_v33  ;;  %v2463_v38 = vrot.slane %v2436_v41, %v5450_v33 }
 0x48a   : > { %1928 = vmax.xlane.f32.xlu0 %v1927_v58  ;;  %v1811_v58 = vcombine.low %v1779_v52, %v1794_v50  ;;  %v1812_v3 = vcombine.high %v1779_v52, %v1794_v50  ;;  %v2448_v52 = vrot.slane %v5444_v44, %v5450_v33 }
 0x48c   : > { %1268 = vmax.xlane.f32.xlu1 %v1267_v60  ;;  %v5624_v60 = vrot.slane %v1878_v49, %v5455_v59  ;;  %v5649_v27 = vrot.slane %v1812_v3, %v5455_v59 }
 0x48e   : > { %1265 = vmax.xlane.f32.xlu0 %v1264_v0  ;;  %v1240_v0 = vsel %vm1227_vm2, %v5581_v18, -inf  ;;  %v5633_v13 = vcombine.high %v5624_v60, %v6806_v56  ;;  %v5658_v50 = vcombine.high %v5649_v27, %v6806_v56 }
 0x490   : > { %1274 = vmax.xlane.f32.xlu1 %v1273_v6  ;;  %v1936_v6 = vsel %vm1227_vm2, %v5621_v39, -inf }
 0x492   : > { %1271 = vmax.xlane.f32.xlu0 %v1270_v14  ;;  %v5636_v14 = vrot.slane %v1811_v58, %v5455_v59  ;;  %v2522_v58 = vcombine.high %v2438_v40, %v6806_v56 }
 0x494   : > { %1901 = vmax.xlane.f32.xlu1 %v1900_v16  ;;  %v2537_v16 = vcombine.low %v2514_v62, %v2529_v4  ;;  %v5646_v22 = vcombine.high %v5636_v14, %v6806_v56  ;;  %v2536_v40 = vrot.slane %v2522_v58, %v5450_v33 }
 0x496   : > { %1898 = vmax.xlane.f32.xlu0 %v1897_v21  ;;  %v1942_v21 = vsel %vm1227_vm2, %v5633_v13, -inf  ;;  %v1912_v49 = vsel %vm1227_vm2, %v5646_v22, -inf }
 0x498   : > { %1907 = vmax.xlane.f32.xlu1 %v1906_v28  ;;  %v1933_v28 = vsel %vm1227_vm2, %v5612_v42, -inf }
 0x49a   : > { %1904 = vmax.xlane.f32.xlu0 %v1903_v45  ;;  %v2538_v45 = vcombine.high %v2514_v62, %v2529_v4  ;;  %v1909_v62 = vsel %vm1227_vm2, %v5636_v14, -inf }
 0x49c   : > { %1244 = vmax.xlane.f32.xlu1 %v1243_v51  ;;  %v5661_v51 = vrot.slane %v2537_v16, %v5455_v59  ;;  %v5675_v4 = vrot.slane %v2538_v45, %v5455_v59  ;;  %v1915_v45 = vsel %vm1227_vm2, %v5649_v27, -inf }
 0x49e   : > { %1238 = vmax.xlane.f32.xlu0 %v1237_v55  ;;  %v1939_v55 = vsel %vm1227_vm2, %v5624_v60, -inf  ;;  %v5672_v3 = vcombine.high %v5661_v51, %v6806_v56 }
 0x4a0   : > { %1250 = vmax.xlane.f32.xlu1 %v1249_v57  ;;  %v2471_v57 = vcombine.low %v2448_v52, %v2463_v38  ;;  %v2600_v16 = vsel %vm1227_vm2, %v5672_v3, -inf }
 0x4a2   : > { %1241 = vmax.xlane.f32.xlu0 %v1240_v0  ;;  %v1918_v0 = vsel %vm1227_vm2, %v5658_v50, -inf }
 0x4a4   : > { %1937 = vmax.xlane.f32.xlu1 %v1936_v6  ;;  %v2507_v6 = vcombine.high %v5442_v43, %v6806_v56 }
 0x4a6   : > { %1247 = vmax.xlane.f32.xlu0 %v1246_v15  ;;  %v2472_v15 = vcombine.high %v2448_v52, %v2463_v38  ;;  %v2521_v43 = vrot.slane %v2507_v6, %v5450_v33 }
 0x4a8   : > { %1943 = vmax.xlane.f32.xlu1 %v1942_v21  ;;  %v5686_v21 = vcombine.high %v5675_v4, %v6806_v56  ;;  %v2553_v38 = vcombine.low %v2521_v43, %v2536_v40  ;;  %v5702_v58 = vrot.slane %v2472_v15, %v5455_v59  ;;  %v2554_v6 = vcombine.high %v2521_v43, %v2536_v40 }
 0x4aa   : > { %1934 = vmax.xlane.f32.xlu0 %v1933_v28  ;;  %v5689_v28 = vrot.slane %v2471_v57, %v5455_v59  ;;  %v2606_v52 = vsel %vm1227_vm2, %v5686_v21, -inf  ;;  %v2441_v57 = vcombine.high %v5444_v44, %v6806_v56  ;;  %v5716_v15 = vrot.slane %v2553_v38, %v5455_v59 }
 0x4ac   : > { %1913 = vmax.xlane.f32.xlu1 %v1912_v49  ;;  %v2456_v49 = vcombine.high %v2436_v41, %v6806_v56  ;;  %v2455_v44 = vrot.slane %v2441_v57, %v5450_v33  ;;  %v5725_v43 = vcombine.high %v5716_v15, %v6806_v56  ;;  %v2573_v38 = vsel %vm1227_vm2, %v5689_v28, -inf }
 0x4ae   : > { %1940 = vmax.xlane.f32.xlu0 %v1939_v55  ;;  %v5699_v55 = vcombine.high %v5689_v28, %v6806_v56  ;;  %v2470_v41 = vrot.slane %v2456_v49, %v5450_v33 }
 0x4b0   : > { %1919 = vmax.xlane.f32.xlu1 %v1918_v0  ;;  %v2597_v0 = vsel %vm1227_vm2, %v5661_v51, -inf  ;;  %v2487_v49 = vcombine.low %v2455_v44, %v2470_v41  ;;  %v2488_v57 = vcombine.high %v2455_v44, %v2470_v41 }
 0x4b2   : > { %1910 = vmax.xlane.f32.xlu0 %v1909_v62  ;;  %v2576_v62 = vsel %vm1227_vm2, %v5699_v55, -inf  ;;  %v5750_v44 = vrot.slane %v2488_v57, %v5455_v59 }
 0x4b4   : > { %2601 = vmax.xlane.f32.xlu1 %v2600_v16  ;;  %v5713_v16 = vcombine.high %v5702_v58, %v6806_v56 }
 0x4b6   : > { %1916 = vmax.xlane.f32.xlu0 %v1915_v45  ;;  %v2603_v45 = vsel %vm1227_vm2, %v5675_v4, -inf  ;;  %v2582_v40 = vsel %vm1227_vm2, %v5713_v16, -inf }
 0x4b8   : > { %2607 = vmax.xlane.f32.xlu1 %v2606_v52  ;;  %v5728_v52 = vrot.slane %v2554_v6, %v5455_v59  ;;  %v2579_v6 = vsel %vm1227_vm2, %v5702_v58, -inf }
 0x4ba   : > { %2598 = vmax.xlane.f32.xlu0 %v2597_v0  ;;  %v2612_v0 = vsel %vm1227_vm2, %v5725_v43, -inf }
 0x4bc   : > { %2577 = vmax.xlane.f32.xlu1 %v2576_v62  ;;  %v5736_v62 = vcombine.high %v5728_v52, %v6806_v56 }
 0x4be   : > { %2604 = vmax.xlane.f32.xlu0 %v2603_v45  ;;  %v5739_v45 = vrot.slane %v2487_v49, %v5455_v59  ;;  %v2609_v49 = vsel %vm1227_vm2, %v5716_v15, -inf }
 0x4c0   : > { %2583 = vmax.xlane.f32.xlu1 %v2582_v40  ;;  %v2618_v40 = vsel %vm1227_vm2, %v5736_v62, -inf  ;;  %v5747_v41 = vcombine.high %v5739_v45, %v6806_v56 }
 0x4c2   : > { %2574 = vmax.xlane.f32.xlu0 %v2573_v38  ;;  %v2588_v38 = vsel %vm1227_vm2, %v5747_v41, -inf }
 0x4c4   : > { %2613 = vmax.xlane.f32.xlu1 %v2612_v0  ;;  %v5758_v0 = vcombine.high %v5750_v44, %v6806_v56 }
 0x4c6   : > { %2580 = vmax.xlane.f32.xlu0 %v2579_v6  ;;  %v2615_v6 = vsel %vm1227_vm2, %v5728_v52, -inf  ;;  %v2594_v57 = vsel %vm1227_vm2, %v5758_v0, -inf }
 0x4c8   : > { %2619 = vmax.xlane.f32.xlu1 %v2618_v40  ;;  %v2585_v40 = vsel %vm1227_vm2, %v5739_v45, -inf }
 0x4ca   : > { %2610 = vmax.xlane.f32.xlu0 %v2609_v49  ;;  %v2591_v49 = vsel %vm1227_vm2, %v5750_v44, -inf }
 0x4cc   : > { %2589 = vmax.xlane.f32.xlu1 %v2588_v38 }
 0x4ce   : > { %2616 = vmax.xlane.f32.xlu0 %v2615_v6 }
 0x4d0   : > { %2595 = vmax.xlane.f32.xlu1 %v2594_v57 }
 0x4d2   : > { %2586 = vmax.xlane.f32.xlu0 %v2585_v40 }
 0x4d6   : > { %2592 = vmax.xlane.f32.xlu0 %v2591_v49 }
 0x503   : > { %v1254_v36 = vpop.xlane.xlu0 %1253 }
 0x504   : > { %v1284_v56 = vsub.f32 %v5464_v1, %v1254_v36 }
 0x505   : > { %v1257_v38 = vpop.xlane.xlu1 %1256 }
 0x506   : > { %v1308_v48 = vmul.f32 1.442695, %v1284_v56  ;;  %v1285_v25 = vsub.f32 %v5475_v5, %v1257_v38 }
 0x507   : > { %v1260_v6 = vpop.xlane.xlu0 %1259 }
 0x508   : > { %4680 = vpow2.f32 %v1308_v48  ;;  %v1310_v35 = vmul.f32 1.442695, %v1285_v25  ;;  %v1286_v57 = vsub.f32 %v5467_v2, %v1260_v6 }
 0x509   : > { %v1263_v9 = vpop.xlane.xlu1 %1262 }
 0x50a   : > { %4682 = vpow2.f32 %v1310_v35  ;;  %v1312_v23 = vmul.f32 1.442695, %v1286_v57  ;;  %v1287_v40 = vsub.f32 %v5482_v10, %v1263_v9 }
 0x50b   : > { %v1230_v11 = vpop.xlane.xlu0 %1229 }
 0x50c   : > { %4684 = vpow2.f32 %v1312_v23  ;;  %v1314_v49 = vmul.f32 1.442695, %v1287_v40  ;;  %v1276_v34 = vsub.f32 %v5485_v12, %v1230_v11 }
 0x50d   : > { %v1233_v36 = vpop.xlane.xlu1 %1232 }
 0x50e   : > { %4686 = vpow2.f32 %v1314_v49  ;;  %v1292_v56 = vmul.f32 1.442695, %v1276_v34  ;;  %v1277_v1 = vsub.f32 %v5495_v19, %v1233_v36 }
 0x50f   : > { %v1236_v5 = vpop.xlane.xlu0 %1235 }
 0x510   : > { %4688 = vpow2.f32 %v1292_v56  ;;  %v1294_v25 = vmul.f32 1.442695, %v1277_v1  ;;  %v1278_v48 = vsub.f32 %v5504_v24, %v1236_v5 }
 0x511   : > { %v5775_v2 = vpop.xlane.xlu1 %1925 }
 0x512   : > { %v5777_v35 = vpop.eup %4680  ;;  %4690 = vpow2.f32 %v1294_v25  ;;  %v1296_v9 = vmul.f32 1.442695, %v1278_v48 }
 0x513   : > { %v1923_v23 = vpop.xlane.xlu0 %1922  ;;  %v1348_v11 = vsel %vm1227_vm2, %v5777_v35, 0.0 }
 0x514   : > { %v5781_v10 = vpop.eup %4682  ;;  %4692 = vpow2.f32 %v1296_v9  ;;  %v1953_v34 = vsub.f32 %v5498_v20, %v1923_v23  ;;  %1349 = vadd.xlane.f32.xlu0 %v1348_v11 }
 0x515   : > { %v5784_v12 = vpop.xlane.xlu1 %1931  ;;  %v1351_v19 = vsel %vm1227_vm2, %v5781_v10, 0.0 }
 0x516   : > { %v5788_v24 = vpop.eup %4684  ;;  %v1977_v38 = vmul.f32 1.442695, %v1953_v34  ;;  %1352 = vadd.xlane.f32.xlu1 %v1351_v19 }
 0x517   : > { %v1929_v6 = vpop.xlane.xlu0 %1928  ;;  %v1354_v57 = vsel %vm1227_vm2, %v5788_v24, 0.0 }
 0x518   : > { %v5792_v40 = vpop.eup %4686  ;;  %4694 = vpow2.f32 %v1977_v38  ;;  %v1955_v49 = vsub.f32 %v5513_v30, %v1929_v6  ;;  %1355 = vadd.xlane.f32.xlu0 %v1354_v57 }
 0x519   : > { %v5795_v20 = vpop.xlane.xlu1 %1268  ;;  %v1357_v36 = vsel %vm1227_vm2, %v5792_v40, 0.0 }
 0x51a   : > { %v5799_v56 = vpop.eup %4688  ;;  %v1981_v1 = vmul.f32 1.442695, %v1955_v49  ;;  %1358 = vadd.xlane.f32.xlu1 %v1357_v36 }
 0x51b   : > { %v1266_v5 = vpop.xlane.xlu0 %1265  ;;  %v1324_v25 = vsel %vm1227_vm2, %v5799_v56, 0.0 }
 0x51c   : > { %v5803_v48 = vpop.eup %4690  ;;  %4696 = vpow2.f32 %v1981_v1  ;;  %v1288_v9 = vsub.f32 %v5525_v47, %v1266_v5  ;;  %1325 = vadd.xlane.f32.xlu0 %v1324_v25 }
 0x51d   : > { %v5806_v30 = vpop.xlane.xlu1 %1274  ;;  %v1327_v23 = vsel %vm1227_vm2, %v5803_v48, 0.0 }
 0x51e   : > { %v5810_v11 = vpop.eup %4692  ;;  %v1316_v34 = vmul.f32 1.442695, %v1288_v9  ;;  %1328 = vadd.xlane.f32.xlu1 %v1327_v23 }
 0x51f   : > { %v1272_v19 = vpop.xlane.xlu0 %1271  ;;  %v1330_v38 = vsel %vm1227_vm2, %v5810_v11, 0.0 }
 0x520   : > { %4698 = vpow2.f32 %v1316_v34  ;;  %v1290_v6 = vsub.f32 %v5539_v54, %v1272_v19  ;;  %1331 = vadd.xlane.f32.xlu0 %v1330_v38 }
 0x521   : > { %v5815_v57 = vpop.xlane.xlu1 %1901 }
 0x522   : > { %v5817_v47 = vpop.eup %4694  ;;  %v1320_v49 = vmul.f32 1.442695, %v1290_v6 }
 0x523   : > { %6847 = vst [vmem:[#allocation17_spill] sm:$0xff] %v5817_v47  ;;  %v1899_v36 = vpop.xlane.xlu0 %1898  ;;  %v2017_v1 = vsel %vm1227_vm2, %v5817_v47, 0.0 }
 0x524   : > { %4700 = vpow2.f32 %v1320_v49  ;;  %v1945_v5 = vsub.f32 %v5553_v63, %v1899_v36  ;;  %2018 = vadd.xlane.f32.xlu0 %v2017_v1  ;;  %v1954_v63 = vsub.f32 %v5510_v29, %v5775_v2 }
 0x525   : > { %v5822_v25 = vpop.xlane.xlu1 %1907 }
 0x526   : > { %v5824_v9 = vpop.eup %4696  ;;  %v1961_v23 = vmul.f32 1.442695, %v1945_v5 }
 0x527   : > { %6848 = vst [vmem:[#allocation18_spill] sm:$0xff] %v5824_v9  ;;  %v1905_v54 = vpop.xlane.xlu0 %1904  ;;  %v2023_v34 = vsel %vm1227_vm2, %v5824_v9, 0.0 }
 0x528   : > { %4702 = vpow2.f32 %v1961_v23  ;;  %v1947_v19 = vsub.f32 %v5567_v8, %v1905_v54  ;;  %2024 = vadd.xlane.f32.xlu0 %v2023_v34  ;;  %v1979_v54 = vmul.f32 1.442695, %v1954_v63  ;;  %v1956_v34 = vsub.f32 %v5522_v46, %v5784_v12 }
 0x529   : > { %v5829_v38 = vpop.xlane.xlu1 %1244  ;;  %v1289_v63 = vsub.f32 %v5536_v53, %v5795_v20 }
 0x52a   : > { %v5831_v6 = vpop.eup %4698  ;;  %v1965_v49 = vmul.f32 1.442695, %v1947_v19 }
 0x52b   : > { %v1239_v36 = vpop.xlane.xlu0 %1238  ;;  %v1360_v1 = vsel %vm1227_vm2, %v5831_v6, 0.0 }
 0x52c   : > { %4704 = vpow2.f32 %v1965_v49  ;;  %v1279_v5 = vsub.f32 %v5602_v26, %v1239_v36  ;;  %1361 = vadd.xlane.f32.xlu0 %v1360_v1  ;;  %v1983_v49 = vmul.f32 1.442695, %v1956_v34  ;;  %v1318_v1 = vmul.f32 1.442695, %v1289_v63 }
 0x52d   : > { %v5838_v23 = vpop.xlane.xlu1 %1250 }
 0x52e   : > { %v5840_v8 = vpop.eup %4700  ;;  %v1298_v47 = vmul.f32 1.442695, %v1279_v5  ;;  %v1291_v5 = vsub.f32 %v5550_v61, %v5806_v30 }
 0x52f   : > { %v1242_v9 = vpop.xlane.xlu0 %1241  ;;  %v1366_v29 = vsel %vm1227_vm2, %v5840_v8, 0.0 }
 0x530   : > { %4706 = vpow2.f32 %v1298_v47  ;;  %v1280_v2 = vsub.f32 %v5581_v18, %v1242_v9  ;;  %1367 = vadd.xlane.f32.xlu0 %v1366_v29 }
 0x531   : > { %v5847_v19 = vpop.xlane.xlu1 %1937  ;;  %4708 = vpow2.f32 %v1979_v54 }
 0x532   : > { %v5849_v26 = vpop.eup %4702  ;;  %v1300_v36 = vmul.f32 1.442695, %v1280_v2  ;;  %v1322_v2 = vmul.f32 1.442695, %v1291_v5 }
 0x533   : > { %v1248_v46 = vpop.xlane.xlu0 %1247  ;;  %v1993_v12 = vsel %vm1227_vm2, %v5849_v26, 0.0 }
 0x534   : > { %4710 = vpow2.f32 %v1300_v36  ;;  %v1282_v47 = vsub.f32 %v5594_v37, %v1248_v46  ;;  %1994 = vadd.xlane.f32.xlu0 %v1993_v12 }
 0x535   : > { %v5856_v18 = vpop.xlane.xlu1 %1943  ;;  %4712 = vpow2.f32 %v1983_v49  ;;  %v1946_v49 = vsub.f32 %v5564_v7, %v5815_v57 }
 0x536   : > { %v5858_v9 = vpop.eup %4704  ;;  %v1304_v54 = vmul.f32 1.442695, %v1282_v47  ;;  %v1948_v47 = vsub.f32 %v5578_v17, %v5822_v25  ;;  %v1281_v25 = vsub.f32 %v5591_v31, %v5829_v38  ;;  %v1283_v38 = vsub.f32 %v5609_v32, %v5838_v23 }
 0x537   : > { %v1935_v53 = vpop.xlane.xlu0 %1934  ;;  %v1999_v20 = vsel %vm1227_vm2, %v5858_v9, 0.0  ;;  %v1963_v12 = vmul.f32 1.442695, %v1946_v49  ;;  %v1958_v32 = vsub.f32 %v5621_v39, %v5847_v19  ;;  %v1960_v19 = vsub.f32 %v5633_v13, %v5856_v18 }
 0x538   : > { %4714 = vpow2.f32 %v1304_v54  ;;  %v1957_v34 = vsub.f32 %v5612_v42, %v1935_v53  ;;  %2000 = vadd.xlane.f32.xlu0 %v1999_v20  ;;  %v1967_v17 = vmul.f32 1.442695, %v1948_v47  ;;  %v1302_v31 = vmul.f32 1.442695, %v1281_v25 }
 0x539   : > { %v5865_v37 = vpop.xlane.xlu1 %1913  ;;  %4716 = vpow2.f32 %v1318_v1  ;;  %v1987_v39 = vmul.f32 1.442695, %v1958_v32  ;;  %v1991_v13 = vmul.f32 1.442695, %v1960_v19 }
 0x53a   : > { %v5867_v29 = vpop.eup %4706  ;;  %v1985_v63 = vmul.f32 1.442695, %v1957_v34  ;;  %v1950_v18 = vsub.f32 %v5646_v22, %v5865_v37 }
 0x53b   : > { %v1941_v61 = vpop.xlane.xlu0 %1940  ;;  %v1333_v30 = vsel %vm1227_vm2, %v5867_v29, 0.0  ;;  %v5873_v36 = vpop.eup %4708 }
 0x53c   : > { %4718 = vpow2.f32 %v1985_v63  ;;  %v1959_v42 = vsub.f32 %v5624_v60, %v1941_v61  ;;  %1334 = vadd.xlane.f32.xlu1 %v1333_v30  ;;  %v2020_v54 = vsel %vm1227_vm2, %v5873_v36, 0.0 }
 0x53d   : > { %4720 = vpow2.f32 %v1322_v2  ;;  %v5880_v7 = vpop.xlane.xlu1 %1919 }
 0x53e   : > { %v5876_v46 = vpop.eup %4710  ;;  %v1989_v1 = vmul.f32 1.442695, %v1959_v42  ;;  %v1952_v22 = vsub.f32 %v5658_v50, %v5880_v7 }
 0x53f   : > { %v1911_v57 = vpop.xlane.xlu0 %1910  ;;  %v1336_v5 = vsel %vm1227_vm2, %v5876_v46, 0.0  ;;  %v5886_v53 = vpop.eup %4712 }
 0x540   : > { %4722 = vpow2.f32 %v1989_v1  ;;  %v1949_v60 = vsub.f32 %v5636_v14, %v1911_v57  ;;  %1337 = vadd.xlane.f32.xlu0 %v1336_v5  ;;  %2021 = vadd.xlane.f32.xlu1 %v2020_v54  ;;  %v2026_v63 = vsel %vm1227_vm2, %v5886_v53, 0.0  ;;  %v1975_v50 = vmul.f32 1.442695, %v1952_v22 }
 0x541   : > { %4724 = vpow2.f32 %v1963_v12  ;;  %v5900_v30 = vpop.xlane.xlu1 %2601 }
 0x542   : > { %v5889_v20 = vpop.eup %4714  ;;  %v1969_v34 = vmul.f32 1.442695, %v1949_v60  ;;  %v1306_v60 = vmul.f32 1.442695, %v1283_v38  ;;  %v2630_v7 = vsub.f32 %v5672_v3, %v5900_v30 }
 0x543   : > { %v1917_v2 = vpop.xlane.xlu0 %1916  ;;  %v1342_v49 = vsel %vm1227_vm2, %v5889_v20, 0.0  ;;  %v5897_v61 = vpop.eup %4716 }
 0x544   : > { %4726 = vpow2.f32 %v1969_v34  ;;  %v1951_v14 = vsub.f32 %v5649_v27, %v1917_v2  ;;  %1343 = vadd.xlane.f32.xlu0 %v1342_v49  ;;  %2027 = vadd.xlane.f32.xlu1 %v2026_v63  ;;  %v1363_v57 = vsel %vm1227_vm2, %v5897_v61, 0.0 }
 0x545   : > { %4728 = vpow2.f32 %v1967_v17  ;;  %v5917_v17 = vpop.xlane.xlu1 %2607 }
 0x546   : > { %v5902_v42 = vpop.eup %4718  ;;  %v1973_v12 = vmul.f32 1.442695, %v1951_v14  ;;  %v2632_v3 = vsub.f32 %v5686_v21, %v5917_v17 }
 0x547   : > { %v2599_v47 = vpop.xlane.xlu0 %2598  ;;  %v2029_v1 = vsel %vm1227_vm2, %v5902_v42, 0.0  ;;  %v5910_v27 = vpop.eup %4720 }
 0x548   : > { %4730 = vpow2.f32 %v1973_v12  ;;  %v2629_v5 = vsub.f32 %v5661_v51, %v2599_v47  ;;  %2030 = vadd.xlane.f32.xlu0 %v2029_v1  ;;  %1364 = vadd.xlane.f32.xlu1 %v1363_v57  ;;  %v1369_v2 = vsel %vm1227_vm2, %v5910_v27, 0.0  ;;  %v2659_v21 = vmul.f32 1.442695, %v2632_v3 }
 0x549   : > { %4732 = vpow2.f32 %v1302_v31  ;;  %v5937_v1 = vpop.xlane.xlu1 %2577 }
 0x54a   : > { %v5913_v54 = vpop.eup %4722  ;;  %v2653_v23 = vmul.f32 1.442695, %v2629_v5 }
 0x54b   : > { %v2605_v25 = vpop.xlane.xlu0 %2604  ;;  %v2035_v34 = vsel %vm1227_vm2, %v5913_v54, 0.0  ;;  %v5923_v51 = vpop.eup %4724 }
 0x54c   : > { %4734 = vpow2.f32 %v2653_v23  ;;  %v2631_v49 = vsub.f32 %v5675_v4, %v2605_v25  ;;  %2036 = vadd.xlane.f32.xlu0 %v2035_v34  ;;  %1370 = vadd.xlane.f32.xlu1 %v1369_v2  ;;  %v1996_v12 = vsel %vm1227_vm2, %v5923_v51, 0.0  ;;  %v1971_v2 = vmul.f32 1.442695, %v1950_v18 }
 0x54d   : > { %4736 = vpow2.f32 %v1306_v60 }
 0x54e   : > { %v5926_v63 = vpop.eup %4726  ;;  %v2657_v14 = vmul.f32 1.442695, %v2631_v49  ;;  %v2584_v49 = vpop.xlane.xlu1 %2583 }
 0x54f   : > { %v2575_v31 = vpop.xlane.xlu0 %2574  ;;  %v2005_v38 = vsel %vm1227_vm2, %v5926_v63, 0.0  ;;  %v5934_v47 = vpop.eup %4728 }
 0x550   : > { %4738 = vpow2.f32 %v2657_v14  ;;  %v2621_v4 = vsub.f32 %v5689_v28, %v2575_v31  ;;  %2006 = vadd.xlane.f32.xlu0 %v2005_v38  ;;  %1997 = vadd.xlane.f32.xlu1 %v1996_v12  ;;  %v2002_v23 = vsel %vm1227_vm2, %v5934_v47, 0.0 }
 0x551   : > { %4740 = vpow2.f32 %v1987_v39 }
 0x552   : > { %v5939_v57 = vpop.eup %4730  ;;  %v2637_v5 = vmul.f32 1.442695, %v2621_v4 }
 0x553   : > { %v2581_v60 = vpop.xlane.xlu0 %2580  ;;  %v2011_v32 = vsel %vm1227_vm2, %v5939_v57, 0.0  ;;  %v5947_v28 = vpop.eup %4732 }
 0x554   : > { %4742 = vpow2.f32 %v2637_v5  ;;  %v2623_v25 = vsub.f32 %v5702_v58, %v2581_v60  ;;  %2012 = vadd.xlane.f32.xlu0 %v2011_v32  ;;  %2003 = vadd.xlane.f32.xlu1 %v2002_v23  ;;  %v1339_v14 = vsel %vm1227_vm2, %v5947_v28, 0.0  ;;  %v2655_v32 = vmul.f32 1.442695, %v2630_v7 }
 0x555   : > { %4744 = vpow2.f32 %v1991_v13 }
 0x556   : > { %v5950_v34 = vpop.eup %4734  ;;  %v2641_v37 = vmul.f32 1.442695, %v2623_v25 }
 0x557   : > { %6849 = vst [vmem:[#allocation19_spill] sm:$0xff] %v5950_v34  ;;  %v2611_v39 = vpop.xlane.xlu0 %2610  ;;  %v2693_v19 = vsel %vm1227_vm2, %v5950_v34, 0.0  ;;  %v5958_v31 = vpop.eup %4736 }
 0x558   : > { %4746 = vpow2.f32 %v2641_v37  ;;  %v2633_v58 = vsub.f32 %v5716_v15, %v2611_v39  ;;  %2694 = vadd.xlane.f32.xlu0 %v2693_v19  ;;  %1340 = vadd.xlane.f32.xlu1 %v1339_v14  ;;  %v1345_v18 = vsel %vm1227_vm2, %v5958_v31, 0.0  ;;  %v2614_v15 = vpop.xlane.xlu1 %2613  ;;  %v2622_v37 = vsub.f32 %v5699_v55, %v5937_v1 }
 0x559   : > { %4748 = vpow2.f32 %v1971_v2 }
 0x55a   : > { %v5961_v38 = vpop.eup %4738  ;;  %v2661_v12 = vmul.f32 1.442695, %v2633_v58  ;;  %v2639_v1 = vmul.f32 1.442695, %v2622_v37 }
 0x55b   : > { %6850 = vst [vmem:[#allocation20_spill] sm:$0xff] %v5961_v38  ;;  %v2617_v4 = vpop.xlane.xlu0 %2616  ;;  %v2699_v13 = vsel %vm1227_vm2, %v5961_v38, 0.0  ;;  %v5969_v5 = vpop.eup %4740 }
 0x55c   : > { %4750 = vpow2.f32 %v2661_v12  ;;  %2700 = vadd.xlane.f32.xlu0 %v2699_v13  ;;  %1346 = vadd.xlane.f32.xlu1 %v1345_v18  ;;  %v2032_v25 = vsel %vm1227_vm2, %v5969_v5, 0.0  ;;  %v2635_v17 = vsub.f32 %v5728_v52, %v2617_v4  ;;  %v2620_v14 = vpop.xlane.xlu1 %2619  ;;  %v2624_v52 = vsub.f32 %v5713_v16, %v2584_v49 }
 0x55d   : > { %4752 = vpow2.f32 %v1975_v50 }
 0x55e   : > { %v5971_v60 = vpop.eup %4742  ;;  %4754 = vpow2.f32 %v2655_v32  ;;  %v2665_v4 = vmul.f32 1.442695, %v2635_v17 }
 0x55f   : > { %6851 = vst [vmem:[#allocation21_spill] sm:$0xff] %v5971_v60  ;;  %v2587_v30 = vpop.xlane.xlu0 %2586  ;;  %v2669_v23 = vsel %vm1227_vm2, %v5971_v60, 0.0  ;;  %v5979_v2 = vpop.eup %4744 }
 0x560   : > { %v2625_v22 = vsub.f32 %v5739_v45, %v2587_v30  ;;  %2670 = vadd.xlane.f32.xlu0 %v2669_v23  ;;  %2033 = vadd.xlane.f32.xlu1 %v2032_v25  ;;  %v2038_v45 = vsel %vm1227_vm2, %v5979_v2, 0.0  ;;  %v2643_v30 = vmul.f32 1.442695, %v2624_v52  ;;  %v2634_v23 = vsub.f32 %v5725_v43, %v2614_v15 }
 0x561   : > { %v2636_v52 = vsub.f32 %v5736_v62, %v2620_v14 }
 0x562   : > { %v5984_v39 = vpop.eup %4746  ;;  %v2645_v19 = vmul.f32 1.442695, %v2625_v22  ;;  %v2663_v22 = vmul.f32 1.442695, %v2634_v23 }
 0x563   : > { %6852 = vst [vmem:[#allocation22_spill] sm:$0xff] %v5984_v39  ;;  %v2593_v58 = vpop.xlane.xlu0 %2592  ;;  %v2675_v50 = vsel %vm1227_vm2, %v5984_v39, 0.0  ;;  %v5991_v7 = vpop.eup %4748 }
 0x564   : > { %4756 = vpow2.f32 %v2645_v19  ;;  %v2627_v55 = vsub.f32 %v5750_v44, %v2593_v58  ;;  %2676 = vadd.xlane.f32.xlu0 %v2675_v50  ;;  %2039 = vadd.xlane.f32.xlu1 %v2038_v45  ;;  %v2008_v32 = vsel %vm1227_vm2, %v5991_v7, 0.0  ;;  %v2590_v44 = vpop.xlane.xlu1 %2589 }
 0x565   : > { %4758 = vpow2.f32 %v2659_v21  ;;  %v2626_v37 = vsub.f32 %v5747_v41, %v2590_v44 }
 0x566   : > { %v5994_v12 = vpop.eup %4750  ;;  %v2649_v13 = vmul.f32 1.442695, %v2627_v55 }
 0x567   : > { %6853 = vst [vmem:[#allocation23_spill] sm:$0xff] %v5994_v12  ;;  %v2705_v18 = vsel %vm1227_vm2, %v5994_v12, 0.0  ;;  %v6001_v3 = vpop.eup %4752  ;;  %v2647_v58 = vmul.f32 1.442695, %v2626_v37 }
 0x568   : > { %4760 = vpow2.f32 %v2649_v13  ;;  %2706 = vadd.xlane.f32.xlu0 %v2705_v18  ;;  %2009 = vadd.xlane.f32.xlu1 %v2008_v32  ;;  %v2014_v16 = vsel %vm1227_vm2, %v6001_v3, 0.0  ;;  %v6006_v49 = vpop.eup %4754  ;;  %v2596_v21 = vpop.xlane.xlu1 %2595  ;;  %v2667_v32 = vmul.f32 1.442695, %v2636_v52 }
 0x569   : > { %4762 = vpow2.f32 %v2639_v1  ;;  %6854 = vst [vmem:[#allocation24_spill] sm:$0xff] %v6006_v49  ;;  %v2696_v43 = vsel %vm1227_vm2, %v6006_v49, 0.0  ;;  %v2628_v50 = vsub.f32 %v5758_v0, %v2596_v21 }
 0x56a   : > { %4764 = vpow2.f32 %v2665_v4 }
 0x56b   : > { %4766 = vpow2.f32 %v2643_v30  ;;  %v2651_v4 = vmul.f32 1.442695, %v2628_v50 }
 0x56c   : > { %2015 = vadd.xlane.f32.xlu1 %v2014_v16  ;;  %4768 = vpow2.f32 %v2663_v22 }
 0x56d   : > { %4770 = vpow2.f32 %v2647_v58 }
 0x56e   : > { %v6008_v25 = vpop.eup %4756  ;;  %4772 = vpow2.f32 %v2651_v4 }
 0x56f   : > { %6855 = vst [vmem:[#allocation25_spill] sm:$0xff] %v6008_v25  ;;  %v2681_v17 = vsel %vm1227_vm2, %v6008_v25, 0.0  ;;  %v6015_v15 = vpop.eup %4758  ;;  %4774 = vpow2.f32 %v2667_v32 }
 0x570   : > { %6856 = vst [vmem:[#allocation26_spill] sm:$0xff] %v6015_v15  ;;  %2682 = vadd.xlane.f32.xlu0 %v2681_v17  ;;  %2697 = vadd.xlane.f32.xlu1 %v2696_v43  ;;  %v2702_v55 = vsel %vm1227_vm2, %v6015_v15, 0.0 }
 0x572   : > { %v6017_v19 = vpop.eup %4760 }
 0x573   : > { %6857 = vst [vmem:[#allocation27_spill] sm:$0xff] %v6017_v19  ;;  %v6020_v45 = vpop.eup %4762  ;;  %v2687_v41 = vsel %vm1227_vm2, %v6017_v19, 0.0 }
 0x574   : > { %6858 = vst [vmem:[#allocation28_spill] sm:$0xff] %v6020_v45  ;;  %v6026_v1 = vpop.eup %4764  ;;  %2688 = vadd.xlane.f32.xlu0 %v2687_v41  ;;  %2703 = vadd.xlane.f32.xlu1 %v2702_v55  ;;  %v2672_v0 = vsel %vm1227_vm2, %v6020_v45, 0.0 }
 0x575   : > { %6859 = vst [vmem:[#allocation29_spill] sm:$0xff] %v6026_v1  ;;  %v2711_v13 = vsel %vm1227_vm2, %v6026_v1, 0.0  ;;  %v6033_v18 = vpop.eup %4766 }
 0x576   : > { %v2678_v44 = vsel %vm1227_vm2, %v6033_v18, 0.0  ;;  %v6037_v30 = vpop.eup %4768 }
 0x577   : > { %6860 = vst [vmem:[#allocation30_spill] sm:$0xff] %v6037_v30  ;;  %v2708_v62 = vsel %vm1227_vm2, %v6037_v30, 0.0  ;;  %v6041_v14 = vpop.eup %4770 }
 0x578   : > { %2712 = vadd.xlane.f32.xlu0 %v2711_v13  ;;  %2673 = vadd.xlane.f32.xlu1 %v2672_v0  ;;  %6861 = vst [vmem:[#allocation31_spill] sm:$0xff] %v6041_v14  ;;  %v2684_v23 = vsel %vm1227_vm2, %v6041_v14, 0.0  ;;  %v6045_v16 = vpop.eup %4772 }
 0x579   : > { %6862 = vst [vmem:[#allocation32_spill] sm:$0xff] %v6045_v16  ;;  %v2690_v22 = vsel %vm1227_vm2, %v6045_v16, 0.0  ;;  %v6049_v37 = vpop.eup %4774 }
 0x57a   : > { %6863 = vst [vmem:[#allocation33_spill] sm:$0xff] %v6049_v37  ;;  %v2714_v21 = vsel %vm1227_vm2, %v6049_v37, 0.0 }
 0x57c   : > { %2679 = vadd.xlane.f32.xlu1 %v2678_v44 }
 0x580   : > { %2709 = vadd.xlane.f32.xlu1 %v2708_v62 }
 0x584   : > { %2685 = vadd.xlane.f32.xlu1 %v2684_v23 }
 0x588   : > { %2691 = vadd.xlane.f32.xlu1 %v2690_v22 }
 0x58c   : > { %2715 = vadd.xlane.f32.xlu1 %v2714_v21 }
 0x5a1   : > { %v1350_v17 = vpop.xlane.xlu0 %1349 }
 0x5a3   : > { %v1353_v52 = vpop.xlane.xlu1 %1352 }
 0x5a5   : > { %v1356_v43 = vpop.xlane.xlu0 %1355 }
 0x5a7   : > { %v1359_v0 = vpop.xlane.xlu1 %1358 }
 0x5a8   : > { %4776 = vrcp.f32 %v1359_v0 }
 0x5a9   : > { %v1326_v58 = vpop.xlane.xlu0 %1325  ;;  %4778 = vrcp.f32 %v1353_v52 }
 0x5aa   : > { %4780 = vrcp.f32 %v1356_v43 }
 0x5ab   : > { %v1329_v44 = vpop.xlane.xlu1 %1328  ;;  %4782 = vrcp.f32 %v1350_v17 }
 0x5ad   : > { %v1332_v50 = vpop.xlane.xlu0 %1331 }
 0x5b1   : > { %v2019_v41 = vpop.xlane.xlu0 %2018 }
 0x5b2   : > { %v4777_v34 = vpop.eup %4776 }
 0x5b3   : > { %v4779_v49 = vpop.eup %4778  ;;  %v1399_v43 = vmul.f32 %v4777_v34, %v5792_v40 }
 0x5b4   : > { %v4781_v25 = vpop.eup %4780  ;;  %v1397_v52 = vmul.f32 %v4779_v49, %v5781_v10 }
 0x5b5   : > { %v2025_v55 = vpop.xlane.xlu0 %2024  ;;  %v4783_v60 = vpop.eup %4782 }
 0x5b6   : > { %v1462_v15 = vcombine.low %v1397_v52, %v1399_v43 }
 0x5b8   : > { %v1469_v49 = vrot.slane %v1462_v15, %v5450_v33 }
 0x5b9   : > { %v1362_v4 = vpop.xlane.xlu0 %1361 }
 0x5bd   : > { %v1368_v13 = vpop.xlane.xlu0 %1367 }
 0x5be   : > { %4784 = vrcp.f32 %v1368_v13 }
 0x5bf   : > { %4786 = vrcp.f32 %v1362_v4  ;;  %v1398_v4 = vmul.f32 %v4781_v25, %v5788_v24 }
 0x5c1   : > { %v6053_v32 = vpop.xlane.xlu0 %1994 }
 0x5c5   : > { %v6055_v62 = vpop.xlane.xlu0 %2000 }
 0x5c8   : > { %v4785_v17 = vpop.eup %4784 }
 0x5c9   : > { %v1335_v23 = vpop.xlane.xlu1 %1334  ;;  %v1402_v19 = vmul.f32 %v4785_v17, %v5840_v8 }
 0x5cd   : > { %v1338_v22 = vpop.xlane.xlu0 %1337  ;;  %v2022_v30 = vpop.xlane.xlu1 %2021 }
 0x5d1   : > { %v1344_v21 = vpop.xlane.xlu0 %1343  ;;  %v2028_v37 = vpop.xlane.xlu1 %2027 }
 0x5d5   : > { %v6057_v12 = vpop.xlane.xlu0 %2030  ;;  %v1365_v16 = vpop.xlane.xlu1 %1364 }
 0x5d6   : > { %4788 = vrcp.f32 %v1365_v16  ;;  %v4787_v16 = vpop.eup %4786 }
 0x5d7   : > { %v1400_v10 = vmul.f32 %v4787_v16, %v5831_v6 }
 0x5d9   : > { %v2037_v14 = vpop.xlane.xlu0 %2036  ;;  %v1371_v1 = vpop.xlane.xlu1 %1370  ;;  %v1470_v25 = vcombine.low %v1400_v10, %v1402_v19 }
 0x5da   : > { %4790 = vrcp.f32 %v1371_v1  ;;  %v1396_v1 = vmul.f32 %v4783_v60, %v5777_v35 }
 0x5db   : > { %4792 = vrcp.f32 %v1326_v58 }
 0x5dc   : > { %4794 = vrcp.f32 %v1335_v23  ;;  %v1454_v40 = vcombine.low %v1396_v1, %v1398_v4 }
 0x5dd   : > { %v6059_v38 = vpop.xlane.xlu0 %2006  ;;  %v6061_v0 = vpop.xlane.xlu1 %1997  ;;  %4796 = vrcp.f32 %v1329_v44  ;;  %v1477_v44 = vrot.slane %v1470_v25, %v5450_v33 }
 0x5de   : > { %4798 = vrcp.f32 %v1332_v50  ;;  %v1461_v8 = vrot.slane %v1454_v40, %v5450_v33 }
 0x5df   : > { %4800 = vrcp.f32 %v2019_v41 }
 0x5e0   : > { %v4789_v39 = vpop.eup %4788  ;;  %4802 = vrcp.f32 %v2025_v55 }
 0x5e1   : > { %v2004_v13 = vpop.xlane.xlu1 %2003  ;;  %v6068_v45 = vpop.xlane.xlu0 %2012  ;;  %4804 = vrcp.f32 %v1344_v21  ;;  %v1401_v35 = vmul.f32 %v4789_v39, %v5897_v61  ;;  %v1486_v61 = vcombine.low %v1461_v8, %v1469_v49 }
 0x5e2   : > { %4806 = vrcp.f32 %v1338_v22 }
 0x5e3   : > { %4808 = vrcp.f32 %v2028_v37  ;;  %v1493_v43 = vrot.slane %v1486_v61, %v5455_v59 }
 0x5e4   : > { %v4791_v34 = vpop.eup %4790 }
 0x5e5   : > { %v1341_v24 = vpop.xlane.xlu1 %1340  ;;  %v1403_v60 = vmul.f32 %v4791_v34, %v5910_v27  ;;  %v6075_v50 = vpop.xlane.xlu0 %2694 }
 0x5e6   : > { %v4793_v41 = vpop.eup %4792  ;;  %4810 = vrcp.f32 %v1341_v24 }
 0x5e7   : > { %v1478_v58 = vcombine.low %v1401_v35, %v1403_v60  ;;  %v4795_v55 = vpop.eup %4794  ;;  %4812 = vrcp.f32 %v2022_v30  ;;  %v1388_v16 = vmul.f32 %v4793_v41, %v5799_v56 }
 0x5e8   : > { %v4797_v39 = vpop.eup %4796  ;;  %v1391_v23 = vmul.f32 %v4795_v55, %v5867_v29 }
 0x5e9   : > { %v1347_v6 = vpop.xlane.xlu1 %1346  ;;  %v1485_v15 = vrot.slane %v1478_v58, %v5450_v33  ;;  %v4799_v27 = vpop.eup %4798  ;;  %v1389_v4 = vmul.f32 %v4797_v39, %v5803_v48  ;;  %v6865_v39 = vld [vmem:[#allocation17_spill] sm:$0xff] }
 0x5ea   : > { %4814 = vrcp.f32 %v1347_v6  ;;  %v4801_v37 = vpop.eup %4800  ;;  %v6085_v30 = vpop.xlane.xlu0 %2700 }
 0x5eb   : > { %4816 = vrcp.f32 %v6053_v32  ;;  %v1494_v19 = vcombine.low %v1477_v44, %v1485_v15  ;;  %v4803_v21 = vpop.eup %4802  ;;  %v1390_v32 = vmul.f32 %v4799_v27, %v5810_v11  ;;  %v1412_v1 = vcombine.low %v1389_v4, %v1391_v23  ;;  %v6864_v44 = vld [vmem:[#allocation18_spill] sm:$0xff] }
 0x5ec   : > { %4818 = vrcp.f32 %v2037_v14  ;;  %v4805_v52 = vpop.eup %4804  ;;  %v2067_v15 = vmul.f32 %v4803_v21, %v6864_v44  ;;  %v2065_v27 = vmul.f32 %v4801_v37, %v6865_v39 }
 0x5ed   : > { %v2034_v22 = vpop.xlane.xlu1 %2033  ;;  %4820 = vrcp.f32 %v6055_v62  ;;  %v1501_v17 = vrot.slane %v1494_v19, %v5455_v59  ;;  %v4807_v62 = vpop.eup %4806  ;;  %v1394_v48 = vmul.f32 %v4805_v52, %v5889_v20  ;;  %v1404_v34 = vcombine.low %v1388_v16, %v1390_v32 }
 0x5ee   : > { %4822 = vrcp.f32 %v6057_v12  ;;  %v4809_v10 = vpop.eup %4808  ;;  %v1392_v56 = vmul.f32 %v4807_v62, %v5876_v46  ;;  %v6104_v49 = vpop.xlane.xlu0 %2670  ;;  %v1419_v35 = vrot.slane %v1412_v1, %v5450_v33  ;;  %v2123_v52 = vcombine.low %v2065_v27, %v2067_v15 }
 0x5ef   : > { %4824 = vrcp.f32 %v2004_v13  ;;  %v6093_v29 = vcombine.low %v1493_v43, %v1501_v17  ;;  %v6095_v14 = vcombine.high %v1493_v43, %v1501_v17  ;;  %v1411_v6 = vrot.slane %v1404_v34, %v5450_v33 }
 0x5f0   : > { %4826 = vrcp.f32 %v2034_v22  ;;  %v4811_v13 = vpop.eup %4810  ;;  %v1420_v60 = vcombine.low %v1392_v56, %v1394_v48 }
 0x5f1   : > { %v2040_v40 = vpop.xlane.xlu1 %2039  ;;  %4828 = vrcp.f32 %v6061_v0  ;;  %v1505_v11 = vmul.f32 0.25, %v6093_v29  ;;  %v1507_v12 = vmul.f32 0.25, %v6095_v14  ;;  %v4813_v24 = vpop.eup %4812  ;;  %v2068_v0 = vmul.f32 %v4809_v10, %v5886_v53 }
 0x5f2   : > { %4830 = vrcp.f32 %v2040_v40  ;;  %v2066_v41 = vmul.f32 %v4813_v24, %v5873_v36  ;;  %v1427_v36 = vrot.slane %v1420_v60, %v5450_v33  ;;  %v2130_v24 = vrot.slane %v2123_v52, %v5450_v33 }
 0x5f3   : > { %4832 = vrcp.f32 %v6068_v45  ;;  %1510 = vst.msk [vmem:[%s6108_s21 + $0x8] sm:$0xff] %vm1508_vm3, %v1505_v11  ;;  %1512 = vst.msk [vmem:[%s6108_s21 + $0x18] sm:$0xff] %vm1508_vm3, %v1507_v12  ;;  %v1393_v45 = vmul.f32 %v4811_v13, %v5947_v28 }
 0x5f4   : > { %v4815_v20 = vpop.eup %4814  ;;  %4834 = vrcp.f32 %v6059_v38  ;;  %v2131_v19 = vcombine.low %v2066_v41, %v2068_v0  ;;  %v1436_v38 = vcombine.low %v1411_v6, %v1419_v35  ;;  %v6866_v6 = vld [vmem:[#allocation13_spill] sm:$0xff] }
 0x5f5   : > { %v2010_v25 = vpop.xlane.xlu1 %2009  ;;  %v4817_v46 = vpop.eup %4816  ;;  %v1395_v8 = vmul.f32 %v4815_v20, %v5958_v31 }
 0x5f6   : > { %v4819_v58 = vpop.eup %4818  ;;  %4836 = vrcp.f32 %v2010_v25  ;;  %v6124_v31 = vpop.xlane.xlu0 %2676  ;;  %v2138_v62 = vrot.slane %v2131_v19, %v5450_v33  ;;  %v2057_v25 = vmul.f32 %v4817_v46, %v5849_v26 }
 0x5f7   : > { %v4821_v55 = vpop.eup %4820  ;;  %v1428_v53 = vcombine.low %v1393_v45, %v1395_v8  ;;  %v2071_v28 = vmul.f32 %v4819_v58, %v5913_v54  ;;  %v1443_v54 = vrot.slane %v1436_v38, %v5455_v59  ;;  %v6868_v38 = vld [vmem:[#allocation15_spill] sm:$0xff] }
 0x5f8   : > { %v4823_v61 = vpop.eup %4822  ;;  %v2155_v8 = vcombine.low %v2130_v24, %v2138_v62 }
 0x5f9   : > { %v2016_v23 = vpop.xlane.xlu1 %2015  ;;  %v4825_v22 = vpop.eup %4824  ;;  %v1435_v43 = vrot.slane %v1428_v53, %v5450_v33  ;;  %v2069_v4 = vmul.f32 %v4823_v61, %v5902_v42  ;;  %v2059_v42 = vmul.f32 %v4821_v55, %v5858_v9 }
 0x5fa   : > { %4838 = vrcp.f32 %v2016_v23  ;;  %v4827_v17 = vpop.eup %4826  ;;  %v2060_v16 = vmul.f32 %v4825_v22, %v5934_v47  ;;  %v6140_v56 = vpop.xlane.xlu0 %2706  ;;  %v2162_v39 = vrot.slane %v2155_v8, %v5455_v59 }
 0x5fb   : > { %v4829_v21 = vpop.eup %4828  ;;  %v1444_v32 = vcombine.low %v1427_v36, %v1435_v43  ;;  %v2139_v10 = vcombine.low %v2069_v4, %v2071_v28  ;;  %v2070_v48 = vmul.f32 %v4827_v17, %v5969_v5  ;;  %v2073_v58 = vcombine.low %v2057_v25, %v2059_v42  ;;  %v2178_v4 = vld [vmem:[%s6108_s21 + $0x8] sm:$0xff] }
 0x5fc   : > { %v4831_v37 = vpop.eup %4830  ;;  %v2058_v13 = vmul.f32 %v4829_v21, %v5923_v51  ;;  %4840 = vrcp.f32 %v6085_v30  ;;  %v2180_v30 = vld [vmem:[%s6108_s21 + $0x18] sm:$0xff] }
 0x5fd   : > { %v6131_v1 = vpop.xlane.xlu1 %2697  ;;  %v4833_v40 = vpop.eup %4832  ;;  %v2072_v11 = vmul.f32 %v4831_v37, %v5979_v2  ;;  %v1451_v12 = vrot.slane %v1444_v32, %v5455_v59  ;;  %v2146_v9 = vrot.slane %v2139_v10, %v5450_v33  ;;  %v2080_v23 = vrot.slane %v2073_v58, %v5450_v33  ;;  %v6872_v58 = vld [vmem:[#allocation28_spill] sm:$0xff] }
 0x5fe   : > { %v4835_v34 = vpop.eup %4834  ;;  %v2063_v5 = vmul.f32 %v4833_v40, %v5939_v57  ;;  %v2081_v2 = vcombine.low %v2058_v13, %v2060_v16  ;;  %v2683_v46 = vpop.xlane.xlu0 %2682  ;;  %4842 = vrcp.f32 %v6104_v49 }
 0x5ff   : > { %v2147_v47 = vcombine.low %v2070_v48, %v2072_v11  ;;  %v1452_v20 = vcombine.low %v1443_v54, %v1451_v12  ;;  %v1453_v0 = vcombine.high %v1443_v54, %v1451_v12  ;;  %v2061_v41 = vmul.f32 %v4835_v34, %v5926_v63  ;;  %v6867_v63 = vld [vmem:[#allocation12_spill] sm:$0xff] }
 0x600   : > { %v4837_v60 = vpop.eup %4836  ;;  %v2088_v61 = vrot.slane %v2081_v2, %v5450_v33  ;;  %4844 = vrcp.f32 %v6124_v31  ;;  %v6870_v2 = vld [vmem:[#allocation14_spill] sm:$0xff] }
 0x601   : > { %v2704_v35 = vpop.xlane.xlu1 %2703  ;;  %v2154_v51 = vrot.slane %v2147_v47, %v5450_v33  ;;  %v1504_v45 = vmul.f32 0.25, %v1452_v20  ;;  %4361 = vmatprep.mubr.msk.f32.mxu1 %vm1508_vm3, %v1452_v20  ;;  %v1506_v26 = vmul.f32 0.25, %v1453_v0  ;;  %v2089_v44 = vcombine.low %v2061_v41, %v2063_v5  ;;  %v6869_v47 = vld [vmem:[#allocation11_spill] sm:$0xff] }
 0x602   : > { %4362 = vmatmul.mubr.msk.f32.vlgmr.msra.gmra.mrb[18].mxu1 %vm1508_vm3, %v6093_v29  ;;  %v2062_v15 = vmul.f32 %v4837_v60, %v5991_v7  ;;  %v2105_v43 = vcombine.low %v2080_v23, %v2088_v61  ;;  %v6876_v61 = vld [vmem:[#allocation20_spill] sm:$0xff] }
 0x603   : > { %1509 = vst.msk [vmem:[%s6108_s21] sm:$0xff] %vm1508_vm3, %v1504_v45  ;;  %4509 = vmatpush3.bf16.msra.mxu1 %v6866_v6  ;;  %4368 = vmatprep.mubr.msk.f32.mxu1 %vm1508_vm3, %v1453_v0  ;;  %v2163_v55 = vcombine.low %v2146_v9, %v2154_v51  ;;  %1511 = vst.msk [vmem:[%s6108_s21 + $0x10] sm:$0xff] %vm1508_vm3, %v1506_v26  ;;  %v2096_v28 = vrot.slane %v2089_v44, %v5450_v33  ;;  %v6871_v45 = vld [vmem:[#allocation22_spill] sm:$0xff] }
 0x604   : > { %v4839_v57 = vpop.eup %4838  ;;  %4519 = vmatprep.subr.bf16.mxu1 %v6867_v63  ;;  %v2112_v16 = vrot.slane %v2105_v43, %v5455_v59  ;;  %v6874_v6 = vld [vmem:[#allocation26_spill] sm:$0xff] }
 0x605   : > { %v2064_v53 = vmul.f32 %v4839_v57, %v6001_v3  ;;  %v2674_v29 = vpop.xlane.xlu1 %2673  ;;  %v2170_v27 = vrot.slane %v2163_v55, %v5455_v59  ;;  %v6873_v57 = vld [vmem:[#allocation27_spill] sm:$0xff] }
 0x606   : > { %4369 = vmatmul.mubr.msk.f32.vlgmr.msra.gmra.mrb[20].mxu1 %vm1508_vm3, %v6095_v14  ;;  %v2689_v14 = vpop.xlane.xlu0 %2688  ;;  %v4841_v13 = vpop.eup %4840 }
 0x607   : > { %v2097_v19 = vcombine.low %v2062_v15, %v2064_v53  ;;  %4521 = vmatpush3.bf16.msra.mxu1 %v6867_v63  ;;  %v2171_v7 = vcombine.low %v2162_v39, %v2170_v27  ;;  %v2172_v3 = vcombine.high %v2162_v39, %v2170_v27  ;;  %v6875_v15 = vld [vmem:[#allocation21_spill] sm:$0xff] }
 0x608   : > { %4523 = vmatprep.subr.bf16.mxu1 %v6868_v38  ;;  %v6877_v39 = vld [vmem:[#allocation25_spill] sm:$0xff] }
 0x609   : > { %v2680_v22 = vpop.xlane.xlu1 %2679  ;;  %v2104_v36 = vrot.slane %v2097_v19, %v5450_v33  ;;  %v2174_v17 = vmul.f32 0.25, %v2171_v7  ;;  %v2176_v21 = vmul.f32 0.25, %v2172_v3  ;;  %v6878_v19 = vld [vmem:[#allocation24_spill] sm:$0xff] }
 0x60a   : > { %4846 = vrcp.f32 %v2680_v22  ;;  %v2713_v40 = vpop.xlane.xlu0 %2712  ;;  %v2177_v12 = vld [vmem:[%s6108_s21] sm:$0xff]  ;;  %v2179_v42 = vld [vmem:[%s6108_s21 + $0x10] sm:$0xff] }
 0x60b   : > { %v2113_v52 = vcombine.low %v2096_v28, %v2104_v36  ;;  %v2182_v32 = vadd.f32 %v2178_v4, %v2174_v17  ;;  %v2184_v37 = vadd.f32 %v2180_v30, %v2176_v21  ;;  %4848 = vrcp.f32 %v2689_v14  ;;  %v6879_v22 = vld [vmem:[#allocation19_spill] sm:$0xff]  ;;  %v6880_v14 = vld [vmem:[#allocation29_spill] sm:$0xff]  ;;  %v6882_v4 = vld [vmem:[#allocation32_spill] sm:$0xff] }
 0x60c   : > { %4850 = vrcp.f32 %v2674_v29  ;;  %v6881_v21 = vld [vmem:[#allocation31_spill] sm:$0xff] }
 0x60d   : > { %v2710_v62 = vpop.xlane.xlu1 %2709  ;;  %v2120_v49 = vrot.slane %v2113_v52, %v5455_v59  ;;  %2186 = vst.msk [vmem:[%s6108_s21 + $0x8] sm:$0xff] %vm1508_vm3, %v2182_v32  ;;  %2188 = vst.msk [vmem:[%s6108_s21 + $0x18] sm:$0xff] %vm1508_vm3, %v2184_v37  ;;  %4852 = vrcp.f32 %v2704_v35 }
 0x60e   : > { %4854 = vrcp.f32 %v2683_v46 }
 0x60f   : > { %v2121_v31 = vcombine.low %v2112_v16, %v2120_v49  ;;  %v2122_v54 = vcombine.high %v2112_v16, %v2120_v49  ;;  %4856 = vrcp.f32 %v6131_v1  ;;  %v4843_v1 = vpop.eup %4842  ;;  %v6883_v16 = vld [vmem:[#allocation23_spill] sm:$0xff] }
 0x610   : > { %4858 = vrcp.f32 %v6075_v50  ;;  %v4845_v20 = vpop.eup %4844  ;;  %v2733_v53 = vmul.f32 %v4843_v1, %v6875_v15 }
 0x611   : > { %v2173_v10 = vmul.f32 0.25, %v2121_v31  ;;  %4386 = vmatprep.mubr.msk.f32.mxu1 %vm1508_vm3, %v2121_v31  ;;  %v2686_v48 = vpop.xlane.xlu1 %2685  ;;  %v2175_v11 = vmul.f32 0.25, %v2122_v54  ;;  %4860 = vrcp.f32 %v2713_v40  ;;  %v2735_v8 = vmul.f32 %v4845_v20, %v6871_v45 }
 0x612   : > { %4387 = vmatmul.mubr.msk.f32.vlgmr.msra.gmra.mrb[22].mxu1 %vm1508_vm3, %v2171_v7  ;;  %4862 = vrcp.f32 %v2686_v48 }
 0x613   : > { %v2181_v34 = vadd.f32 %v2177_v12, %v2173_v10  ;;  %4525 = vmatpush3.bf16.msra.mxu1 %v6868_v38  ;;  %v2183_v24 = vadd.f32 %v2179_v42, %v2175_v11  ;;  %4393 = vmatprep.mubr.msk.f32.mxu1 %vm1508_vm3, %v2122_v54  ;;  %4864 = vrcp.f32 %v6140_v56  ;;  %v6884_v12 = vld [vmem:[#allocation30_spill] sm:$0xff] }
 0x614   : > { %4535 = vmatprep.subr.bf16.mxu1 %v6869_v47  ;;  %v4847_v0 = vpop.eup %4846 }
 0x615   : > { %2185 = vst.msk [vmem:[%s6108_s21] sm:$0xff] %vm1508_vm3, %v2181_v34  ;;  %2187 = vst.msk [vmem:[%s6108_s21 + $0x10] sm:$0xff] %vm1508_vm3, %v2183_v24  ;;  %v2692_v50 = vpop.xlane.xlu1 %2691  ;;  %v4849_v25 = vpop.eup %4848  ;;  %v2736_v60 = vmul.f32 %v4847_v0, %v6033_v18  ;;  %v2743_v18 = vmul.f32 %v4841_v13, %v6876_v61  ;;  %v6885_v13 = vld [vmem:[#allocation33_spill] sm:$0xff] }
 0x616   : > { %4866 = vrcp.f32 %v2692_v50  ;;  %4394 = vmatmul.mubr.msk.f32.vlgmr.msra.gmra.mrb[24].mxu1 %vm1508_vm3, %v2172_v3  ;;  %v4851_v5 = vpop.eup %4850  ;;  %v2739_v46 = vmul.f32 %v4849_v25, %v6873_v57  ;;  %v2749_v3 = vcombine.low %v2733_v53, %v2735_v8 }
 0x617   : > { %4537 = vmatpush3.bf16.msra.mxu1 %v6869_v47  ;;  %4868 = vrcp.f32 %v2710_v62  ;;  %v4853_v35 = vpop.eup %4852  ;;  %v2734_v41 = vmul.f32 %v4851_v5, %v6872_v58 }
 0x618   : > { %4539 = vmatprep.subr.bf16.mxu1 %v6870_v2  ;;  %v4855_v9 = vpop.eup %4854  ;;  %v2744_v55 = vmul.f32 %v4853_v35, %v6874_v6  ;;  %v2756_v54 = vrot.slane %v2749_v3, %v5450_v33 }
 0x619   : > { %v2716_v56 = vpop.xlane.xlu1 %2715  ;;  %v4857_v51 = vpop.eup %4856  ;;  %v2757_v63 = vcombine.low %v2734_v41, %v2736_v60  ;;  %v2737_v27 = vmul.f32 %v4855_v9, %v6877_v39 }
 0x61a   : > { %4870 = vrcp.f32 %v2716_v56  ;;  %v4859_v26 = vpop.eup %4858  ;;  %v2742_v23 = vmul.f32 %v4857_v51, %v6878_v19  ;;  %v4147_v19 = vld [vmem:[%s6838_s1 + $0x38] sm:$0xff] }
 0x61b   : > { %v4861_v44 = vpop.eup %4860  ;;  %v2741_v28 = vmul.f32 %v4859_v26, %v6879_v22  ;;  %v2765_v36 = vcombine.low %v2737_v27, %v2739_v46  ;;  %v2764_v32 = vrot.slane %v2757_v63, %v5450_v33  ;;  %v2854_v63 = vld [vmem:[%s6108_s21 + $0x8] sm:$0xff]  ;;  %v4146_v27 = vld [vmem:[%s6838_s1 + $0x30] sm:$0xff] }
 0x61c   : > { %v4863_v29 = vpop.eup %4862  ;;  %v2807_v43 = vcombine.low %v2742_v23, %v2744_v55  ;;  %v2747_v17 = vmul.f32 %v4861_v44, %v6880_v14  ;;  %v2853_v26 = vld [vmem:[%s6108_s21] sm:$0xff]  ;;  %v2855_v57 = vld [vmem:[%s6108_s21 + $0x10] sm:$0xff] }
 0x61d   : > { %v4865_v7 = vpop.eup %4864  ;;  %v2738_v52 = vmul.f32 %v4863_v29, %v6881_v21  ;;  %v2799_v62 = vcombine.low %v2741_v28, %v2743_v18  ;;  %v2772_v11 = vrot.slane %v2765_v36, %v5450_v33  ;;  %v2781_v1 = vcombine.low %v2756_v54, %v2764_v32  ;;  %v2856_v29 = vld [vmem:[%s6108_s21 + $0x18] sm:$0xff]  ;;  %v6886_v18 = vld [vmem:[#allocation9_spill] sm:$0xff] }
 0x61e   : > { %v2745_v49 = vmul.f32 %v4865_v7, %v6883_v16  ;;  %v2814_v10 = vrot.slane %v2807_v43, %v5450_v33  ;;  %v6888_v54 = vmov 0.0  }
 0x61f   : > { %v2806_v47 = vrot.slane %v2799_v62, %v5450_v33  ;;  %v2788_v35 = vrot.slane %v2781_v1, %v5455_v59 }
 0x620   : > { %v4867_v38 = vpop.eup %4866  ;;  %v2815_v48 = vcombine.low %v2745_v49, %v2747_v17 }
 0x621   : > { %v2740_v30 = vmul.f32 %v4867_v38, %v6882_v4  ;;  %v4869_v37 = vpop.eup %4868  ;;  %v2831_v0 = vcombine.low %v2806_v47, %v2814_v10 }
 0x622   : > { %v2746_v42 = vmul.f32 %v4869_v37, %v6884_v12  ;;  %v2822_v25 = vrot.slane %v2815_v48, %v5450_v33 }
 0x623   : > { %v2773_v31 = vcombine.low %v2738_v52, %v2740_v30  ;;  %v2838_v8 = vrot.slane %v2831_v0, %v5455_v59 }
 0x624   : > { %v4871_v40 = vpop.eup %4870 }
 0x625   : > { %v2748_v34 = vmul.f32 %v4871_v40, %v6885_v13  ;;  %v2780_v24 = vrot.slane %v2773_v31, %v5450_v33 }
 0x627   : > { %v2823_v20 = vcombine.low %v2746_v42, %v2748_v34  ;;  %v2789_v50 = vcombine.low %v2772_v11, %v2780_v24 }
 0x629   : > { %v2830_v5 = vrot.slane %v2823_v20, %v5450_v33  ;;  %v2796_v60 = vrot.slane %v2789_v50, %v5455_v59 }
 0x62b   : > { %v2797_v56 = vcombine.low %v2788_v35, %v2796_v60  ;;  %v2839_v9 = vcombine.low %v2822_v25, %v2830_v5  ;;  %v2798_v51 = vcombine.high %v2788_v35, %v2796_v60 }
 0x62d   : > { %v2849_v45 = vmul.f32 0.25, %v2797_v56  ;;  %4411 = vmatprep.mubr.msk.f32.mxu1 %vm1508_vm3, %v2797_v56  ;;  %v2846_v58 = vrot.slane %v2839_v9, %v5455_v59  ;;  %v2851_v41 = vmul.f32 0.25, %v2798_v51 }
 0x62f   : > { %v2857_v46 = vadd.f32 %v2853_v26, %v2849_v45  ;;  %v2847_v6 = vcombine.low %v2838_v8, %v2846_v58  ;;  %v2859_v55 = vadd.f32 %v2855_v57, %v2851_v41  ;;  %v2848_v44 = vcombine.high %v2838_v8, %v2846_v58 }
 0x631   : > { %2861 = vst.msk [vmem:[%s6108_s21] sm:$0xff] %vm1508_vm3, %v2857_v46  ;;  %v2850_v15 = vmul.f32 0.25, %v2847_v6  ;;  %4412 = vmatmul.mubr.msk.f32.vlgmr.msra.gmra.mrb[26].mxu1 %vm1508_vm3, %v2847_v6  ;;  %2863 = vst.msk [vmem:[%s6108_s21 + $0x10] sm:$0xff] %vm1508_vm3, %v2859_v55  ;;  %v2852_v53 = vmul.f32 0.25, %v2848_v44 }
 0x632   : > { %4541 = vmatpush3.bf16.msra.mxu1 %v6870_v2  ;;  %4418 = vmatprep.mubr.msk.f32.mxu1 %vm1508_vm3, %v2798_v51  ;;  %v6887_v2 = vld [vmem:[#allocation10_spill] sm:$0xff] }
 0x633   : > { %v2858_v61 = vadd.f32 %v2854_v63, %v2850_v15  ;;  %4543 = vmatprep.subr.bf16.mxu1 %v6886_v18  ;;  %v2860_v39 = vadd.f32 %v2856_v29, %v2852_v53 }
 0x635   : > { %2862 = vst.msk [vmem:[%s6108_s21 + $0x8] sm:$0xff] %vm1508_vm3, %v2858_v61  ;;  %2864 = vst.msk [vmem:[%s6108_s21 + $0x18] sm:$0xff] %vm1508_vm3, %v2860_v39  ;;  %4419 = vmatmul.mubr.msk.f32.vlgmr.msra.gmra.mrb[28].mxu1 %vm1508_vm3, %v2848_v44 }
 0x636   : > { %4429 = vmatprep.mubr.f32.mxu1 %v4146_v27 }
 0x63b   : > { %4545 = vmatpush3.bf16.xpose.msra.mxu1 %v6886_v18 }
 0x63c   : > { %4547 = vmatprep.subr.bf16.mxu1 %v6887_v2 }
 0x643   : > { %4549 = vmatpush3.bf16.xpose.msra.mxu1 %v6887_v2 }
 0x64a   : > { %4430 = vmatmul.mubr.f32.vlgmr.msra.gmra.mrb[30].mxu1 %v4147_v19 }
 0x6d5   : > { %v6252_v23 = vpop.f32.mrb[18].mxu1 }
 0x6d6   : > { %v6254_v7 = vpop.f32.mrb[19].mxu1 }
 0x6d9   : > { %v6256_v3 = vpop.f32.mrb[20].mxu1 }
 0x6da   : > { %v6258_v38 = vpop.f32.mrb[21].mxu1 }
 0x6e5   : > { %v6260_v22 = vpop.f32.mrb[22].mxu1 }
 0x6e6   : > { %v6262_v28 = vpop.f32.mrb[23].mxu1 }
 0x6e9   : > { %v6264_v36 = vpop.f32.mrb[24].mxu1 }
 0x6ea   : > { %v6266_v43 = vpop.f32.mrb[25].mxu1 }
 0x704   : > { %v6268_v14 = vpop.f32.mrb[26].mxu1 }
 0x705   : > { %v6270_v17 = vpop.f32.mrb[27].mxu1 }
 0x708   : > { %v6272_v21 = vpop.f32.mrb[28].mxu1 }
 0x709   : > { %v6274_v52 = vpop.f32.mrb[29].mxu1 }
 0x71d   : > { %v4431_v4 = vpop.f32.mrb[30].mxu1 }
 0x71e   : > { %3113 = vrot.lane.b32.xlu1 %v4431_v4, %s5033_s12  ;;  %v3100_v30 = vpop.f32.mrb[31].mxu1  ;;  %v3190_v37 = vrot.slane %v4431_v4, %v5450_v33  ;;  %v3183_v12 = vcombine.high %v4431_v4, %v6888_v54 }
 0x71f   : > { %3111 = vrot.lane.b32.xlu0 %v3100_v30, %s5033_s12  ;;  %v3124_v49 = vrot.slane %v3100_v30, %v5450_v33  ;;  %v3117_v5 = vcombine.high %v3100_v30, %v6888_v54  ;;  %s4940_s12 = sshll.u32 %s5036_s30, 4  ;;  %s4941_s12 = int_to_ptr.vmem [resolvable:$false] %s4940_s12 }
 0x720   : > { %v3197_v25 = vrot.slane %v3183_v12, %v5450_v33  ;;  %s4942_s11 = scalar_lea.vmem %s4941_s12, 1024  ;;  %p4943_p0 = scmp.lt.s32.totalorder %s6703_s0, %s4941_s12 }
 0x721   : > { %v3131_v8 = vrot.slane %v3117_v5, %v5450_v33  ;;  %p4944_p1 = scmp.lt.s32.totalorder %s4942_s11, %s4936_s29 }
 0x723   : > { %p4945_p2 = por %p4944_p1, %p4943_p0 }
 0x725   : > { %p4946_p3 = pnand %p4945_p2, %p4939_p13 }
 0x790   : > { %v3114_v32 = vpop.permute.xlu1 %3113 }
 0x791   : > { %v3205_v62 = vrot.slane %v3114_v32, %v5450_v33  ;;  %v3112_v16 = vpop.permute.xlu0 %3111  ;;  %v3198_v40 = vcombine.high %v3114_v32, %v6888_v54 }
 0x792   : > { %v3139_v31 = vrot.slane %v3112_v16, %v5450_v33  ;;  %v3132_v20 = vcombine.high %v3112_v16, %v6888_v54 }
 0x793   : > { %v3213_v10 = vcombine.low %v3190_v37, %v3205_v62  ;;  %v3214_v48 = vcombine.high %v3190_v37, %v3205_v62  ;;  %v3212_v34 = vrot.slane %v3198_v40, %v5450_v33 }
 0x794   : > { %v3147_v11 = vcombine.low %v3124_v49, %v3139_v31  ;;  %v3148_v1 = vcombine.high %v3124_v49, %v3139_v31  ;;  %v3146_v9 = vrot.slane %v3132_v20, %v5450_v33 }
 0x795   : > { %v3221_v42 = vrot.slane %v3213_v10, %v5455_v59  ;;  %v6290_v24 = vrot.slane %v3214_v48, %v5455_v59  ;;  %v3229_v35 = vcombine.low %v3197_v25, %v3212_v34  ;;  %v3230_v61 = vcombine.high %v3197_v25, %v3212_v34 }
 0x796   : > { %v6286_v13 = vrot.slane %v3147_v11, %v5455_v59  ;;  %v6300_v60 = vrot.slane %v3148_v1, %v5455_v59  ;;  %v3163_v26 = vcombine.low %v3131_v8, %v3146_v9  ;;  %v3164_v44 = vcombine.high %v3131_v8, %v3146_v9 }
 0x797   : > { %v3273_v47 = vsel %vm1227_vm2, %v3221_v42, -inf  ;;  %v3245_v0 = vcombine.high %v3221_v42, %v6888_v54  ;;  %v3279_v56 = vsel %vm1227_vm2, %v6290_v24, -inf  ;;  %v3246_v45 = vcombine.high %v6290_v24, %v6888_v54 }
 0x798   : > { %3274 = vmax.xlane.f32.xlu0 %v3273_v47  ;;  %v3249_v50 = vsel %vm1227_vm2, %v6286_v13, -inf  ;;  %v3255_v58 = vsel %vm1227_vm2, %v6300_v60, -inf  ;;  %v6312_v41 = vrot.slane %v3229_v35, %v5455_v59  ;;  %v6317_v46 = vcombine.high %v6300_v60, %v6888_v54 }
 0x799   : > { %3250 = vmax.xlane.f32.xlu1 %v3249_v50  ;;  %v3276_v51 = vsel %vm1227_vm2, %v3245_v0, -inf  ;;  %v3282_v57 = vsel %vm1227_vm2, %v3246_v45, -inf  ;;  %v6323_v55 = vcombine.high %v6286_v13, %v6888_v54  ;;  %v6332_v63 = vrot.slane %v3163_v26, %v5455_v59 }
 0x79a   : > { %v3285_v6 = vsel %vm1227_vm2, %v6312_v41, -inf  ;;  %v3258_v15 = vsel %vm1227_vm2, %v6317_v46, -inf  ;;  %v6329_v53 = vcombine.high %v6312_v41, %v6888_v54  ;;  %v6343_v27 = vrot.slane %v3164_v44, %v5455_v59 }
 0x79b   : > { %v3252_v29 = vsel %vm1227_vm2, %v6323_v55, -inf  ;;  %v6340_v39 = vcombine.high %v6332_v63, %v6888_v54  ;;  %v3261_v2 = vsel %vm1227_vm2, %v6332_v63, -inf  ;;  %v6354_v30 = vrot.slane %v3230_v61, %v5455_v59 }
 0x79c   : > { %3280 = vmax.xlane.f32.xlu0 %v3279_v56  ;;  %v3288_v18 = vsel %vm1227_vm2, %v6329_v53, -inf  ;;  %v6351_v4 = vcombine.high %v6343_v27, %v6888_v54  ;;  %v3267_v32 = vsel %vm1227_vm2, %v6343_v27, -inf }
 0x79d   : > { %3277 = vmax.xlane.f32.xlu1 %v3276_v51  ;;  %v3264_v19 = vsel %vm1227_vm2, %v6340_v39, -inf  ;;  %v6362_v62 = vcombine.high %v6354_v30, %v6888_v54  ;;  %v3291_v16 = vsel %vm1227_vm2, %v6354_v30, -inf }
 0x79e   : > { %v3270_v37 = vsel %vm1227_vm2, %v6351_v4, -inf }
 0x79f   : > { %v3294_v49 = vsel %vm1227_vm2, %v6362_v62, -inf }
 0x7a0   : > { %3256 = vmax.xlane.f32.xlu0 %v3255_v58 }
 0x7a1   : > { %3283 = vmax.xlane.f32.xlu1 %v3282_v57 }
 0x7a4   : > { %3286 = vmax.xlane.f32.xlu0 %v3285_v6 }
 0x7a5   : > { %3259 = vmax.xlane.f32.xlu1 %v3258_v15 }
 0x7a8   : > { %3253 = vmax.xlane.f32.xlu0 %v3252_v29 }
 0x7a9   : > { %3289 = vmax.xlane.f32.xlu1 %v3288_v18 }
 0x7ac   : > { %3262 = vmax.xlane.f32.xlu0 %v3261_v2 }
 0x7ad   : > { %3265 = vmax.xlane.f32.xlu1 %v3264_v19 }
 0x7b0   : > { %3268 = vmax.xlane.f32.xlu0 %v3267_v32 }
 0x7b1   : > { %3271 = vmax.xlane.f32.xlu1 %v3270_v37 }
 0x7b4   : > { %3292 = vmax.xlane.f32.xlu0 %v3291_v16 }
 0x7b5   : > { %3295 = vmax.xlane.f32.xlu1 %v3294_v49 }
 0x825   : > { %v3275_v31 = vpop.xlane.xlu0 %3274 }
 0x826   : > { %v3305_v40 = vsub.f32 %v3221_v42, %v3275_v31  ;;  %v3251_v10 = vpop.xlane.xlu1 %3250 }
 0x827   : > { %v3297_v11 = vsub.f32 %v6286_v13, %v3251_v10 }
 0x828   : > { %v3329_v48 = vmul.f32 1.442695, %v3305_v40 }
 0x829   : > { %v3281_v12 = vpop.xlane.xlu0 %3280  ;;  %v3313_v47 = vmul.f32 1.442695, %v3297_v11 }
 0x82a   : > { %4872 = vpow2.f32 %v3329_v48  ;;  %v3307_v54 = vsub.f32 %v6290_v24, %v3281_v12  ;;  %v3278_v34 = vpop.xlane.xlu1 %3277 }
 0x82b   : > { %v3306_v1 = vsub.f32 %v3245_v0, %v3278_v34 }
 0x82c   : > { %v3333_v20 = vmul.f32 1.442695, %v3307_v54 }
 0x82d   : > { %v3331_v50 = vmul.f32 1.442695, %v3306_v1  ;;  %v3257_v25 = vpop.xlane.xlu0 %3256 }
 0x82e   : > { %4874 = vpow2.f32 %v3333_v20  ;;  %v3299_v5 = vsub.f32 %v6300_v60, %v3257_v25  ;;  %v3284_v35 = vpop.xlane.xlu1 %3283 }
 0x82f   : > { %4876 = vpow2.f32 %v3331_v50  ;;  %v3308_v42 = vsub.f32 %v3246_v45, %v3284_v35 }
 0x830   : > { %4878 = vpow2.f32 %v3313_v47  ;;  %v3317_v56 = vmul.f32 1.442695, %v3299_v5 }
 0x831   : > { %v3335_v9 = vmul.f32 1.442695, %v3308_v42  ;;  %v3287_v13 = vpop.xlane.xlu0 %3286 }
 0x832   : > { %v3309_v51 = vsub.f32 %v6312_v41, %v3287_v13  ;;  %v3260_v8 = vpop.xlane.xlu1 %3259 }
 0x833   : > { %4880 = vpow2.f32 %v3335_v9  ;;  %v3300_v58 = vsub.f32 %v6317_v46, %v3260_v8 }
 0x834   : > { %v6372_v24 = vpop.eup %4872  ;;  %4882 = vpow2.f32 %v3317_v56  ;;  %v3337_v0 = vmul.f32 1.442695, %v3309_v51 }
 0x835   : > { %v3254_v26 = vpop.xlane.xlu0 %3253  ;;  %v3369_v60 = vsel %vm1227_vm2, %v6372_v24, 0.0  ;;  %v3319_v41 = vmul.f32 1.442695, %v3300_v58 }
 0x836   : > { %v3298_v45 = vsub.f32 %v6323_v55, %v3254_v26  ;;  %v3290_v57 = vpop.xlane.xlu1 %3289  ;;  %3370 = vadd.xlane.f32.xlu0 %v3369_v60  ;;  %4884 = vpow2.f32 %v3337_v0 }
 0x837   : > { %v3310_v15 = vsub.f32 %v6329_v53, %v3290_v57 }
 0x838   : > { %v6378_v6 = vpop.eup %4874  ;;  %v3315_v44 = vmul.f32 1.442695, %v3298_v45 }
 0x839   : > { %v6381_v29 = vpop.eup %4876  ;;  %v3263_v61 = vpop.xlane.xlu0 %3262  ;;  %v3375_v46 = vsel %vm1227_vm2, %v6378_v6, 0.0  ;;  %v3339_v32 = vmul.f32 1.442695, %v3310_v15 }
 0x83a   : > { %v6385_v18 = vpop.eup %4878  ;;  %4886 = vpow2.f32 %v3315_v44  ;;  %v3301_v55 = vsub.f32 %v6332_v63, %v3263_v61  ;;  %3376 = vadd.xlane.f32.xlu0 %v3375_v46  ;;  %v3266_v2 = vpop.xlane.xlu1 %3265  ;;  %v3372_v19 = vsel %vm1227_vm2, %v6381_v29, 0.0  ;;  %v3771_v61 = vld [vmem:[%s6801_s7 + $0x180] sm:$0xff]  ;;  %v3772_v46 = vld [vmem:[%s6801_s7 + $0x188] sm:$0xff] }
 0x83b   : > { %3373 = vadd.xlane.f32.xlu1 %v3372_v19  ;;  %4888 = vpow2.f32 %v3319_v41  ;;  %v3302_v37 = vsub.f32 %v6340_v39, %v3266_v2  ;;  %v3345_v31 = vsel %vm1227_vm2, %v6385_v18, 0.0  ;;  %v4590_v2 = vpack.c.bf16 %v3772_v46, %v3771_v61  ;;  %v3756_v19 = vld [vmem:[%s6801_s7 + $0x108] sm:$0xff]  ;;  %v3766_v61 = vld [vmem:[%s6801_s7 + $0x158] sm:$0xff]  ;;  %v3783_v46 = vld [vmem:[%s6801_s7 + $0x1e0] sm:$0xff] }
 0x83c   : > { %v3321_v53 = vmul.f32 1.442695, %v3301_v55  ;;  %v3755_v55 = vld [vmem:[%s6801_s7 + $0x100] sm:$0xff] }
 0x83d   : > { %v6391_v16 = vpop.eup %4880  ;;  %v3269_v49 = vpop.xlane.xlu0 %3268  ;;  %v3323_v11 = vmul.f32 1.442695, %v3302_v37  ;;  %v4592_v37 = vpack.c.bf16 %v3756_v19, %v3755_v55  ;;  %4591 = vmatprep.subr.bf16.mxu1 %v4590_v2  ;;  %v3784_v55 = vld [vmem:[%s6801_s7 + $0x1e8] sm:$0xff] }
 0x83e   : > { %v6395_v40 = vpop.eup %4882  ;;  %4890 = vpow2.f32 %v3321_v53  ;;  %v3303_v63 = vsub.f32 %v6343_v27, %v3269_v49  ;;  %3346 = vadd.xlane.f32.xlu0 %v3345_v31  ;;  %v3272_v10 = vpop.xlane.xlu1 %3271  ;;  %v3378_v48 = vsel %vm1227_vm2, %v6391_v16, 0.0  ;;  %v3774_v53 = vld [vmem:[%s6801_s7 + $0x198] sm:$0xff]  ;;  %v3757_v31 = vld [vmem:[%s6801_s7 + $0x110] sm:$0xff] }
 0x83f   : > { %3379 = vadd.xlane.f32.xlu1 %v3378_v48  ;;  %4892 = vpow2.f32 %v3339_v32  ;;  %v3304_v12 = vsub.f32 %v6351_v4, %v3272_v10  ;;  %v3351_v34 = vsel %vm1227_vm2, %v6395_v40, 0.0  ;;  %v3773_v32 = vld [vmem:[%s6801_s7 + $0x190] sm:$0xff]  ;;  %v3775_v10 = vld [vmem:[%s6801_s7 + $0x1a0] sm:$0xff]  ;;  %v3776_v48 = vld [vmem:[%s6801_s7 + $0x1a8] sm:$0xff]  ;;  %4593 = vmatpush3.bf16.msra.mxu1 %v4592_v37 }
 0x840   : > { %v3325_v39 = vmul.f32 1.442695, %v3303_v63  ;;  %v6403_v1 = vpop.eup %4884  ;;  %v4594_v49 = vpack.c.bf16 %v3774_v53, %v3773_v32  ;;  %v3758_v63 = vld [vmem:[%s6801_s7 + $0x118] sm:$0xff]  ;;  %v4614_v32 = vpack.c.bf16 %v3784_v55, %v3783_v46  ;;  %v3767_v53 = vld [vmem:[%s6801_s7 + $0x160] sm:$0xff]  ;;  %v3768_v37 = vld [vmem:[%s6801_s7 + $0x168] sm:$0xff] }
 0x841   : > { %v3293_v54 = vpop.xlane.xlu0 %3292  ;;  %v3327_v50 = vmul.f32 1.442695, %v3304_v12  ;;  %v3381_v4 = vsel %vm1227_vm2, %v6403_v1, 0.0  ;;  %v3759_v12 = vld [vmem:[%s6801_s7 + $0x120] sm:$0xff] }
 0x842   : > { %4894 = vpow2.f32 %v3325_v39  ;;  %v3311_v27 = vsub.f32 %v6354_v30, %v3293_v54  ;;  %3352 = vadd.xlane.f32.xlu0 %v3351_v34  ;;  %v3296_v47 = vpop.xlane.xlu1 %3295  ;;  %4595 = vmatprep.subr.bf16.mxu1 %v4594_v49  ;;  %v4598_v39 = vpack.c.bf16 %v3776_v48, %v3775_v10  ;;  %v3760_v54 = vld [vmem:[%s6801_s7 + $0x128] sm:$0xff]  ;;  %v3777_v34 = vld [vmem:[%s6801_s7 + $0x1b0] sm:$0xff]  ;;  %v4616_v10 = vpack.c.bf16 %v3768_v37, %v3767_v53 }
 0x843   : > { %4896 = vpow2.f32 %v3323_v11  ;;  %v3312_v5 = vsub.f32 %v6362_v62, %v3296_v47  ;;  %v4596_v11 = vpack.c.bf16 %v3758_v63, %v3757_v31  ;;  %v4600_v47 = vpack.c.bf16 %v3760_v54, %v3759_v12  ;;  %v3785_v49 = vld [vmem:[%s6801_s7 + $0x1f0] sm:$0xff]  ;;  %v3786_v31 = vld [vmem:[%s6801_s7 + $0x1f8] sm:$0xff] }
 0x844   : > { %v6406_v20 = vpop.eup %4886  ;;  %v3341_v25 = vmul.f32 1.442695, %v3311_v27  ;;  %v3778_v27 = vld [vmem:[%s6801_s7 + $0x1b8] sm:$0xff]  ;;  %v4618_v48 = vpack.c.bf16 %v3786_v31, %v3785_v49 }
 0x845   : > { %v3348_v35 = vsel %vm1227_vm2, %v6406_v20, 0.0  ;;  %v6413_v42 = vpop.eup %4888  ;;  %v3343_v56 = vmul.f32 1.442695, %v3312_v5  ;;  %4597 = vmatpush3.bf16.msra.mxu1 %v4596_v11  ;;  %v3762_v5 = vld [vmem:[%s6801_s7 + $0x138] sm:$0xff] }
 0x846   : > { %4898 = vpow2.f32 %v3341_v25  ;;  %3382 = vadd.xlane.f32.xlu0 %v3381_v4  ;;  %3349 = vadd.xlane.f32.xlu1 %v3348_v35  ;;  %v3354_v62 = vsel %vm1227_vm2, %v6413_v42, 0.0  ;;  %v3761_v25 = vld [vmem:[%s6801_s7 + $0x130] sm:$0xff]  ;;  %v3779_v4 = vld [vmem:[%s6801_s7 + $0x1c0] sm:$0xff]  ;;  %v3780_v35 = vld [vmem:[%s6801_s7 + $0x1c8] sm:$0xff] }
 0x847   : > { %4900 = vpow2.f32 %v3327_v50  ;;  %4599 = vmatprep.subr.bf16.mxu1 %v4598_v39  ;;  %v4602_v50 = vpack.c.bf16 %v3778_v27, %v3777_v34 }
 0x848   : > { %v6415_v30 = vpop.eup %4890  ;;  %4902 = vpow2.f32 %v3343_v56  ;;  %v4604_v56 = vpack.c.bf16 %v3762_v5, %v3761_v25 }
 0x849   : > { %v3357_v9 = vsel %vm1227_vm2, %v6415_v30, 0.0  ;;  %v6421_v13 = vpop.eup %4892  ;;  %4601 = vmatpush3.bf16.msra.mxu1 %v4600_v47 }
 0x84a   : > { %3358 = vadd.xlane.f32.xlu0 %v3357_v9  ;;  %3355 = vadd.xlane.f32.xlu1 %v3354_v62  ;;  %v3384_v0 = vsel %vm1227_vm2, %v6421_v13, 0.0  ;;  %v4606_v9 = vpack.c.bf16 %v3780_v35, %v3779_v4  ;;  %v3763_v62 = vld [vmem:[%s6801_s7 + $0x140] sm:$0xff] }
 0x84b   : > { %4603 = vmatprep.subr.bf16.mxu1 %v4602_v50 }
 0x84c   : > { %v6423_v51 = vpop.eup %4894 }
 0x84d   : > { %v3363_v8 = vsel %vm1227_vm2, %v6423_v51, 0.0  ;;  %v6429_v58 = vpop.eup %4896  ;;  %4605 = vmatpush3.bf16.msra.mxu1 %v4604_v56 }
 0x84e   : > { %3364 = vadd.xlane.f32.xlu0 %v3363_v8  ;;  %3385 = vadd.xlane.f32.xlu1 %v3384_v0  ;;  %v3360_v45 = vsel %vm1227_vm2, %v6429_v58, 0.0  ;;  %v3764_v8 = vld [vmem:[%s6801_s7 + $0x148] sm:$0xff]  ;;  %v3781_v0 = vld [vmem:[%s6801_s7 + $0x1d0] sm:$0xff] }
 0x84f   : > { %4607 = vmatprep.subr.bf16.mxu1 %v4606_v9 }
 0x850   : > { %v6431_v26 = vpop.eup %4898 }
 0x851   : > { %v3387_v60 = vsel %vm1227_vm2, %v6431_v26, 0.0  ;;  %v6437_v57 = vpop.eup %4900 }
 0x852   : > { %3388 = vadd.xlane.f32.xlu0 %v3387_v60  ;;  %3361 = vadd.xlane.f32.xlu1 %v3360_v45  ;;  %v3366_v41 = vsel %vm1227_vm2, %v6437_v57, 0.0  ;;  %v6441_v44 = vpop.eup %4902  ;;  %v3782_v60 = vld [vmem:[%s6801_s7 + $0x1d8] sm:$0xff]  ;;  %v4608_v45 = vpack.c.bf16 %v3764_v8, %v3763_v62 }
 0x853   : > { %v3390_v15 = vsel %vm1227_vm2, %v6441_v44, 0.0 }
 0x854   : > { %4609 = vmatpush3.bf16.msra.mxu1 %v4608_v45 }
 0x856   : > { %3367 = vadd.xlane.f32.xlu1 %v3366_v41  ;;  %v4610_v41 = vpack.c.bf16 %v3782_v60, %v3781_v0 }
 0x858   : > { %4611 = vmatprep.subr.bf16.mxu1 %v4610_v41 }
 0x85a   : > { %3391 = vadd.xlane.f32.xlu1 %v3390_v15  ;;  %v3765_v15 = vld [vmem:[%s6801_s7 + $0x150] sm:$0xff] }
 0x85b   : > { %v4612_v19 = vpack.c.bf16 %v3766_v61, %v3765_v15 }
 0x85d   : > { %4613 = vmatpush3.bf16.msra.mxu1 %v4612_v19 }
 0x85e   : > { %4615 = vmatprep.subr.bf16.mxu1 %v4614_v32 }
 0x861   : > { %4617 = vmatpush3.bf16.msra.mxu1 %v4616_v10 }
 0x862   : > { %4619 = vmatprep.subr.bf16.mxu1 %v4618_v48 }
 0x8c3   : > { %v3371_v2 = vpop.xlane.xlu0 %3370 }
 0x8c4   : > { %4904 = vrcp.f32 %v3371_v2 }
 0x8c7   : > { %v3377_v63 = vpop.xlane.xlu0 %3376 }
 0x8c8   : > { %v3374_v11 = vpop.xlane.xlu1 %3373  ;;  %4906 = vrcp.f32 %v3377_v63 }
 0x8cb   : > { %v3347_v39 = vpop.xlane.xlu0 %3346 }
 0x8cc   : > { %v3380_v12 = vpop.xlane.xlu1 %3379 }
 0x8ce   : > { %v4905_v56 = vpop.eup %4904 }
 0x8cf   : > { %v3353_v54 = vpop.xlane.xlu0 %3352 }
 0x8d2   : > { %v4907_v9 = vpop.eup %4906 }
 0x8d3   : > { %v3383_v34 = vpop.xlane.xlu0 %3382  ;;  %v3350_v27 = vpop.xlane.xlu1 %3349 }
 0x8d7   : > { %v3359_v47 = vpop.xlane.xlu0 %3358  ;;  %v3356_v50 = vpop.xlane.xlu1 %3355 }
 0x8d8   : > { %4908 = vrcp.f32 %v3356_v50 }
 0x8d9   : > { %4910 = vrcp.f32 %v3353_v54 }
 0x8da   : > { %4912 = vrcp.f32 %v3350_v27 }
 0x8db   : > { %v3365_v25 = vpop.xlane.xlu0 %3364  ;;  %v3386_v5 = vpop.xlane.xlu1 %3385  ;;  %4914 = vrcp.f32 %v3347_v39 }
 0x8dc   : > { %4916 = vrcp.f32 %v3380_v12  ;;  %v3417_v12 = vmul.f32 %v4905_v56, %v6372_v24 }
 0x8dd   : > { %4918 = vrcp.f32 %v3365_v25 }
 0x8de   : > { %4920 = vrcp.f32 %v3374_v11 }
 0x8df   : > { %v3389_v4 = vpop.xlane.xlu0 %3388  ;;  %v3362_v35 = vpop.xlane.xlu1 %3361  ;;  %4922 = vrcp.f32 %v3359_v47 }
 0x8e0   : > { %4924 = vrcp.f32 %v3389_v4 }
 0x8e1   : > { %4926 = vrcp.f32 %v3362_v35 }
 0x8e2   : > { %v4909_v62 = vpop.eup %4908  ;;  %4928 = vrcp.f32 %v3383_v34 }
 0x8e3   : > { %v3368_v8 = vpop.xlane.xlu1 %3367  ;;  %v4911_v0 = vpop.eup %4910  ;;  %v3412_v41 = vmul.f32 %v4909_v62, %v6413_v42  ;;  %v3419_v42 = vmul.f32 %v4907_v9, %v6378_v6 }
 0x8e4   : > { %4930 = vrcp.f32 %v3368_v8  ;;  %v4913_v60 = vpop.eup %4912  ;;  %v3411_v55 = vmul.f32 %v4911_v0, %v6395_v40 }
 0x8e5   : > { %4932 = vrcp.f32 %v3386_v5  ;;  %v4915_v45 = vpop.eup %4914  ;;  %v3410_v2 = vmul.f32 %v4913_v60, %v6406_v20  ;;  %v3475_v47 = vcombine.low %v3417_v12, %v3419_v42  ;;  %v3724_v42 = vld [vmem:[%s6801_s7 + $0x8] sm:$0xff]  ;;  %v3532_v12 = vld [vmem:[%s6108_s21 + $0x18] sm:$0xff] }
 0x8e6   : > { %v4917_v15 = vpop.eup %4916  ;;  %v3409_v53 = vmul.f32 %v4915_v45, %v6385_v18 }
 0x8e7   : > { %v3392_v61 = vpop.xlane.xlu1 %3391  ;;  %v4919_v46 = vpop.eup %4918  ;;  %v3420_v37 = vmul.f32 %v4917_v15, %v6391_v16  ;;  %v3433_v49 = vcombine.low %v3410_v2, %v3412_v41  ;;  %v3739_v15 = vld [vmem:[%s6801_s7 + $0x80] sm:$0xff] }
 0x8e8   : > { %4934 = vrcp.f32 %v3392_v61  ;;  %v4921_v19 = vpop.eup %4920  ;;  %v3415_v63 = vmul.f32 %v4919_v46, %v6423_v51  ;;  %v3425_v11 = vcombine.low %v3409_v53, %v3411_v55  ;;  %v3740_v61 = vld [vmem:[%s6801_s7 + $0x88] sm:$0xff] }
 0x8e9   : > { %v4923_v32 = vpop.eup %4922  ;;  %v3418_v48 = vmul.f32 %v4921_v19, %v6381_v29  ;;  %v3440_v18 = vrot.slane %v3433_v49, %v5450_v33  ;;  %v3529_v19 = vld [vmem:[%s6108_s21] sm:$0xff]  ;;  %v4558_v53 = vpack.c.bf16 %v3740_v61, %v3739_v15  ;;  %v3752_v15 = vld [vmem:[%s6801_s7 + $0xe8] sm:$0xff] }
 0x8ea   : > { %v4925_v31 = vpop.eup %4924  ;;  %v3413_v20 = vmul.f32 %v4923_v32, %v6415_v30  ;;  %v3432_v29 = vrot.slane %v3425_v11, %v5450_v33  ;;  %v3531_v32 = vld [vmem:[%s6108_s21 + $0x10] sm:$0xff] }
 0x8eb   : > { %v4927_v10 = vpop.eup %4926  ;;  %v3483_v54 = vcombine.low %v3418_v48, %v3420_v37  ;;  %v3423_v27 = vmul.f32 %v4925_v31, %v6431_v26  ;;  %v3742_v48 = vld [vmem:[%s6801_s7 + $0x98] sm:$0xff] }
 0x8ec   : > { %v4929_v40 = vpop.eup %4928  ;;  %v3441_v34 = vcombine.low %v3413_v20, %v3415_v63  ;;  %v3414_v51 = vmul.f32 %v4927_v10, %v6429_v58  ;;  %v3457_v4 = vcombine.low %v3432_v29, %v3440_v18  ;;  %v3723_v10 = vld [vmem:[%s6801_s7] sm:$0xff]  ;;  %v3530_v20 = vld [vmem:[%s6108_s21 + $0x8] sm:$0xff] }
 0x8ed   : > { %v3421_v50 = vmul.f32 %v4929_v40, %v6403_v1  ;;  %v3490_v24 = vrot.slane %v3483_v54, %v5450_v33  ;;  %v4560_v54 = vpack.c.bf16 %v3724_v42, %v3723_v10 }
 0x8ee   : > { %v4931_v39 = vpop.eup %4930  ;;  %v3448_v26 = vrot.slane %v3441_v34, %v5450_v33 }
 0x8ef   : > { %v4933_v16 = vpop.eup %4932  ;;  %v3416_v6 = vmul.f32 %v4931_v39, %v6437_v57  ;;  %v3491_v35 = vcombine.low %v3421_v50, %v3423_v27  ;;  %v3482_v57 = vrot.slane %v3475_v47, %v5450_v33  ;;  %v6889_v39 = vld [vmem:[#allocation16_spill] sm:$0xff]  ;;  %v3725_v27 = vld [vmem:[%s6801_s7 + $0x10] sm:$0xff]  ;;  %v3744_v47 = vld [vmem:[%s6801_s7 + $0xa8] sm:$0xff] }
 0x8f0   : > { %v3422_v5 = vmul.f32 %v4933_v16, %v6421_v13  ;;  %v3464_v13 = vrot.slane %v3457_v4, %v5455_v59 }
 0x8f1   : > { %v3449_v30 = vcombine.low %v3414_v51, %v3416_v6  ;;  %v3507_v1 = vcombine.low %v3482_v57, %v3490_v24  ;;  %v3498_v8 = vrot.slane %v3491_v35, %v5450_v33  ;;  %v3726_v51 = vld [vmem:[%s6801_s7 + $0x18] sm:$0xff]  ;;  %v3743_v6 = vld [vmem:[%s6801_s7 + $0xa0] sm:$0xff]  ;;  %v3745_v24 = vld [vmem:[%s6801_s7 + $0xb0] sm:$0xff] }
 0x8f2   : > { %v4935_v25 = vpop.eup %4934  ;;  %v4564_v29 = vpack.c.bf16 %v3726_v51, %v3725_v27  ;;  %v4566_v50 = vpack.c.bf16 %v3744_v47, %v3743_v6  ;;  %v3729_v35 = vld [vmem:[%s6801_s7 + $0x30] sm:$0xff] }
 0x8f3   : > { %v3424_v56 = vmul.f32 %v4935_v25, %v6441_v44  ;;  %v3456_v58 = vrot.slane %v3449_v30, %v5450_v33  ;;  %v3727_v30 = vld [vmem:[%s6801_s7 + $0x20] sm:$0xff]  ;;  %v3728_v25 = vld [vmem:[%s6801_s7 + $0x28] sm:$0xff] }
 0x8f5   : > { %v3499_v9 = vcombine.low %v3422_v5, %v3424_v56  ;;  %v3465_v62 = vcombine.low %v3448_v26, %v3456_v58  ;;  %v3746_v5 = vld [vmem:[%s6801_s7 + $0xb8] sm:$0xff]  ;;  %v3747_v26 = vld [vmem:[%s6801_s7 + $0xc0] sm:$0xff]  ;;  %v3748_v58 = vld [vmem:[%s6801_s7 + $0xc8] sm:$0xff] }
 0x8f6   : > { %v4570_v4 = vpack.c.bf16 %v3746_v5, %v3745_v24  ;;  %v3730_v56 = vld [vmem:[%s6801_s7 + $0x38] sm:$0xff] }
 0x8f7   : > { %v3506_v0 = vrot.slane %v3499_v9, %v5450_v33  ;;  %v3472_v60 = vrot.slane %v3465_v62, %v5455_v59  ;;  %v3514_v33 = vrot.slane %v3507_v1, %v5455_v59  ;;  %v4572_v57 = vpack.c.bf16 %v3730_v56, %v3729_v35  ;;  %v3731_v62 = vld [vmem:[%s6801_s7 + $0x40] sm:$0xff]  ;;  %v3732_v1 = vld [vmem:[%s6801_s7 + $0x48] sm:$0xff] }
 0x8f8   : > { %v4574_v9 = vpack.c.bf16 %v3748_v58, %v3747_v26 }
 0x8f9   : > { %v3473_v44 = vcombine.low %v3464_v13, %v3472_v60  ;;  %v3515_v45 = vcombine.low %v3498_v8, %v3506_v0  ;;  %v3474_v41 = vcombine.high %v3464_v13, %v3472_v60  ;;  %v3749_v8 = vld [vmem:[%s6801_s7 + $0xd0] sm:$0xff]  ;;  %v3750_v0 = vld [vmem:[%s6801_s7 + $0xd8] sm:$0xff]  ;;  %v4576_v13 = vpack.c.bf16 %v3732_v1, %v3731_v62 }
 0x8fa   : > { %v4578_v60 = vpack.c.bf16 %v3750_v0, %v3749_v8 }
 0x8fb   : > { %v3525_v46 = vmul.f32 0.25, %v3473_v44  ;;  %4436 = vmatprep.mubr.msk.f32.mxu0 %vm1508_vm3, %v3473_v44  ;;  %v3522_v55 = vrot.slane %v3515_v45, %v5455_v59  ;;  %v3527_v2 = vmul.f32 0.25, %v3474_v41  ;;  %v3741_v59 = vld [vmem:[%s6801_s7 + $0x90] sm:$0xff]  ;;  %v3734_v45 = vld [vmem:[%s6801_s7 + $0x58] sm:$0xff] }
 0x8fc   : > { %v4562_v34 = vpack.c.bf16 %v3742_v48, %v3741_v59  ;;  %v3733_v44 = vld [vmem:[%s6801_s7 + $0x50] sm:$0xff] }
 0x8fd   : > { %v3533_v37 = vadd.f32 %v3529_v19, %v3525_v46  ;;  %v3523_v49 = vcombine.low %v3514_v33, %v3522_v55  ;;  %v3535_v31 = vadd.f32 %v3531_v32, %v3527_v2  ;;  %v3524_v63 = vcombine.high %v3514_v33, %v3522_v55  ;;  %v3735_v33 = vld [vmem:[%s6801_s7 + $0x60] sm:$0xff]  ;;  %v3736_v55 = vld [vmem:[%s6801_s7 + $0x68] sm:$0xff]  ;;  %v3753_v2 = vld [vmem:[%s6801_s7 + $0xf0] sm:$0xff] }
 0x8fe   : > { %v4580_v61 = vpack.c.bf16 %v3734_v45, %v3733_v44  ;;  %v3754_v19 = vld [vmem:[%s6801_s7 + $0xf8] sm:$0xff]  ;;  %v4584_v32 = vpack.c.bf16 %v3736_v55, %v3735_v33 }
 0x8ff   : > { %3537 = vst.msk [vmem:[%s6108_s21] sm:$0xff] %vm1508_vm3, %v3533_v37  ;;  %v3526_v11 = vmul.f32 0.25, %v3523_v49  ;;  %4437 = vmatmul.mubr.msk.f32.vlgmr.msra.gmra.mrb[24].mxu0 %vm1508_vm3, %v3523_v49  ;;  %3539 = vst.msk [vmem:[%s6108_s21 + $0x10] sm:$0xff] %vm1508_vm3, %v3535_v31  ;;  %v3528_v40 = vmul.f32 0.25, %v3524_v63  ;;  %v3737_v37 = vld [vmem:[%s6801_s7 + $0x70] sm:$0xff]  ;;  %v3738_v49 = vld [vmem:[%s6801_s7 + $0x78] sm:$0xff] }
 0x900   : > { %4557 = vmatpush3.bf16.msra.mxu0 %v6889_v39  ;;  %4443 = vmatprep.mubr.msk.f32.mxu0 %vm1508_vm3, %v3474_v41  ;;  %v3751_v41 = vld [vmem:[%s6801_s7 + $0xe0] sm:$0xff]  ;;  %v4588_v31 = vpack.c.bf16 %v3738_v49, %v3737_v37 }
 0x901   : > { %v3534_v18 = vadd.f32 %v3530_v20, %v3526_v11  ;;  %4559 = vmatprep.subr.bf16.mxu0 %v4558_v53  ;;  %v3536_v16 = vadd.f32 %v3532_v12, %v3528_v40  ;;  %v4582_v46 = vpack.c.bf16 %v3752_v15, %v3751_v41  ;;  %v4586_v53 = vpack.c.bf16 %v3754_v19, %v3753_v2 }
 0x903   : > { %3538 = vst.msk [vmem:[%s6108_s21 + $0x8] sm:$0xff] %vm1508_vm3, %v3534_v18  ;;  %4444 = vmatmul.mubr.msk.f32.vlgmr.msra.gmra.mrb[26].mxu0 %vm1508_vm3, %v3524_v63  ;;  %3540 = vst.msk [vmem:[%s6108_s21 + $0x18] sm:$0xff] %vm1508_vm3, %v3536_v16  ;;  %v3769_v63 = vld [vmem:[%s6801_s7 + $0x170] sm:$0xff] }
 0x904   : > { %4561 = vmatpush3.bf16.msra.mxu0 %v4560_v54  ;;  %3858 = vmatprep.mubr.f32.mxu0 %v6262_v28  ;;  %v4568_v28 = vpack.c.bf16 %v3728_v25, %v3727_v30 }
 0x905   : > { %4563 = vmatprep.subr.bf16.mxu0 %v4562_v34 }
 0x908   : > { %4565 = vmatpush3.bf16.msra.mxu0 %v4564_v29 }
 0x909   : > { %4567 = vmatprep.subr.bf16.mxu0 %v4566_v50 }
 0x90c   : > { %4569 = vmatpush3.bf16.msra.mxu0 %v4568_v28 }
 0x90d   : > { %4571 = vmatprep.subr.bf16.mxu0 %v4570_v4 }
 0x910   : > { %4573 = vmatpush3.bf16.msra.mxu0 %v4572_v57 }
 0x911   : > { %4575 = vmatprep.subr.bf16.mxu0 %v4574_v9 }
 0x914   : > { %4577 = vmatpush3.bf16.msra.mxu0 %v4576_v13 }
 0x915   : > { %4579 = vmatprep.subr.bf16.mxu0 %v4578_v60 }
 0x918   : > { %4581 = vmatpush3.bf16.msra.mxu0 %v4580_v61 }
 0x919   : > { %4583 = vmatprep.subr.bf16.mxu0 %v4582_v46 }
 0x91c   : > { %4585 = vmatpush3.bf16.msra.mxu0 %v4584_v32 }
 0x91d   : > { %4587 = vmatprep.subr.bf16.mxu0 %v4586_v53 }
 0x920   : > { %4589 = vmatpush3.bf16.msra.mxu0 %v4588_v31 }
 0x923   : > { %3859 = vmatmul.mubr.f32.vlgmr.msra.gmra.mrb[28].mxu0 %v6254_v7  ;;  %v3770_v7 = vld [vmem:[%s6801_s7 + $0x178] sm:$0xff] }
 0x924   : > { %3863 = vmatprep.mubr.f32.mxu0 %v6260_v22  ;;  %v4620_v10 = vpack.c.bf16 %v3770_v7, %v3769_v63 }
 0x926   : > { %4621 = vmatpush3.bf16.msra.mxu1 %v4620_v10 }
 0x927   : > { %3864 = vmatmul.mubr.f32.gmra.mrb[30].mxu0 %v6252_v23 }
 0x928   : > { %3868 = vmatprep.mubr.f32.mxu0 %v6266_v43 }
 0x92b   : > { %3869 = vmatmul.mubr.f32.gmra.mrb[32].mxu0 %v6258_v38 }
 0x92c   : > { %3873 = vmatprep.mubr.f32.mxu0 %v6264_v36 }
 0x92f   : > { %3874 = vmatmul.mubr.f32.gmra.mrb[34].mxu0 %v6256_v3 }
 0x9d2   : > { %v4438_v22 = vpop.f32.mrb[24].mxu0 }
 0x9d3   : > { %v3613_v23 = vpop.f32.mrb[25].mxu0 }
 0x9d4   : > { %3943 = vmatprep.mubr.f32.mxu1 %v3613_v23 }
 0x9d5   : > { %3944 = vmatmul.mubr.f32.vlgmr.msra.gmra.mrb[32].mxu1 %v6270_v17 }
 0x9d6   : > { %v4445_v38 = vpop.f32.mrb[26].mxu0  ;;  %3948 = vmatprep.mubr.f32.mxu1 %v4438_v22 }
 0x9d7   : > { %v3694_v36 = vpop.f32.mrb[27].mxu0 }
 0x9d9   : > { %3949 = vmatmul.mubr.f32.gmra.mrb[34].mxu1 %v6268_v14 }
 0x9da   : > { %3953 = vmatprep.mubr.f32.mxu1 %v3694_v36 }
 0x9dd   : > { %3954 = vmatmul.mubr.f32.gmra.mrb[36].mxu1 %v6274_v52 }
 0x9de   : > { %3958 = vmatprep.mubr.f32.mxu1 %v4445_v38 }
 0x9e1   : > { %3959 = vmatmul.mubr.f32.gmra.mrb[38].mxu1 %v6272_v21 }
 0x9f6   : > { %v4268_v3 = vpop.f32.mrb[28].mxu0 }
 0x9f7   : > { %v4269_v43 = vpop.f32.mrb[29].mxu0 }
 0x9f8   : > { %v4270_v42 = vadd.f32 %v4269_v43, %v4268_v3 }
 0x9fa   : > { %v4271_v59 = vpop.f32.mrb[30].mxu0 }
 0x9fb   : > { %v4272_v17 = vpop.f32.mrb[31].mxu0 }
 0x9fc   : > { %v4273_v48 = vadd.f32 %v4272_v17, %v4271_v59 }
 0x9fe   : > { %v4274_v11 = vpop.f32.mrb[32].mxu0 }
 0x9ff   : > { %v4275_v40 = vpop.f32.mrb[33].mxu0 }
 0xa00   : > { %v4276_v14 = vadd.f32 %v4275_v40, %v4274_v11 }
 0xa02   : > { %v4277_v20 = vpop.f32.mrb[34].mxu0 }
 0xa03   : > { %v4278_v39 = vpop.f32.mrb[35].mxu0 }
 0xa04   : > { %v4279_v12 = vadd.f32 %v4278_v39, %v4277_v20 }
 0xa05   : > { %4949 = shalt.err (!%p4946_p3)
}
 0xa06   : > { %s4950_s21 = scalar_lea.hbm %s6700_s27, 512  ;;  %s4954_s1 = scalar_lea.hbm %s6804_s10, 1024 }
 0xa07   : > { %p4951_p4 = scmp.ne.s32.totalorder %s6700_s27, %s4950_s21  ;;  %p4955_p9 = scmp.lt.u32.totalorder %s6700_s27, %s6804_s10 }
 0xa08   : > { %p4956_p10 = scmp.lt.u32.totalorder %s4954_s1, %s4950_s21  ;;  %p4958_p12 = scmp.lt.u32.totalorder %s4950_s21, %s6700_s27 }
 0xa09   : > { %p4952_p7 = pnand %p4951_p4, %p5133_p5 }
 0xa0a   : > { %p4957_p11 = por %p4956_p10, %p4955_p9 }
 0xa0b   : > { %p4953_p8 = pneg %p4952_p7 }
 0xa0c   : > { %p4959_p13 = por %p4958_p12, %p4957_p11 }
 0xa0e   : > { %p4960_p0 = pnand %p4959_p13, %p4953_p8 }
 0xa10   : > { %4963 = shalt.err (!%p4960_p0)
}
 0xa11   : > { %s5037_s29 = smov 128   ;;  %s5038_s11 = smov 8   ;;  %v4152_v21 = vld [vmem:[%s6802_s8] ss:$0 sm:$0xff] }
 0xa12   : > { %4623 = dma.vmem_to_hbm [thread:$0]  (%p5133_p5), %s6703_s0, 512, %s6700_s27, %s3974_s28, %s5037_s29, %s5037_s29, %s5038_s11   ;;  %v3861_v18 = vadd.f32 %v4270_v42, %v4152_v21  ;;  %v3866_v6 = vadd.f32 %v4273_v48, %v4152_v21  ;;  %v3871_v25 = vadd.f32 %v4276_v14, %v4152_v21  ;;  %v3876_v35 = vadd.f32 %v4279_v12, %v4152_v21 }
 0xa13   : > { %s6890_s21 = sshll.u32 %s6080_s18, 5  ;;  %s6745_s30 = scalar_lea.hbm %s6803_s9, %s4165_s20 }
 0xa14   : > { %s359_s1 = scalar_lea.vmem [#allocation3], %s6890_s21  ;;  %s3969_s12 = scalar_lea.sflag [#allocation4], %s6080_s18 }
 0xa15   : > { %s3988_s27 = sshll.u32 %s359_s1, 4  ;;  %s5039_s26 = smov [#allocation3]   ;;  %s6747_s27 = int_to_ptr.vmem [resolvable:$true] %s3988_s27 }
 0xa16   : > { %s4964_s25 = scalar_lea.vmem %s6747_s27, 512  ;;  %s4968_s17 = sshll.u32 %s5039_s26, 4  ;;  %s4969_s17 = int_to_ptr.vmem [resolvable:$false] %s4968_s17 }
 0xa17   : > { %p4965_p1 = scmp.ne.s32.totalorder %s6747_s27, %s4964_s25  ;;  %s4970_s21 = scalar_lea.vmem %s4969_s17, 1024 }
 0xa18   : > { %p4971_p4 = scmp.lt.s32.totalorder %s6747_s27, %s4969_s17  ;;  %p4972_p7 = scmp.lt.s32.totalorder %s4970_s21, %s4964_s25 }
 0xa19   : > { %p4966_p2 = pnand %p4965_p1, %p5133_p5 }
 0xa1a   : > { %p4973_p8 = por %p4972_p7, %p4971_p4 }
 0xa1b   : > { %p4967_p3 = pneg %p4966_p2 }
 0xa1d   : > { %p4974_p9 = pnand %p4973_p8, %p4967_p3 }
 0xaa8   : > { %v4312_v52 = vpop.f32.mrb[32].mxu1 }
 0xaa9   : > { %v4313_v54 = vpop.f32.mrb[33].mxu1 }
 0xaaa   : > { %v4314_v16 = vadd.f32 %v4313_v54, %v4312_v52 }
 0xaac   : > { %v3946_v34 = vadd.f32 %v4314_v16, %v3861_v18  ;;  %v4315_v27 = vpop.f32.mrb[34].mxu1 }
 0xaad   : > { %v4316_v51 = vpop.f32.mrb[35].mxu1 }
 0xaae   : > { %3964 = vst.msk [vmem:[%s359_s1] sm:$0xff] %vm486_vm1, %v3946_v34  ;;  %v4317_v47 = vadd.f32 %v4316_v51, %v4315_v27 }
 0xab0   : > { %v3951_v29 = vadd.f32 %v4317_v47, %v3866_v6  ;;  %v4318_v50 = vpop.f32.mrb[36].mxu1 }
 0xab1   : > { %v4319_v30 = vpop.f32.mrb[37].mxu1 }
 0xab2   : > { %3965 = vst.msk [vmem:[%s359_s1 + $0x8] sm:$0xff] %vm486_vm1, %v3951_v29  ;;  %v4320_v24 = vadd.f32 %v4319_v30, %v4318_v50 }
 0xab4   : > { %v3956_v5 = vadd.f32 %v4320_v24, %v3871_v25  ;;  %v4321_v28 = vpop.f32.mrb[38].mxu1 }
 0xab5   : > { %v4322_v4 = vpop.f32.mrb[39].mxu1 }
 0xab6   : > { %3966 = vst.msk [vmem:[%s359_s1 + $0x10] sm:$0xff] %vm486_vm1, %v3956_v5  ;;  %v4323_v56 = vadd.f32 %v4322_v4, %v4321_v28 }
 0xab8   : > { %v3961_v26 = vadd.f32 %v4323_v56, %v3876_v35 }
 0xaba   : > { %3967 = vst.msk [vmem:[%s359_s1 + $0x18] sm:$0xff] %vm486_vm1, %v3961_v26 }
 0xabb   : > { %4977 = shalt.err (!%p4974_p9)
}
 0xabc   : > { %s4978_s20 = scalar_lea.hbm %s6745_s30, 512  ;;  %s4982_s28 = scalar_lea.hbm %s6803_s9, 1024 }
 0xabd   : > { %p4979_p10 = scmp.ne.s32.totalorder %s6745_s30, %s4978_s20  ;;  %p4983_p13 = scmp.lt.u32.totalorder %s6745_s30, %s6803_s9 }
 0xabe   : > { %p4984_p0 = scmp.lt.u32.totalorder %s4982_s28, %s4978_s20  ;;  %p4986_p2 = scmp.lt.u32.totalorder %s4978_s20, %s6745_s30 }
 0xabf   : > { %p4980_p11 = pnand %p4979_p10, %p5133_p5 }
 0xac0   : > { %p4985_p1 = por %p4984_p0, %p4983_p13 }
 0xac1   : > { %p4981_p12 = pneg %p4980_p11 }
 0xac2   : > { %p4987_p3 = por %p4986_p2, %p4985_p1 }
 0xac4   : > { %p4988_p4 = pnand %p4987_p3, %p4981_p12 }
 0xac6   : > { %4991 = shalt.err (!%p4988_p4)
}
 0xac7   : > { %4622 = dma.vmem_to_hbm [thread:$0]  (%p5133_p5), %s6747_s27, 512, %s6745_s30, %s3969_s12, %s5037_s29, %s5037_s29, %s5038_s11  }
 0xac8 PF: > { %p4633_p7 = scmp.ge.s32.totalorder %s5030_s16, 2  ;;  %s4020_s25 = sand.u32 1, %s5018_s13  }
 0xac9   : > { %s4021_s21 = scalar_lea.sflag [#allocation4], %s4020_s25 }
 0xaca   : > { %p4627_p8 = pnand %p4633_p7, %p5137_p6 }
 0xacc   : > { %5009 = dma.done.wait (!%p4627_p8), %s4021_s21, 512  }
 0xacd   : > { %5011 = vsyncadd (!%p4627_p8), %s4021_s21, 4294966784  ;;  %s4030_s23 = scalar_lea.sflag [#allocation6], %s4020_s25 }
 0xace   : > { %5013 = dma.done.wait (!%p4627_p8), %s4030_s23, 512  }
 0xacf   : > { %5015 = vsyncadd (!%p4627_p8), %s4030_s23, 4294966784  ;;  %p24_p5 = scmp.ge.s32.totalorder %s5120_s19, 4   ;;  %s6891_s13 = smov %s5022_s14 }
 0xad0   : > { %s6892_s14 = smov %s5026_s15  ;;  %s6893_s15 = smov %s5131_s22 }
 0xad1   : > { %s6894_s16 = smov %s5120_s19  ;;  %26 = sbr.rel (!%p24_p5) target bundleno = 8 (0x8), region = 111 }
 0xad8   :  { %4035 = vsyncpa [#allocation4], 1 }
 0xad9   :  { %4037 = vsyncpa [#allocation4 + $0x1], 1 }
 0xada   :  { %4038 = vsyncpa [#allocation6], 1 }
 0xadb   :  { %4040 = vsyncpa [#allocation6 + $0x1], 1 }

</bundles_post_ra>
